<compile_context>
chip_gen: v6e
topology: v6e:2x2x1
jax: 0.10.0
libtpu: 0.0.40
codegen_flags: <defaults>
</compile_context>

<pallas_src>
import functools

import jax
import jax.numpy as jnp
import numpy as np
from jax.experimental import pallas as pl
from jax.experimental.pallas import tpu as pltpu


# ---------------------------------------------------------------------------
# Pallas kernel: one BCConvBlock for one batch chunk (Nb samples, lane-folded).
# ---------------------------------------------------------------------------
def _bc_block_kernel(x_ref, tw_ref, tb_ref, fw_ref, fb_ref, ssn_s_ref, ssn_b_ref,
                     dtw_ref, dtb_ref, bn_s_ref, bn_b_ref, pw_ref, pb_ref,
                     tmask_ref, o_ref,
                     *, has_transition, f_ks, t_ks, f_dil, t_dil, f_stride, p_f):
    x = x_ref[...].astype(jnp.float32)                   # (F_pad, C_in, L)
    F_pad, C_in, L = x.shape
    F_out, C_out, _ = o_ref.shape

    # ---- optional 1x1 transition conv: batched (over F) matmul on the MXU ----
    if has_transition:
        # tw_ref: (F_pad, C_out, C_in)  pre-broadcast over F by the wrapper.
        # tb_ref: (F_pad, C_out, 1)     bias zeroed in the frequency halo rows,
        #                               so the padded rows stay exactly 0.
        y = jax.lax.dot_general(
            tw_ref[...], x,
            dimension_numbers=(((2,), (1,)), ((0,), (0,))),
            preferred_element_type=jnp.float32)           # (F_pad, C_out, L)
        y = y + tb_ref[...]
    else:
        y = x                                             # C_in == C_out

    # ---- f2: depthwise frequency conv + SubSpectralNorm (folded) -------------
    # Zero padding along F was applied outside the kernel, so each tap is a
    # static slice along the leading (tile) dimension -- no sublane relayout.
    fw = fw_ref[...]                                      # (f_ks, 1, C_out, 1)
    f2 = None
    for k in range(f_ks):
        start = k * f_dil
        if f_stride == 1:
            tap = y[start:start + F_out]
        else:
            limit = start + (F_out - 1) * f_stride + 1
            tap = jax.lax.slice(y, (start, 0, 0), (limit, C_out, L),
                                (f_stride, 1, 1))
        term = fw[k] * tap
        f2 = term if f2 is None else f2 + term
    f2 = f2 + fb_ref[...]                                 # (1, C_out, 1)
    f2 = f2 * ssn_s_ref[...] + ssn_b_ref[...]             # SSN: (F_out, C_out, 1)

    # ---- f1: freq-mean, temporal depthwise conv, BN, SiLU, 1x1 conv ----------
    m = jnp.mean(f2, axis=0)                              # (C_out, L)
    dtw = dtw_ref[...]                                    # (t_ks, C_out, 1)
    tmask = tmask_ref[...]                                # (t_ks, 1, L) 0/1 float
    p_t = (t_ks - 1) * t_dil // 2
    u = None
    for k in range(t_ks):
        d = k * t_dil - p_t                               # source offset m[:, l + d]
        if d == 0:
            term = dtw[k] * m
        else:
            # XLU lane rotation + precomputed validity mask replaces in-kernel
            # zero-padding / lane concatenation of m.
            shifted = pltpu.roll(m, shift=(-d) % L, axis=1)
            term = dtw[k] * (shifted * tmask[k])
        u = term if u is None else u + term
    u = u + dtb_ref[...]                                  # depthwise bias (C_out, 1)
    u = u * bn_s_ref[...] + bn_b_ref[...]                 # BatchNorm2d (eval, folded)
    u = u * jax.nn.sigmoid(u)                             # SiLU
    v = jnp.dot(pw_ref[...], u,
                preferred_element_type=jnp.float32) + pb_ref[...]   # MXU 1x1 conv
    # Dropout2d: identity in eval mode.

    res = v[None, :, :] + f2                              # broadcast over frequency
    if not has_transition:
        res = res + y[p_f:p_f + F_out]                    # residual connection
    o_ref[...] = res.astype(o_ref.dtype)


# ---------------------------------------------------------------------------
# Wrapper: one BCConvBlock in the internal (F, C, N*T) layout
# ---------------------------------------------------------------------------
def _choose_batch_block(n, t, per_sample_bytes, target_bytes=4 << 20):
    """Largest divisor nb of n whose tile fits the VMEM budget while keeping the
    lane dimension either the full N*T extent or a multiple of 128."""
    best = n
    for nb in range(n, 0, -1):
        if n % nb:
            continue
        lane_ok = (nb == n) or ((nb * t) % 128 == 0)
        if not lane_ok:
            continue
        if nb * per_sample_bytes <= target_bytes:
            return nb
        best = nb
    return best


def bc_conv_block_core(xt, p, *, T, has_transition, f_ks, t_ks, f_stride, t_stride,
                       f_dil, t_dil):
    F_in, C_in, L_total = xt.shape
    assert L_total % T == 0
    N = L_total // T
    C_out = p["pw_w"].shape[0]

    p_f = (f_ks - 1) * f_dil // 2
    F_pad = F_in + 2 * p_f
    F_out = (F_pad - f_dil * (f_ks - 1) - 1) // f_stride + 1
    p_t = (t_ks - 1) * t_dil // 2
    assert t_stride == 1, "broadcast add f1+f2 requires t_stride == 1"
    T_out = (T + 2 * p_t - t_dil * (t_ks - 1) - 1) // t_stride + 1
    assert T_out == T, "f1/f2 time dims must match for the broadcast add"
    if not has_transition:
        assert C_in == C_out and F_out == F_in, "residual add requires matching shapes"

    # Frequency zero-padding applied once, outside the kernel (leading dim).
    xp = jnp.pad(xt, ((p_f, p_f), (0, 0), (0, 0)))

    # Per-tap temporal validity masks (precomputed host-side): 1 where the rolled
    # source time index stays inside the same sample, 0 in the padding region.
    t_of_lane = jnp.tile(jnp.arange(T, dtype=jnp.int32), N)
    tmask = jnp.stack(
        [((t_of_lane + (k * t_dil - p_t) >= 0) &
          (t_of_lane + (k * t_dil - p_t) < T)).astype(jnp.float32)
         for k in range(t_ks)], axis=0)[:, None, :]        # (t_ks, 1, N*T)

    # Transition weights pre-broadcast over the padded frequency axis (batched
    # MXU matmul); bias zeroed in the halo rows (PyTorch pads the conv *output*).
    if has_transition:
        tw = jnp.broadcast_to(p["trans_w"][None], (F_pad, C_out, C_in))
        tb = jnp.pad(jnp.broadcast_to(p["trans_b"], (F_in, C_out, 1)),
                     ((p_f, p_f), (0, 0), (0, 0)))
    else:
        tw = jnp.zeros((1, 1, 1), jnp.float32)
        tb = jnp.zeros((1, 1, 1), jnp.float32)

    per_sample_bytes = 4 * T * (C_in * F_pad + 2 * C_out * F_out + 4 * C_out)
    Nb = _choose_batch_block(N, T, per_sample_bytes)
    Lb = Nb * T
    grid = (N // Nb,)

    params = [tw, tb, p["fw"], p["fb"], p["ssn_s"], p["ssn_b"],
              p["dtw"], p["dtb"], p["bn_s"], p["bn_b"], p["pw_w"], p["pw_b"]]

    def const_spec(a):
        nd = a.ndim
        return pl.BlockSpec(a.shape, lambda i, _nd=nd: (0,) * _nd)

    kernel = functools.partial(
        _bc_block_kernel, has_transition=has_transition, f_ks=f_ks, t_ks=t_ks,
        f_dil=f_dil, t_dil=t_dil, f_stride=f_stride, p_f=p_f)

    return pl.pallas_call(
        kernel,
        out_shape=jax.ShapeDtypeStruct((F_out, C_out, L_total), jnp.float32),
        grid_spec=pltpu.PrefetchScalarGridSpec(
            num_scalar_prefetch=0,
            grid=grid,
            in_specs=[pl.BlockSpec((F_pad, C_in, Lb), lambda i: (0, 0, i))]
                     + [const_spec(a) for a in params]
                     + [pl.BlockSpec((t_ks, 1, Lb), lambda i: (0, 0, i))],
            out_specs=pl.BlockSpec((F_out, C_out, Lb), lambda i: (0, 0, i)),
        ),
        compiler_params=pltpu.CompilerParams(
            dimension_semantics=("parallel",),        # batch chunks are independent
            vmem_limit_bytes=32 * 1024 * 1024),
    )(xp, *params, tmask)


def bc_conv_blocks_forward(x, blocks, cfgs):
    """x: (N, C, F, T) -> (N, C_out, F_out, T).  Keeps the activations in the
    TPU-friendly (F, C, N*T) layout between consecutive pallas_calls."""
    N, C, F, T = x.shape
    h = jnp.transpose(x, (2, 1, 0, 3)).reshape(F, C, N * T)
    for p, cfg in zip(blocks, cfgs):
        h = bc_conv_block_core(h, p, T=T, **cfg)
    F_out, C_out, _ = h.shape
    return jnp.transpose(h.reshape(F_out, C_out, N, T), (2, 1, 0, 3))


def bc_conv_block(x, p, **cfg):
    """Single-block convenience wrapper (NCFT in, NCFT out)."""
    return bc_conv_blocks_forward(x, [p], [cfg])


# ---------------------------------------------------------------------------
# Deterministic parameter construction (matches nn.Module __init__ shapes)
# ---------------------------------------------------------------------------
def _fold_bn(gamma, beta, mean, var, eps=1e-5):
    scale = gamma / jnp.sqrt(var + eps)
    bias = beta - mean * scale
    return scale, bias


def init_block_params(key, in_c, out_c, f_ks, t_ks, num_subbands, F_out):
    assert F_out % num_subbands == 0
    ks = jax.random.split(key, 16)
    p = {}
    # transition Conv2d(in_c, out_c, 1)
    p["trans_w"] = 0.1 * jax.random.normal(ks[0], (out_c, in_c), jnp.float32)
    p["trans_b"] = (0.05 * jax.random.normal(ks[1], (out_c,), jnp.float32)).reshape(1, out_c, 1)
    # f2 depthwise freq Conv2d(out_c, out_c, (f_ks,1), groups=out_c)
    p["fw"] = (0.3 * jax.random.normal(ks[2], (out_c, f_ks), jnp.float32)).T.reshape(f_ks, 1, out_c, 1)
    p["fb"] = (0.05 * jax.random.normal(ks[3], (out_c,), jnp.float32)).reshape(1, out_c, 1)
    # SubSpectralNorm = BatchNorm2d(out_c * num_subbands), eval-mode folded, per-frequency
    S = num_subbands
    gamma = 1.0 + 0.1 * jax.random.normal(ks[4], (out_c * S,), jnp.float32)
    beta = 0.1 * jax.random.normal(ks[5], (out_c * S,), jnp.float32)
    rmean = 0.1 * jax.random.normal(ks[6], (out_c * S,), jnp.float32)
    rvar = 1.0 + 0.2 * jax.random.uniform(ks[7], (out_c * S,), jnp.float32)
    s, b = _fold_bn(gamma, beta, rmean, rvar)
    sub = F_out // S
    p["ssn_s"] = jnp.repeat(s.reshape(out_c, S), sub, axis=1).T[:, :, None]   # (F_out, C, 1)
    p["ssn_b"] = jnp.repeat(b.reshape(out_c, S), sub, axis=1).T[:, :, None]
    # f1 temporal depthwise Conv2d(out_c, out_c, (1,t_ks), groups=out_c)
    p["dtw"] = (0.3 * jax.random.normal(ks[8], (out_c, t_ks), jnp.float32)).T[:, :, None]  # (t_ks, C, 1)
    p["dtb"] = (0.05 * jax.random.normal(ks[9], (out_c,), jnp.float32)).reshape(out_c, 1)
    # BatchNorm2d(out_c), eval folded
    g1 = 1.0 + 0.1 * jax.random.normal(ks[10], (out_c,), jnp.float32)
    b1 = 0.1 * jax.random.normal(ks[11], (out_c,), jnp.float32)
    m1 = 0.1 * jax.random.normal(ks[12], (out_c,), jnp.float32)
    v1 = 1.0 + 0.2 * jax.random.uniform(ks[13], (out_c,), jnp.float32)
    s1, bb1 = _fold_bn(g1, b1, m1, v1)
    p["bn_s"] = s1.reshape(out_c, 1)
    p["bn_b"] = bb1.reshape(out_c, 1)
    # pointwise Conv2d(out_c, out_c, 1)
    p["pw_w"] = 0.1 * jax.random.normal(ks[14], (out_c, out_c), jnp.float32)
    p["pw_b"] = (0.05 * jax.random.normal(ks[15], (out_c,), jnp.float32)).reshape(out_c, 1)
    return p


def build_bc_conv_blocks(key, n, mult, in_c, out_c, f_ks, t_ks, f_stride, t_stride,
                         f_dil, t_dil, num_subbands, dropout, F):
    del dropout  # Dropout2d is the identity in eval mode
    blocks, cfgs = [], []
    cin, fs, ts, Fcur = in_c, f_stride, t_stride, F
    keys = jax.random.split(key, n)
    for i in range(n):
        ci, co = int(cin * mult), int(out_c * mult)
        p_f = (f_ks - 1) * f_dil // 2
        F_out = (Fcur + 2 * p_f - f_dil * (f_ks - 1) - 1) // fs + 1
        blocks.append(init_block_params(keys[i], ci, co, f_ks, t_ks, num_subbands, F_out))
        cfgs.append(dict(has_transition=(ci != co), f_ks=f_ks, t_ks=t_ks,
                         f_stride=fs, t_stride=ts, f_dil=f_dil, t_dil=t_dil))
        cin, fs, ts, Fcur = out_c, 1, 1, F_out
    return blocks, cfgs


# ---------------------------------------------------------------------------
# Pure-JAX reference (same eval-mode math, NCFT layout) for a correctness check
# ---------------------------------------------------------------------------
def _ref_block(x, p, cfg):
    f_ks, t_ks = cfg["f_ks"], cfg["t_ks"]
    f_dil, t_dil = cfg["f_dil"], cfg["t_dil"]
    f_stride, t_stride = cfg["f_stride"], cfg["t_stride"]
    N, C_in, F, T = x.shape
    C_out = p["pw_w"].shape[0]
    if cfg["has_transition"]:
        y = jnp.einsum("oc,ncft->noft", p["trans_w"], x) + p["trans_b"].reshape(1, C_out, 1, 1)
    else:
        y = x
    p_f = (f_ks - 1) * f_dil // 2
    yp = jnp.pad(y, ((0, 0), (0, 0), (p_f, p_f), (0, 0)))
    F_out = (F + 2 * p_f - f_dil * (f_ks - 1) - 1) // f_stride + 1
    f2 = jnp.zeros((N, C_out, F_out, T), jnp.float32)
    for k in range(f_ks):
        s = k * f_dil
        tap = jax.lax.slice(yp, (0, 0, s, 0),
                            (N, C_out, s + (F_out - 1) * f_stride + 1, T),
                            (1, 1, f_stride, 1))
        f2 = f2 + p["fw"][k].reshape(1, C_out, 1, 1) * tap
    f2 = f2 + p["fb"].reshape(1, C_out, 1, 1)
    ssn_s = p["ssn_s"][:, :, 0].T[None, :, :, None]
    ssn_b = p["ssn_b"][:, :, 0].T[None, :, :, None]
    f2 = f2 * ssn_s + ssn_b
    m = jnp.mean(f2, axis=2)                              # (N, C_out, T)
    p_t = (t_ks - 1) * t_dil // 2
    mp = jnp.pad(m, ((0, 0), (0, 0), (p_t, p_t)))
    T_out = (T + 2 * p_t - t_dil * (t_ks - 1) - 1) // t_stride + 1
    u = jnp.zeros((N, C_out, T_out), jnp.float32)
    for k in range(t_ks):
        s = k * t_dil
        tap = jax.lax.slice(mp, (0, 0, s), (N, C_out, s + (T_out - 1) * t_stride + 1),
                            (1, 1, t_stride))
        u = u + p["dtw"][k].reshape(1, C_out, 1) * tap
    u = u + p["dtb"].reshape(1, C_out, 1)
    u = u * p["bn_s"].reshape(1, C_out, 1) + p["bn_b"].reshape(1, C_out, 1)
    u = u * jax.nn.sigmoid(u)
    v = jnp.einsum("oc,nct->not", p["pw_w"], u) + p["pw_b"].reshape(1, C_out, 1)
    res = v[:, :, None, :] + f2
    if not cfg["has_transition"]:
        res = res + y
    return res


if __name__ == "__main__":
    key = jax.random.PRNGKey(0)
    kx, kp = jax.random.split(key)

    # Small shapes consistent with the module's NCHW (N, C, F, T) convention;
    # T=64 gives a lane axis of N*T=128 (one full vreg of lanes) in the kernel.
    N, in_c, out_c, F, T = 2, 4, 16, 16, 64
    n_blocks, mult = 2, 1
    f_ks = t_ks = 3
    f_stride = t_stride = 1
    f_dil = t_dil = 1
    num_subbands = 4
    dropout = 0.1

    x = jax.random.normal(kx, (N, in_c, F, T), jnp.float32)
    blocks, cfgs = build_bc_conv_blocks(kp, n_blocks, mult, in_c, out_c, f_ks, t_ks,
                                        f_stride, t_stride, f_dil, t_dil,
                                        num_subbands, dropout, F)

    fwd = jax.jit(lambda inp: bc_conv_blocks_forward(inp, blocks, cfgs))
    out = jax.block_until_ready(fwd(x))

    # Correctness check against a pure-JAX reference of the same eval-mode math.
    ref = x
    for p, cfg in zip(blocks, cfgs):
        ref = _ref_block(ref, p, cfg)
    np.testing.assert_allclose(np.asarray(out), np.asarray(ref), rtol=2e-3, atol=2e-3)

    print("KERNEL_OK")
</pallas_src>

<mosaic_0001>
module attributes {stable_mosaic.version = 11 : i64} {
  func.func @_bc_block_kernel(%arg0: i32, %arg1: memref<18x4x128xf32, #tpu.memory_space<vmem>>, %arg2: memref<18x16x4xf32, #tpu.memory_space<vmem>>, %arg3: memref<18x16x1xf32, #tpu.memory_space<vmem>>, %arg4: memref<3x1x16x1xf32, #tpu.memory_space<vmem>>, %arg5: memref<1x16x1xf32, #tpu.memory_space<vmem>>, %arg6: memref<16x16x1xf32, #tpu.memory_space<vmem>>, %arg7: memref<16x16x1xf32, #tpu.memory_space<vmem>>, %arg8: memref<3x16x1xf32, #tpu.memory_space<vmem>>, %arg9: memref<16x1xf32, #tpu.memory_space<vmem>>, %arg10: memref<16x1xf32, #tpu.memory_space<vmem>>, %arg11: memref<16x1xf32, #tpu.memory_space<vmem>>, %arg12: memref<16x16xf32, #tpu.memory_space<vmem>>, %arg13: memref<16x1xf32, #tpu.memory_space<vmem>>, %arg14: memref<3x1x128xf32, #tpu.memory_space<vmem>>, %arg15: memref<16x16x128xf32, #tpu.memory_space<vmem>>) attributes {dimension_semantics = [#tpu.dimension_semantics<parallel>], iteration_bounds = array<i64: 1>, scalar_prefetch = 0 : i64, scratch_operands = 0 : i64, tpu.core_type = #tpu.core_type<tc>, window_params = [{transform_indices = @transform_0, window_bounds = array<i64: 18, 4, 128>}, {pipeline_mode = #tpu.pipeline_mode<synchronous>, transform_indices = @transform_1, window_bounds = array<i64: 18, 16, 4>}, {pipeline_mode = #tpu.pipeline_mode<synchronous>, transform_indices = @transform_2, window_bounds = array<i64: 18, 16, 1>}, {pipeline_mode = #tpu.pipeline_mode<synchronous>, transform_indices = @transform_3, window_bounds = array<i64: 3, 1, 16, 1>}, {pipeline_mode = #tpu.pipeline_mode<synchronous>, transform_indices = @transform_4, window_bounds = array<i64: 1, 16, 1>}, {pipeline_mode = #tpu.pipeline_mode<synchronous>, transform_indices = @transform_5, window_bounds = array<i64: 16, 16, 1>}, {pipeline_mode = #tpu.pipeline_mode<synchronous>, transform_indices = @transform_6, window_bounds = array<i64: 16, 16, 1>}, {pipeline_mode = #tpu.pipeline_mode<synchronous>, transform_indices = @transform_7, window_bounds = array<i64: 3, 16, 1>}, {pipeline_mode = #tpu.pipeline_mode<synchronous>, transform_indices = @transform_8, window_bounds = array<i64: 16, 1>}, {pipeline_mode = #tpu.pipeline_mode<synchronous>, transform_indices = @transform_9, window_bounds = array<i64: 16, 1>}, {pipeline_mode = #tpu.pipeline_mode<synchronous>, transform_indices = @transform_10, window_bounds = array<i64: 16, 1>}, {pipeline_mode = #tpu.pipeline_mode<synchronous>, transform_indices = @transform_11, window_bounds = array<i64: 16, 16>}, {pipeline_mode = #tpu.pipeline_mode<synchronous>, transform_indices = @transform_12, window_bounds = array<i64: 16, 1>}, {transform_indices = @transform_13, window_bounds = array<i64: 3, 1, 128>}, {transform_indices = @transform_14, window_bounds = array<i64: 16, 16, 128>}]} {
    %c0 = arith.constant 0 : index
    %c0_0 = arith.constant 0 : index
    %c0_1 = arith.constant 0 : index
    %0 = vector.load %arg1[%c0, %c0_0, %c0_1] : memref<18x4x128xf32, #tpu.memory_space<vmem>>, vector<18x4x128xf32>
    %c0_2 = arith.constant 0 : index
    %c0_3 = arith.constant 0 : index
    %c0_4 = arith.constant 0 : index
    %1 = vector.load %arg2[%c0_2, %c0_3, %c0_4] : memref<18x16x4xf32, #tpu.memory_space<vmem>>, vector<18x16x4xf32>
    %cst = arith.constant dense<0.000000e+00> : vector<18x16x128xf32>
    %2 = tpu.matmul %1, %0, %cst {dimension_numbers = #tpu.dot_dimension_numbers<[2], [1], [1], [2], [0, 0, 0, 1, 1, 2], [0], [0]>} : vector<18x16x4xf32>, vector<18x4x128xf32>, vector<18x16x128xf32> -> vector<18x16x128xf32>
    %c0_5 = arith.constant 0 : index
    %c0_6 = arith.constant 0 : index
    %c0_7 = arith.constant 0 : index
    %3 = vector.load %arg3[%c0_5, %c0_6, %c0_7] : memref<18x16x1xf32, #tpu.memory_space<vmem>>, vector<18x16x1xf32>
    %4 = vector.broadcast %3 : vector<18x16x1xf32> to vector<18x16x128xf32>
    %5 = arith.addf %2, %4 : vector<18x16x128xf32>
    %c0_8 = arith.constant 0 : index
    %c0_9 = arith.constant 0 : index
    %c0_10 = arith.constant 0 : index
    %c0_11 = arith.constant 0 : index
    %6 = vector.load %arg4[%c0_8, %c0_9, %c0_10, %c0_11] : memref<3x1x16x1xf32, #tpu.memory_space<vmem>>, vector<3x1x16x1xf32>
    %7 = vector.extract_strided_slice %5 {offsets = [0, 0, 0], sizes = [16, 16, 128], strides = [1, 1, 1]} : vector<18x16x128xf32> to vector<16x16x128xf32>
    %8 = vector.extract_strided_slice %6 {offsets = [0, 0, 0, 0], sizes = [1, 1, 16, 1], strides = [1, 1, 1, 1]} : vector<3x1x16x1xf32> to vector<1x1x16x1xf32>
    %9 = vector.shape_cast %8 : vector<1x1x16x1xf32> to vector<1x16x1xf32>
    %10 = vector.broadcast %9 : vector<1x16x1xf32> to vector<16x16x128xf32>
    %11 = arith.mulf %10, %7 : vector<16x16x128xf32>
    %12 = vector.extract_strided_slice %5 {offsets = [1, 0, 0], sizes = [16, 16, 128], strides = [1, 1, 1]} : vector<18x16x128xf32> to vector<16x16x128xf32>
    %13 = vector.extract_strided_slice %6 {offsets = [1, 0, 0, 0], sizes = [1, 1, 16, 1], strides = [1, 1, 1, 1]} : vector<3x1x16x1xf32> to vector<1x1x16x1xf32>
    %14 = vector.shape_cast %13 : vector<1x1x16x1xf32> to vector<1x16x1xf32>
    %15 = vector.broadcast %14 : vector<1x16x1xf32> to vector<16x16x128xf32>
    %16 = arith.mulf %15, %12 : vector<16x16x128xf32>
    %17 = arith.addf %11, %16 : vector<16x16x128xf32>
    %18 = vector.extract_strided_slice %5 {offsets = [2, 0, 0], sizes = [16, 16, 128], strides = [1, 1, 1]} : vector<18x16x128xf32> to vector<16x16x128xf32>
    %19 = vector.extract_strided_slice %6 {offsets = [2, 0, 0, 0], sizes = [1, 1, 16, 1], strides = [1, 1, 1, 1]} : vector<3x1x16x1xf32> to vector<1x1x16x1xf32>
    %20 = vector.shape_cast %19 : vector<1x1x16x1xf32> to vector<1x16x1xf32>
    %21 = vector.broadcast %20 : vector<1x16x1xf32> to vector<16x16x128xf32>
    %22 = arith.mulf %21, %18 : vector<16x16x128xf32>
    %23 = arith.addf %17, %22 : vector<16x16x128xf32>
    %c0_12 = arith.constant 0 : index
    %c0_13 = arith.constant 0 : index
    %c0_14 = arith.constant 0 : index
    %24 = vector.load %arg5[%c0_12, %c0_13, %c0_14] : memref<1x16x1xf32, #tpu.memory_space<vmem>>, vector<1x16x1xf32>
    %25 = vector.broadcast %24 : vector<1x16x1xf32> to vector<16x16x128xf32>
    %26 = arith.addf %23, %25 : vector<16x16x128xf32>
    %c0_15 = arith.constant 0 : index
    %c0_16 = arith.constant 0 : index
    %c0_17 = arith.constant 0 : index
    %27 = vector.load %arg6[%c0_15, %c0_16, %c0_17] : memref<16x16x1xf32, #tpu.memory_space<vmem>>, vector<16x16x1xf32>
    %28 = vector.broadcast %27 : vector<16x16x1xf32> to vector<16x16x128xf32>
    %29 = arith.mulf %26, %28 : vector<16x16x128xf32>
    %c0_18 = arith.constant 0 : index
    %c0_19 = arith.constant 0 : index
    %c0_20 = arith.constant 0 : index
    %30 = vector.load %arg7[%c0_18, %c0_19, %c0_20] : memref<16x16x1xf32, #tpu.memory_space<vmem>>, vector<16x16x1xf32>
    %31 = vector.broadcast %30 : vector<16x16x1xf32> to vector<16x16x128xf32>
    %32 = arith.addf %29, %31 : vector<16x16x128xf32>
    %cst_21 = arith.constant dense<0.000000e+00> : vector<16x128xf32>
    %33 = vector.multi_reduction <add>, %32, %cst_21 [0] : vector<16x16x128xf32> to vector<16x128xf32>
    %cst_22 = arith.constant 1.600000e+01 : f32
    %34 = vector.broadcast %cst_22 : f32 to vector<16x128xf32>
    %35 = arith.divf %33, %34 : vector<16x128xf32>
    %c0_23 = arith.constant 0 : index
    %c0_24 = arith.constant 0 : index
    %c0_25 = arith.constant 0 : index
    %36 = vector.load %arg8[%c0_23, %c0_24, %c0_25] : memref<3x16x1xf32, #tpu.memory_space<vmem>>, vector<3x16x1xf32>
    %c0_26 = arith.constant 0 : index
    %c0_27 = arith.constant 0 : index
    %c0_28 = arith.constant 0 : index
    %37 = vector.load %arg14[%c0_26, %c0_27, %c0_28] : memref<3x1x128xf32, #tpu.memory_space<vmem>>, vector<3x1x128xf32>
    %c1_i32 = arith.constant 1 : i32
    %38 = tpu.dynamic_rotate %35 by %c1_i32 dim 1 : vector<16x128xf32>, i32 -> vector<16x128xf32>
    %39 = vector.extract_strided_slice %36 {offsets = [0, 0, 0], sizes = [1, 16, 1], strides = [1, 1, 1]} : vector<3x16x1xf32> to vector<1x16x1xf32>
    %40 = vector.shape_cast %39 : vector<1x16x1xf32> to vector<16x1xf32>
    %41 = vector.extract_strided_slice %37 {offsets = [0, 0, 0], sizes = [1, 1, 128], strides = [1, 1, 1]} : vector<3x1x128xf32> to vector<1x1x128xf32>
    %42 = vector.shape_cast %41 : vector<1x1x128xf32> to vector<1x128xf32>
    %43 = vector.broadcast %42 : vector<1x128xf32> to vector<16x128xf32>
    %44 = arith.mulf %38, %43 : vector<16x128xf32>
    %45 = vector.broadcast %40 : vector<16x1xf32> to vector<16x128xf32>
    %46 = arith.mulf %45, %44 : vector<16x128xf32>
    %47 = vector.extract_strided_slice %36 {offsets = [1, 0, 0], sizes = [1, 16, 1], strides = [1, 1, 1]} : vector<3x16x1xf32> to vector<1x16x1xf32>
    %48 = vector.shape_cast %47 : vector<1x16x1xf32> to vector<16x1xf32>
    %49 = vector.broadcast %48 : vector<16x1xf32> to vector<16x128xf32>
    %50 = arith.mulf %49, %35 : vector<16x128xf32>
    %51 = arith.addf %46, %50 : vector<16x128xf32>
    %c127_i32 = arith.constant 127 : i32
    %52 = tpu.dynamic_rotate %35 by %c127_i32 dim 1 : vector<16x128xf32>, i32 -> vector<16x128xf32>
    %53 = vector.extract_strided_slice %36 {offsets = [2, 0, 0], sizes = [1, 16, 1], strides = [1, 1, 1]} : vector<3x16x1xf32> to vector<1x16x1xf32>
    %54 = vector.shape_cast %53 : vector<1x16x1xf32> to vector<16x1xf32>
    %55 = vector.extract_strided_slice %37 {offsets = [2, 0, 0], sizes = [1, 1, 128], strides = [1, 1, 1]} : vector<3x1x128xf32> to vector<1x1x128xf32>
    %56 = vector.shape_cast %55 : vector<1x1x128xf32> to vector<1x128xf32>
    %57 = vector.broadcast %56 : vector<1x128xf32> to vector<16x128xf32>
    %58 = arith.mulf %52, %57 : vector<16x128xf32>
    %59 = vector.broadcast %54 : vector<16x1xf32> to vector<16x128xf32>
    %60 = arith.mulf %59, %58 : vector<16x128xf32>
    %61 = arith.addf %51, %60 : vector<16x128xf32>
    %c0_29 = arith.constant 0 : index
    %c0_30 = arith.constant 0 : index
    %62 = vector.load %arg9[%c0_29, %c0_30] : memref<16x1xf32, #tpu.memory_space<vmem>>, vector<16x1xf32>
    %63 = vector.broadcast %62 : vector<16x1xf32> to vector<16x128xf32>
    %64 = arith.addf %61, %63 : vector<16x128xf32>
    %c0_31 = arith.constant 0 : index
    %c0_32 = arith.constant 0 : index
    %65 = vector.load %arg10[%c0_31, %c0_32] : memref<16x1xf32, #tpu.memory_space<vmem>>, vector<16x1xf32>
    %66 = vector.broadcast %65 : vector<16x1xf32> to vector<16x128xf32>
    %67 = arith.mulf %64, %66 : vector<16x128xf32>
    %c0_33 = arith.constant 0 : index
    %c0_34 = arith.constant 0 : index
    %68 = vector.load %arg11[%c0_33, %c0_34] : memref<16x1xf32, #tpu.memory_space<vmem>>, vector<16x1xf32>
    %69 = vector.broadcast %68 : vector<16x1xf32> to vector<16x128xf32>
    %70 = arith.addf %67, %69 : vector<16x128xf32>
    %71 = arith.negf %70 : vector<16x128xf32>
    %72 = math.exp %71 : vector<16x128xf32>
    %cst_35 = arith.constant 1.000000e+00 : f32
    %73 = vector.broadcast %cst_35 : f32 to vector<16x128xf32>
    %74 = arith.addf %73, %72 : vector<16x128xf32>
    %75 = arith.divf %73, %74 : vector<16x128xf32>
    %76 = arith.mulf %70, %75 : vector<16x128xf32>
    %c0_36 = arith.constant 0 : index
    %c0_37 = arith.constant 0 : index
    %77 = vector.load %arg12[%c0_36, %c0_37] : memref<16x16xf32, #tpu.memory_space<vmem>>, vector<16x16xf32>
    %cst_38 = arith.constant dense<0.000000e+00> : vector<16x128xf32>
    %78 = tpu.matmul %77, %76, %cst_38 {dimension_numbers = #tpu.dot_dimension_numbers<[1], [0], [0], [1], [0, 0, 1, 1], [], []>} : vector<16x16xf32>, vector<16x128xf32>, vector<16x128xf32> -> vector<16x128xf32>
    %c0_39 = arith.constant 0 : index
    %c0_40 = arith.constant 0 : index
    %79 = vector.load %arg13[%c0_39, %c0_40] : memref<16x1xf32, #tpu.memory_space<vmem>>, vector<16x1xf32>
    %80 = vector.broadcast %79 : vector<16x1xf32> to vector<16x128xf32>
    %81 = arith.addf %78, %80 : vector<16x128xf32>
    %82 = vector.shape_cast %81 : vector<16x128xf32> to vector<1x16x128xf32>
    %83 = vector.broadcast %82 : vector<1x16x128xf32> to vector<16x16x128xf32>
    %84 = arith.addf %83, %32 : vector<16x16x128xf32>
    %c0_41 = arith.constant 0 : index
    %c0_42 = arith.constant 0 : index
    %c0_43 = arith.constant 0 : index
    %85 = vector.load %arg15[%c0_41, %c0_42, %c0_43] : memref<16x16x128xf32, #tpu.memory_space<vmem>>, vector<16x16x128xf32>
    tpu.vector_store %arg15[%c0_41, %c0_42, %c0_43], %84 {strides = array<i32>} : memref<16x16x128xf32, #tpu.memory_space<vmem>>, vector<16x16x128xf32>,
    return
  }
  func.func @transform_0(%arg0: i32) -> (i32, i32, i32) {
    %c0_i32 = arith.constant 0 : i32
    %c0_i32_0 = arith.constant 0 : i32
    %c0_i32_1 = arith.constant 0 : i32
    return %c0_i32, %c0_i32_0, %arg0 : i32, i32, i32
  }
  func.func @transform_1(%arg0: i32) -> (i32, i32, i32) {
    %c0_i32 = arith.constant 0 : i32
    %c0_i32_0 = arith.constant 0 : i32
    %c0_i32_1 = arith.constant 0 : i32
    %c0_i32_2 = arith.constant 0 : i32
    return %c0_i32, %c0_i32_0, %c0_i32_1 : i32, i32, i32
  }
  func.func @transform_2(%arg0: i32) -> (i32, i32, i32) {
    %c0_i32 = arith.constant 0 : i32
    %c0_i32_0 = arith.constant 0 : i32
    %c0_i32_1 = arith.constant 0 : i32
    %c0_i32_2 = arith.constant 0 : i32
    return %c0_i32, %c0_i32_0, %c0_i32_1 : i32, i32, i32
  }
  func.func @transform_3(%arg0: i32) -> (i32, i32, i32, i32) {
    %c0_i32 = arith.constant 0 : i32
    %c0_i32_0 = arith.constant 0 : i32
    %c0_i32_1 = arith.constant 0 : i32
    %c0_i32_2 = arith.constant 0 : i32
    %c0_i32_3 = arith.constant 0 : i32
    return %c0_i32, %c0_i32_0, %c0_i32_1, %c0_i32_2 : i32, i32, i32, i32
  }
  func.func @transform_4(%arg0: i32) -> (i32, i32, i32) {
    %c0_i32 = arith.constant 0 : i32
    %c0_i32_0 = arith.constant 0 : i32
    %c0_i32_1 = arith.constant 0 : i32
    %c0_i32_2 = arith.constant 0 : i32
    return %c0_i32, %c0_i32_0, %c0_i32_1 : i32, i32, i32
  }
  func.func @transform_5(%arg0: i32) -> (i32, i32, i32) {
    %c0_i32 = arith.constant 0 : i32
    %c0_i32_0 = arith.constant 0 : i32
    %c0_i32_1 = arith.constant 0 : i32
    %c0_i32_2 = arith.constant 0 : i32
    return %c0_i32, %c0_i32_0, %c0_i32_1 : i32, i32, i32
  }
  func.func @transform_6(%arg0: i32) -> (i32, i32, i32) {
    %c0_i32 = arith.constant 0 : i32
    %c0_i32_0 = arith.constant 0 : i32
    %c0_i32_1 = arith.constant 0 : i32
    %c0_i32_2 = arith.constant 0 : i32
    return %c0_i32, %c0_i32_0, %c0_i32_1 : i32, i32, i32
  }
  func.func @transform_7(%arg0: i32) -> (i32, i32, i32) {
    %c0_i32 = arith.constant 0 : i32
    %c0_i32_0 = arith.constant 0 : i32
    %c0_i32_1 = arith.constant 0 : i32
    %c0_i32_2 = arith.constant 0 : i32
    return %c0_i32, %c0_i32_0, %c0_i32_1 : i32, i32, i32
  }
  func.func @transform_8(%arg0: i32) -> (i32, i32) {
    %c0_i32 = arith.constant 0 : i32
    %c0_i32_0 = arith.constant 0 : i32
    %c0_i32_1 = arith.constant 0 : i32
    return %c0_i32, %c0_i32_0 : i32, i32
  }
  func.func @transform_9(%arg0: i32) -> (i32, i32) {
    %c0_i32 = arith.constant 0 : i32
    %c0_i32_0 = arith.constant 0 : i32
    %c0_i32_1 = arith.constant 0 : i32
    return %c0_i32, %c0_i32_0 : i32, i32
  }
  func.func @transform_10(%arg0: i32) -> (i32, i32) {
    %c0_i32 = arith.constant 0 : i32
    %c0_i32_0 = arith.constant 0 : i32
    %c0_i32_1 = arith.constant 0 : i32
    return %c0_i32, %c0_i32_0 : i32, i32
  }
  func.func @transform_11(%arg0: i32) -> (i32, i32) {
    %c0_i32 = arith.constant 0 : i32
    %c0_i32_0 = arith.constant 0 : i32
    %c0_i32_1 = arith.constant 0 : i32
    return %c0_i32, %c0_i32_0 : i32, i32
  }
  func.func @transform_12(%arg0: i32) -> (i32, i32) {
    %c0_i32 = arith.constant 0 : i32
    %c0_i32_0 = arith.constant 0 : i32
    %c0_i32_1 = arith.constant 0 : i32
    return %c0_i32, %c0_i32_0 : i32, i32
  }
  func.func @transform_13(%arg0: i32) -> (i32, i32, i32) {
    %c0_i32 = arith.constant 0 : i32
    %c0_i32_0 = arith.constant 0 : i32
    %c0_i32_1 = arith.constant 0 : i32
    return %c0_i32, %c0_i32_0, %arg0 : i32, i32, i32
  }
  func.func @transform_14(%arg0: i32) -> (i32, i32, i32) {
    %c0_i32 = arith.constant 0 : i32
    %c0_i32_0 = arith.constant 0 : i32
    %c0_i32_1 = arith.constant 0 : i32
    return %c0_i32, %c0_i32_0, %arg0 : i32, i32, i32
  }
}

module attributes {stable_mosaic.version = 11 : i64} {
  func.func @_bc_block_kernel(%arg0: i32, %arg1: memref<18x16x128xf32, #tpu.memory_space<vmem>>, %arg2: memref<1x1x1xf32, #tpu.memory_space<vmem>>, %arg3: memref<1x1x1xf32, #tpu.memory_space<vmem>>, %arg4: memref<3x1x16x1xf32, #tpu.memory_space<vmem>>, %arg5: memref<1x16x1xf32, #tpu.memory_space<vmem>>, %arg6: memref<16x16x1xf32, #tpu.memory_space<vmem>>, %arg7: memref<16x16x1xf32, #tpu.memory_space<vmem>>, %arg8: memref<3x16x1xf32, #tpu.memory_space<vmem>>, %arg9: memref<16x1xf32, #tpu.memory_space<vmem>>, %arg10: memref<16x1xf32, #tpu.memory_space<vmem>>, %arg11: memref<16x1xf32, #tpu.memory_space<vmem>>, %arg12: memref<16x16xf32, #tpu.memory_space<vmem>>, %arg13: memref<16x1xf32, #tpu.memory_space<vmem>>, %arg14: memref<3x1x128xf32, #tpu.memory_space<vmem>>, %arg15: memref<16x16x128xf32, #tpu.memory_space<vmem>>) attributes {dimension_semantics = [#tpu.dimension_semantics<parallel>], iteration_bounds = array<i64: 1>, scalar_prefetch = 0 : i64, scratch_operands = 0 : i64, tpu.core_type = #tpu.core_type<tc>, window_params = [{transform_indices = @transform_0, window_bounds = array<i64: 18, 16, 128>}, {pipeline_mode = #tpu.pipeline_mode<synchronous>, transform_indices = @transform_1, window_bounds = array<i64: 1, 1, 1>}, {pipeline_mode = #tpu.pipeline_mode<synchronous>, transform_indices = @transform_2, window_bounds = array<i64: 1, 1, 1>}, {pipeline_mode = #tpu.pipeline_mode<synchronous>, transform_indices = @transform_3, window_bounds = array<i64: 3, 1, 16, 1>}, {pipeline_mode = #tpu.pipeline_mode<synchronous>, transform_indices = @transform_4, window_bounds = array<i64: 1, 16, 1>}, {pipeline_mode = #tpu.pipeline_mode<synchronous>, transform_indices = @transform_5, window_bounds = array<i64: 16, 16, 1>}, {pipeline_mode = #tpu.pipeline_mode<synchronous>, transform_indices = @transform_6, window_bounds = array<i64: 16, 16, 1>}, {pipeline_mode = #tpu.pipeline_mode<synchronous>, transform_indices = @transform_7, window_bounds = array<i64: 3, 16, 1>}, {pipeline_mode = #tpu.pipeline_mode<synchronous>, transform_indices = @transform_8, window_bounds = array<i64: 16, 1>}, {pipeline_mode = #tpu.pipeline_mode<synchronous>, transform_indices = @transform_9, window_bounds = array<i64: 16, 1>}, {pipeline_mode = #tpu.pipeline_mode<synchronous>, transform_indices = @transform_10, window_bounds = array<i64: 16, 1>}, {pipeline_mode = #tpu.pipeline_mode<synchronous>, transform_indices = @transform_11, window_bounds = array<i64: 16, 16>}, {pipeline_mode = #tpu.pipeline_mode<synchronous>, transform_indices = @transform_12, window_bounds = array<i64: 16, 1>}, {transform_indices = @transform_13, window_bounds = array<i64: 3, 1, 128>}, {transform_indices = @transform_14, window_bounds = array<i64: 16, 16, 128>}]} {
    %c0 = arith.constant 0 : index
    %c0_0 = arith.constant 0 : index
    %c0_1 = arith.constant 0 : index
    %0 = vector.load %arg1[%c0, %c0_0, %c0_1] : memref<18x16x128xf32, #tpu.memory_space<vmem>>, vector<18x16x128xf32>
    %c0_2 = arith.constant 0 : index
    %c0_3 = arith.constant 0 : index
    %c0_4 = arith.constant 0 : index
    %c0_5 = arith.constant 0 : index
    %1 = vector.load %arg4[%c0_2, %c0_3, %c0_4, %c0_5] : memref<3x1x16x1xf32, #tpu.memory_space<vmem>>, vector<3x1x16x1xf32>
    %2 = vector.extract_strided_slice %0 {offsets = [0, 0, 0], sizes = [16, 16, 128], strides = [1, 1, 1]} : vector<18x16x128xf32> to vector<16x16x128xf32>
    %3 = vector.extract_strided_slice %1 {offsets = [0, 0, 0, 0], sizes = [1, 1, 16, 1], strides = [1, 1, 1, 1]} : vector<3x1x16x1xf32> to vector<1x1x16x1xf32>
    %4 = vector.shape_cast %3 : vector<1x1x16x1xf32> to vector<1x16x1xf32>
    %5 = vector.broadcast %4 : vector<1x16x1xf32> to vector<16x16x128xf32>
    %6 = arith.mulf %5, %2 : vector<16x16x128xf32>
    %7 = vector.extract_strided_slice %0 {offsets = [1, 0, 0], sizes = [16, 16, 128], strides = [1, 1, 1]} : vector<18x16x128xf32> to vector<16x16x128xf32>
    %8 = vector.extract_strided_slice %1 {offsets = [1, 0, 0, 0], sizes = [1, 1, 16, 1], strides = [1, 1, 1, 1]} : vector<3x1x16x1xf32> to vector<1x1x16x1xf32>
    %9 = vector.shape_cast %8 : vector<1x1x16x1xf32> to vector<1x16x1xf32>
    %10 = vector.broadcast %9 : vector<1x16x1xf32> to vector<16x16x128xf32>
    %11 = arith.mulf %10, %7 : vector<16x16x128xf32>
    %12 = arith.addf %6, %11 : vector<16x16x128xf32>
    %13 = vector.extract_strided_slice %0 {offsets = [2, 0, 0], sizes = [16, 16, 128], strides = [1, 1, 1]} : vector<18x16x128xf32> to vector<16x16x128xf32>
    %14 = vector.extract_strided_slice %1 {offsets = [2, 0, 0, 0], sizes = [1, 1, 16, 1], strides = [1, 1, 1, 1]} : vector<3x1x16x1xf32> to vector<1x1x16x1xf32>
    %15 = vector.shape_cast %14 : vector<1x1x16x1xf32> to vector<1x16x1xf32>
    %16 = vector.broadcast %15 : vector<1x16x1xf32> to vector<16x16x128xf32>
    %17 = arith.mulf %16, %13 : vector<16x16x128xf32>
    %18 = arith.addf %12, %17 : vector<16x16x128xf32>
    %c0_6 = arith.constant 0 : index
    %c0_7 = arith.constant 0 : index
    %c0_8 = arith.constant 0 : index
    %19 = vector.load %arg5[%c0_6, %c0_7, %c0_8] : memref<1x16x1xf32, #tpu.memory_space<vmem>>, vector<1x16x1xf32>
    %20 = vector.broadcast %19 : vector<1x16x1xf32> to vector<16x16x128xf32>
    %21 = arith.addf %18, %20 : vector<16x16x128xf32>
    %c0_9 = arith.constant 0 : index
    %c0_10 = arith.constant 0 : index
    %c0_11 = arith.constant 0 : index
    %22 = vector.load %arg6[%c0_9, %c0_10, %c0_11] : memref<16x16x1xf32, #tpu.memory_space<vmem>>, vector<16x16x1xf32>
    %23 = vector.broadcast %22 : vector<16x16x1xf32> to vector<16x16x128xf32>
    %24 = arith.mulf %21, %23 : vector<16x16x128xf32>
    %c0_12 = arith.constant 0 : index
    %c0_13 = arith.constant 0 : index
    %c0_14 = arith.constant 0 : index
    %25 = vector.load %arg7[%c0_12, %c0_13, %c0_14] : memref<16x16x1xf32, #tpu.memory_space<vmem>>, vector<16x16x1xf32>
    %26 = vector.broadcast %25 : vector<16x16x1xf32> to vector<16x16x128xf32>
    %27 = arith.addf %24, %26 : vector<16x16x128xf32>
    %cst = arith.constant dense<0.000000e+00> : vector<16x128xf32>
    %28 = vector.multi_reduction <add>, %27, %cst [0] : vector<16x16x128xf32> to vector<16x128xf32>
    %cst_15 = arith.constant 1.600000e+01 : f32
    %29 = vector.broadcast %cst_15 : f32 to vector<16x128xf32>
    %30 = arith.divf %28, %29 : vector<16x128xf32>
    %c0_16 = arith.constant 0 : index
    %c0_17 = arith.constant 0 : index
    %c0_18 = arith.constant 0 : index
    %31 = vector.load %arg8[%c0_16, %c0_17, %c0_18] : memref<3x16x1xf32, #tpu.memory_space<vmem>>, vector<3x16x1xf32>
    %c0_19 = arith.constant 0 : index
    %c0_20 = arith.constant 0 : index
    %c0_21 = arith.constant 0 : index
    %32 = vector.load %arg14[%c0_19, %c0_20, %c0_21] : memref<3x1x128xf32, #tpu.memory_space<vmem>>, vector<3x1x128xf32>
    %c1_i32 = arith.constant 1 : i32
    %33 = tpu.dynamic_rotate %30 by %c1_i32 dim 1 : vector<16x128xf32>, i32 -> vector<16x128xf32>
    %34 = vector.extract_strided_slice %31 {offsets = [0, 0, 0], sizes = [1, 16, 1], strides = [1, 1, 1]} : vector<3x16x1xf32> to vector<1x16x1xf32>
    %35 = vector.shape_cast %34 : vector<1x16x1xf32> to vector<16x1xf32>
    %36 = vector.extract_strided_slice %32 {offsets = [0, 0, 0], sizes = [1, 1, 128], strides = [1, 1, 1]} : vector<3x1x128xf32> to vector<1x1x128xf32>
    %37 = vector.shape_cast %36 : vector<1x1x128xf32> to vector<1x128xf32>
    %38 = vector.broadcast %37 : vector<1x128xf32> to vector<16x128xf32>
    %39 = arith.mulf %33, %38 : vector<16x128xf32>
    %40 = vector.broadcast %35 : vector<16x1xf32> to vector<16x128xf32>
    %41 = arith.mulf %40, %39 : vector<16x128xf32>
    %42 = vector.extract_strided_slice %31 {offsets = [1, 0, 0], sizes = [1, 16, 1], strides = [1, 1, 1]} : vector<3x16x1xf32> to vector<1x16x1xf32>
    %43 = vector.shape_cast %42 : vector<1x16x1xf32> to vector<16x1xf32>
    %44 = vector.broadcast %43 : vector<16x1xf32> to vector<16x128xf32>
    %45 = arith.mulf %44, %30 : vector<16x128xf32>
    %46 = arith.addf %41, %45 : vector<16x128xf32>
    %c127_i32 = arith.constant 127 : i32
    %47 = tpu.dynamic_rotate %30 by %c127_i32 dim 1 : vector<16x128xf32>, i32 -> vector<16x128xf32>
    %48 = vector.extract_strided_slice %31 {offsets = [2, 0, 0], sizes = [1, 16, 1], strides = [1, 1, 1]} : vector<3x16x1xf32> to vector<1x16x1xf32>
    %49 = vector.shape_cast %48 : vector<1x16x1xf32> to vector<16x1xf32>
    %50 = vector.extract_strided_slice %32 {offsets = [2, 0, 0], sizes = [1, 1, 128], strides = [1, 1, 1]} : vector<3x1x128xf32> to vector<1x1x128xf32>
    %51 = vector.shape_cast %50 : vector<1x1x128xf32> to vector<1x128xf32>
    %52 = vector.broadcast %51 : vector<1x128xf32> to vector<16x128xf32>
    %53 = arith.mulf %47, %52 : vector<16x128xf32>
    %54 = vector.broadcast %49 : vector<16x1xf32> to vector<16x128xf32>
    %55 = arith.mulf %54, %53 : vector<16x128xf32>
    %56 = arith.addf %46, %55 : vector<16x128xf32>
    %c0_22 = arith.constant 0 : index
    %c0_23 = arith.constant 0 : index
    %57 = vector.load %arg9[%c0_22, %c0_23] : memref<16x1xf32, #tpu.memory_space<vmem>>, vector<16x1xf32>
    %58 = vector.broadcast %57 : vector<16x1xf32> to vector<16x128xf32>
    %59 = arith.addf %56, %58 : vector<16x128xf32>
    %c0_24 = arith.constant 0 : index
    %c0_25 = arith.constant 0 : index
    %60 = vector.load %arg10[%c0_24, %c0_25] : memref<16x1xf32, #tpu.memory_space<vmem>>, vector<16x1xf32>
    %61 = vector.broadcast %60 : vector<16x1xf32> to vector<16x128xf32>
    %62 = arith.mulf %59, %61 : vector<16x128xf32>
    %c0_26 = arith.constant 0 : index
    %c0_27 = arith.constant 0 : index
    %63 = vector.load %arg11[%c0_26, %c0_27] : memref<16x1xf32, #tpu.memory_space<vmem>>, vector<16x1xf32>
    %64 = vector.broadcast %63 : vector<16x1xf32> to vector<16x128xf32>
    %65 = arith.addf %62, %64 : vector<16x128xf32>
    %66 = arith.negf %65 : vector<16x128xf32>
    %67 = math.exp %66 : vector<16x128xf32>
    %cst_28 = arith.constant 1.000000e+00 : f32
    %68 = vector.broadcast %cst_28 : f32 to vector<16x128xf32>
    %69 = arith.addf %68, %67 : vector<16x128xf32>
    %70 = arith.divf %68, %69 : vector<16x128xf32>
    %71 = arith.mulf %65, %70 : vector<16x128xf32>
    %c0_29 = arith.constant 0 : index
    %c0_30 = arith.constant 0 : index
    %72 = vector.load %arg12[%c0_29, %c0_30] : memref<16x16xf32, #tpu.memory_space<vmem>>, vector<16x16xf32>
    %cst_31 = arith.constant dense<0.000000e+00> : vector<16x128xf32>
    %73 = tpu.matmul %72, %71, %cst_31 {dimension_numbers = #tpu.dot_dimension_numbers<[1], [0], [0], [1], [0, 0, 1, 1], [], []>} : vector<16x16xf32>, vector<16x128xf32>, vector<16x128xf32> -> vector<16x128xf32>
    %c0_32 = arith.constant 0 : index
    %c0_33 = arith.constant 0 : index
    %74 = vector.load %arg13[%c0_32, %c0_33] : memref<16x1xf32, #tpu.memory_space<vmem>>, vector<16x1xf32>
    %75 = vector.broadcast %74 : vector<16x1xf32> to vector<16x128xf32>
    %76 = arith.addf %73, %75 : vector<16x128xf32>
    %77 = vector.shape_cast %76 : vector<16x128xf32> to vector<1x16x128xf32>
    %78 = vector.broadcast %77 : vector<1x16x128xf32> to vector<16x16x128xf32>
    %79 = arith.addf %78, %27 : vector<16x16x128xf32>
    %80 = vector.extract_strided_slice %0 {offsets = [1, 0, 0], sizes = [16, 16, 128], strides = [1, 1, 1]} : vector<18x16x128xf32> to vector<16x16x128xf32>
    %81 = arith.addf %79, %80 : vector<16x16x128xf32>
    %c0_34 = arith.constant 0 : index
    %c0_35 = arith.constant 0 : index
    %c0_36 = arith.constant 0 : index
    %82 = vector.load %arg15[%c0_34, %c0_35, %c0_36] : memref<16x16x128xf32, #tpu.memory_space<vmem>>, vector<16x16x128xf32>
    tpu.vector_store %arg15[%c0_34, %c0_35, %c0_36], %81 {strides = array<i32>} : memref<16x16x128xf32, #tpu.memory_space<vmem>>, vector<16x16x128xf32>,
    return
  }
  func.func @transform_0(%arg0: i32) -> (i32, i32, i32) {
    %c0_i32 = arith.constant 0 : i32
    %c0_i32_0 = arith.constant 0 : i32
    %c0_i32_1 = arith.constant 0 : i32
    return %c0_i32, %c0_i32_0, %arg0 : i32, i32, i32
  }
  func.func @transform_1(%arg0: i32) -> (i32, i32, i32) {
    %c0_i32 = arith.constant 0 : i32
    %c0_i32_0 = arith.constant 0 : i32
    %c0_i32_1 = arith.constant 0 : i32
    %c0_i32_2 = arith.constant 0 : i32
    return %c0_i32, %c0_i32_0, %c0_i32_1 : i32, i32, i32
  }
  func.func @transform_2(%arg0: i32) -> (i32, i32, i32) {
    %c0_i32 = arith.constant 0 : i32
    %c0_i32_0 = arith.constant 0 : i32
    %c0_i32_1 = arith.constant 0 : i32
    %c0_i32_2 = arith.constant 0 : i32
    return %c0_i32, %c0_i32_0, %c0_i32_1 : i32, i32, i32
  }
  func.func @transform_3(%arg0: i32) -> (i32, i32, i32, i32) {
    %c0_i32 = arith.constant 0 : i32
    %c0_i32_0 = arith.constant 0 : i32
    %c0_i32_1 = arith.constant 0 : i32
    %c0_i32_2 = arith.constant 0 : i32
    %c0_i32_3 = arith.constant 0 : i32
    return %c0_i32, %c0_i32_0, %c0_i32_1, %c0_i32_2 : i32, i32, i32, i32
  }
  func.func @transform_4(%arg0: i32) -> (i32, i32, i32) {
    %c0_i32 = arith.constant 0 : i32
    %c0_i32_0 = arith.constant 0 : i32
    %c0_i32_1 = arith.constant 0 : i32
    %c0_i32_2 = arith.constant 0 : i32
    return %c0_i32, %c0_i32_0, %c0_i32_1 : i32, i32, i32
  }
  func.func @transform_5(%arg0: i32) -> (i32, i32, i32) {
    %c0_i32 = arith.constant 0 : i32
    %c0_i32_0 = arith.constant 0 : i32
    %c0_i32_1 = arith.constant 0 : i32
    %c0_i32_2 = arith.constant 0 : i32
    return %c0_i32, %c0_i32_0, %c0_i32_1 : i32, i32, i32
  }
  func.func @transform_6(%arg0: i32) -> (i32, i32, i32) {
    %c0_i32 = arith.constant 0 : i32
    %c0_i32_0 = arith.constant 0 : i32
    %c0_i32_1 = arith.constant 0 : i32
    %c0_i32_2 = arith.constant 0 : i32
    return %c0_i32, %c0_i32_0, %c0_i32_1 : i32, i32, i32
  }
  func.func @transform_7(%arg0: i32) -> (i32, i32, i32) {
    %c0_i32 = arith.constant 0 : i32
    %c0_i32_0 = arith.constant 0 : i32
    %c0_i32_1 = arith.constant 0 : i32
    %c0_i32_2 = arith.constant 0 : i32
    return %c0_i32, %c0_i32_0, %c0_i32_1 : i32, i32, i32
  }
  func.func @transform_8(%arg0: i32) -> (i32, i32) {
    %c0_i32 = arith.constant 0 : i32
    %c0_i32_0 = arith.constant 0 : i32
    %c0_i32_1 = arith.constant 0 : i32
    return %c0_i32, %c0_i32_0 : i32, i32
  }
  func.func @transform_9(%arg0: i32) -> (i32, i32) {
    %c0_i32 = arith.constant 0 : i32
    %c0_i32_0 = arith.constant 0 : i32
    %c0_i32_1 = arith.constant 0 : i32
    return %c0_i32, %c0_i32_0 : i32, i32
  }
  func.func @transform_10(%arg0: i32) -> (i32, i32) {
    %c0_i32 = arith.constant 0 : i32
    %c0_i32_0 = arith.constant 0 : i32
    %c0_i32_1 = arith.constant 0 : i32
    return %c0_i32, %c0_i32_0 : i32, i32
  }
  func.func @transform_11(%arg0: i32) -> (i32, i32) {
    %c0_i32 = arith.constant 0 : i32
    %c0_i32_0 = arith.constant 0 : i32
    %c0_i32_1 = arith.constant 0 : i32
    return %c0_i32, %c0_i32_0 : i32, i32
  }
  func.func @transform_12(%arg0: i32) -> (i32, i32) {
    %c0_i32 = arith.constant 0 : i32
    %c0_i32_0 = arith.constant 0 : i32
    %c0_i32_1 = arith.constant 0 : i32
    return %c0_i32, %c0_i32_0 : i32, i32
  }
  func.func @transform_13(%arg0: i32) -> (i32, i32, i32) {
    %c0_i32 = arith.constant 0 : i32
    %c0_i32_0 = arith.constant 0 : i32
    %c0_i32_1 = arith.constant 0 : i32
    return %c0_i32, %c0_i32_0, %arg0 : i32, i32, i32
  }
  func.func @transform_14(%arg0: i32) -> (i32, i32, i32) {
    %c0_i32 = arith.constant 0 : i32
    %c0_i32_0 = arith.constant 0 : i32
    %c0_i32_1 = arith.constant 0 : i32
    return %c0_i32, %c0_i32_0, %arg0 : i32, i32, i32
  }
}

</mosaic_0001>

<bundles_post_ra>
// kernel: _lambda_.3
= control target key start
LH: loop header
LB: loop body
LE: loop exit
PB: predicated region body
PF: predicated region fallthrough
CT: control target
= control target key end

     0   :  { %v1175_v0 = vmov 0   ;;  %s1177_s16 = smov 1   ;;  %vm950_vm0 = vcmask 130048   ;;  %s2306_s3 = inlined_call_operand.vmem [shape: f32[3,1,16,1], index: 3, kind: input, shape index: {}]   ;;  %s2307_s4 = inlined_call_operand.vmem [shape: f32[1,16,1], index: 4, kind: input, shape index: {}]   ;;  %s2308_s5 = inlined_call_operand.vmem [shape: f32[16,16,1], index: 5, kind: input, shape index: {}]   ;;  %s2309_s6 = inlined_call_operand.vmem [shape: f32[16,16,1], index: 6, kind: input, shape index: {}]   ;;  %s2310_s0 = inlined_call_operand.vmem [shape: f32[18,16,128], index: 0, kind: input, shape index: {}]   ;;  %s2311_s7 = inlined_call_operand.vmem [shape: f32[3,16,1], index: 7, kind: input, shape index: {}]   ;;  %s2312_s8 = inlined_call_operand.vmem [shape: f32[16,1], index: 8, kind: input, shape index: {}]   ;;  %s2313_s9 = inlined_call_operand.vmem [shape: f32[16,1], index: 9, kind: input, shape index: {}]   ;;  %s2314_s10 = inlined_call_operand.vmem [shape: f32[16,1], index: 10, kind: input, shape index: {}]   ;;  %s2315_s12 = inlined_call_operand.vmem [shape: f32[16,1], index: 12, kind: input, shape index: {}]   ;;  %s2316_s1 = inlined_call_operand.<no memory space> [shape: f32[1,1,1], index: 1, kind: input, shape index: {}, may-alias: {1,2}]   ;;  %s2317_s2 = inlined_call_operand.<no memory space> [shape: f32[1,1,1], index: 2, kind: input, shape index: {}, may-alias: {1,2}]   ;;  %s2318_s11 = inlined_call_operand.vmem [shape: f32[16,16], index: 11, kind: input, shape index: {}]   ;;  %s2319_s13 = inlined_call_operand.vmem [shape: f32[3,1,128], index: 13, kind: input, shape index: {}]   ;;  %s2320_s14 = inlined_call_operand.vmem [shape: f32[16,16,128], index: 14, kind: output, shape index: {}]  }
   0x1   :  { %1153 = vset.pattern.permute.xlu1 %v1175_v0  ;;  %1152 = vset.pattern.permute.xlu0 %v1175_v0  ;;  %v88_v1 = vld [vmem:[%s2306_s3 + $0x8] sm:$0xff]  ;;  %v87_v2 = vld [vmem:[%s2306_s3] sm:$0xff]  ;;  %v90_v3 = vld [vmem:[%s2306_s3 + $0x18] sm:$0xff] }
   0x2   :  { %100 = vperm.xlu0 %1152, %v88_v1   ;;  %95 = vperm.xlu1 %1153, %v87_v2   ;;  %v89_v4 = vld [vmem:[%s2306_s3 + $0x10] sm:$0xff]  ;;  %v92_v5 = vld [vmem:[%s2306_s3 + $0x28] sm:$0xff]  ;;  %v91_v6 = vld [vmem:[%s2306_s3 + $0x20] sm:$0xff] }
   0x3   :  { %v284_v7 = vld [vmem:[%s2307_s4 + $0x8] sm:$0xff]  ;;  %v283_v8 = vld [vmem:[%s2307_s4] sm:$0xff]  ;;  %v330_v10 = vld [vmem:[%s2308_s5 + $0x18] sm:$0xff]  ;;  %s1176_s4 = smov 127  }
   0x4   :  { %v328_v9 = vld [vmem:[%s2308_s5 + $0x8] sm:$0xff]  ;;  %v327_v11 = vld [vmem:[%s2308_s5] sm:$0xff]  ;;  %v329_v12 = vld [vmem:[%s2308_s5 + $0x10] sm:$0xff] }
   0x5   :  { %v332_v13 = vld [vmem:[%s2308_s5 + $0x28] sm:$0xff]  ;;  %v554_v15 = vld [vmem:[%s2309_s6 + $0x18] sm:$0xff]  ;;  %v331_v16 = vld [vmem:[%s2308_s5 + $0x20] sm:$0xff] }
   0x6   :  { %142 = vperm.xlu0 %1152, %v90_v3   ;;  %137 = vperm.xlu1 %1153, %v89_v4   ;;  %v552_v14 = vld [vmem:[%s2309_s6 + $0x8] sm:$0xff]  ;;  %v334_v17 = vld [vmem:[%s2308_s5 + $0x38] sm:$0xff]  ;;  %v551_v18 = vld [vmem:[%s2309_s6] sm:$0xff] }
   0x7   :  { %v553_v19 = vld [vmem:[%s2309_s6 + $0x10] sm:$0xff]  ;;  %v556_v20 = vld [vmem:[%s2309_s6 + $0x28] sm:$0xff]  ;;  %v555_v23 = vld [vmem:[%s2309_s6 + $0x20] sm:$0xff] }
   0x8   :  { %v333_v21 = vld [vmem:[%s2308_s5 + $0x30] sm:$0xff]  ;;  %v336_v22 = vld [vmem:[%s2308_s5 + $0x48] sm:$0xff]  ;;  %v558_v24 = vld [vmem:[%s2309_s6 + $0x38] sm:$0xff] }
   0x9   :  { %v335_v25 = vld [vmem:[%s2308_s5 + $0x40] sm:$0xff]  ;;  %v338_v26 = vld [vmem:[%s2308_s5 + $0x58] sm:$0xff]  ;;  %v557_v27 = vld [vmem:[%s2309_s6 + $0x30] sm:$0xff] }
   0xa   :  { %216 = vperm.xlu0 %1152, %v92_v5   ;;  %211 = vperm.xlu1 %1153, %v91_v6   ;;  %v560_v28 = vld [vmem:[%s2309_s6 + $0x48] sm:$0xff]  ;;  %v337_v29 = vld [vmem:[%s2308_s5 + $0x50] sm:$0xff]  ;;  %v559_v31 = vld [vmem:[%s2309_s6 + $0x40] sm:$0xff] }
   0xb   :  { %v340_v30 = vld [vmem:[%s2308_s5 + $0x68] sm:$0xff]  ;;  %v562_v32 = vld [vmem:[%s2309_s6 + $0x58] sm:$0xff]  ;;  %v339_v33 = vld [vmem:[%s2308_s5 + $0x60] sm:$0xff] }
   0xc   :  { %v342_v34 = vld [vmem:[%s2308_s5 + $0x78] sm:$0xff]  ;;  %v561_v35 = vld [vmem:[%s2309_s6 + $0x50] sm:$0xff]  ;;  %v564_v36 = vld [vmem:[%s2309_s6 + $0x68] sm:$0xff] }
   0xd   :  { %v341_v37 = vld [vmem:[%s2308_s5 + $0x70] sm:$0xff]  ;;  %v344_v38 = vld [vmem:[%s2308_s5 + $0x88] sm:$0xff]  ;;  %v563_v39 = vld [vmem:[%s2309_s6 + $0x60] sm:$0xff] }
   0xe   :  { %292 = vperm.xlu0 %1152, %v284_v7   ;;  %287 = vperm.xlu1 %1153, %v283_v8   ;;  %v566_v40 = vld [vmem:[%s2309_s6 + $0x78] sm:$0xff]  ;;  %v343_v41 = vld [vmem:[%s2308_s5 + $0x80] sm:$0xff]  ;;  %v565_v43 = vld [vmem:[%s2309_s6 + $0x70] sm:$0xff] }
   0xf   :  { %v346_v42 = vld [vmem:[%s2308_s5 + $0x98] sm:$0xff]  ;;  %v568_v44 = vld [vmem:[%s2309_s6 + $0x88] sm:$0xff]  ;;  %v345_v45 = vld [vmem:[%s2308_s5 + $0x90] sm:$0xff] }
  0x10   :  { %v348_v46 = vld [vmem:[%s2308_s5 + $0xa8] sm:$0xff]  ;;  %v567_v47 = vld [vmem:[%s2309_s6 + $0x80] sm:$0xff]  ;;  %v570_v48 = vld [vmem:[%s2309_s6 + $0x98] sm:$0xff] }
  0x11   :  { %v347_v49 = vld [vmem:[%s2308_s5 + $0xa0] sm:$0xff]  ;;  %v350_v50 = vld [vmem:[%s2308_s5 + $0xb8] sm:$0xff]  ;;  %v569_v51 = vld [vmem:[%s2309_s6 + $0x90] sm:$0xff] }
  0x12   :  { %366 = vperm.xlu0 %1152, %v328_v9   ;;  %376 = vperm.xlu1 %1153, %v330_v10   ;;  %v572_v52 = vld [vmem:[%s2309_s6 + $0xa8] sm:$0xff]  ;;  %v349_v53 = vld [vmem:[%s2308_s5 + $0xb0] sm:$0xff]  ;;  %v571_v55 = vld [vmem:[%s2309_s6 + $0xa0] sm:$0xff] }
  0x13   :  { %v352_v54 = vld [vmem:[%s2308_s5 + $0xc8] sm:$0xff]  ;;  %v574_v56 = vld [vmem:[%s2309_s6 + $0xb8] sm:$0xff]  ;;  %v351_v57 = vld [vmem:[%s2308_s5 + $0xc0] sm:$0xff] }
  0x14   :  { %v354_v58 = vld [vmem:[%s2308_s5 + $0xd8] sm:$0xff]  ;;  %v573_v59 = vld [vmem:[%s2309_s6 + $0xb0] sm:$0xff]  ;;  %v576_v60 = vld [vmem:[%s2309_s6 + $0xc8] sm:$0xff] }
  0x15   :  { %v353_v61 = vld [vmem:[%s2308_s5 + $0xd0] sm:$0xff]  ;;  %v356_v62 = vld [vmem:[%s2308_s5 + $0xe8] sm:$0xff]  ;;  %v575_v63 = vld [vmem:[%s2309_s6 + $0xc0] sm:$0xff] }
  0x16   :  { %361 = vperm.xlu0 %1152, %v327_v11   ;;  %371 = vperm.xlu1 %1153, %v329_v12   ;;  %v578_v0 = vld [vmem:[%s2309_s6 + $0xd8] sm:$0xff]  ;;  %v52_v1 = vld [vmem:[%s2310_s0 + $0x8] sm:$0xff]  ;;  %v51_v5 = vld [vmem:[%s2310_s0] sm:$0xff] }
  0x17   :  { %v54_v2 = vld [vmem:[%s2310_s0 + $0x18] sm:$0xff]  ;;  %v56_v3 = vld [vmem:[%s2310_s0 + $0x28] sm:$0xff]  ;;  %v53_v6 = vld [vmem:[%s2310_s0 + $0x10] sm:$0xff] }
  0x18   :  { %v58_v4 = vld [vmem:[%s2310_s0 + $0x38] sm:$0xff]  ;;  %v55_v7 = vld [vmem:[%s2310_s0 + $0x20] sm:$0xff]  ;;  %v57_v8 = vld [vmem:[%s2310_s0 + $0x30] sm:$0xff] }
  0x19   :  { %v60_v9 = vld [vmem:[%s2310_s0 + $0x48] sm:$0xff]  ;;  %v59_v12 = vld [vmem:[%s2310_s0 + $0x40] sm:$0xff] }
  0x1a   :  { %386 = vperm.xlu0 %1152, %v332_v13   ;;  %590 = vperm.xlu1 %1153, %v552_v14   ;;  %v1482_v13 = vld [vmem:[%s2310_s0 + $0x58] sm:$0xff]  ;;  %v1487_v14 = vld [vmem:[%s2310_s0 + $0x50] sm:$0xff] }
  0x1e   :  { %600 = vperm.xlu0 %1152, %v554_v15   ;;  %381 = vperm.xlu1 %1153, %v331_v16  }
  0x22   :  { %396 = vperm.xlu0 %1152, %v334_v17   ;;  %585 = vperm.xlu1 %1153, %v551_v18   ;;  %v1495_v18 = vld [vmem:[%s2310_s0 + $0x68] sm:$0xff] }
  0x26   :  { %595 = vperm.xlu0 %1152, %v553_v19   ;;  %610 = vperm.xlu1 %1153, %v556_v20   ;;  %v1500_v19 = vld [vmem:[%s2310_s0 + $0x60] sm:$0xff]  ;;  %v1505_v20 = vld [vmem:[%s2310_s0 + $0x78] sm:$0xff] }
  0x2a   :  { %391 = vperm.xlu0 %1152, %v333_v21   ;;  %406 = vperm.xlu1 %1153, %v336_v22   ;;  %v355_v21 = vld [vmem:[%s2308_s5 + $0xe0] sm:$0xff]  ;;  %v358_v22 = vld [vmem:[%s2308_s5 + $0xf8] sm:$0xff] }
  0x2e   :  { %605 = vperm.xlu0 %1152, %v555_v23   ;;  %620 = vperm.xlu1 %1153, %v558_v24  }
  0x32   :  { %401 = vperm.xlu0 %1152, %v335_v25   ;;  %416 = vperm.xlu1 %1153, %v338_v26  }
  0x36   :  { %615 = vperm.xlu0 %1152, %v557_v27   ;;  %630 = vperm.xlu1 %1153, %v560_v28  }
  0x3a   :  { %411 = vperm.xlu0 %1152, %v337_v29   ;;  %426 = vperm.xlu1 %1153, %v340_v30  }
  0x3e   :  { %625 = vperm.xlu0 %1152, %v559_v31   ;;  %640 = vperm.xlu1 %1153, %v562_v32  }
  0x42   :  { %421 = vperm.xlu0 %1152, %v339_v33   ;;  %436 = vperm.xlu1 %1153, %v342_v34  }
  0x46   :  { %635 = vperm.xlu0 %1152, %v561_v35   ;;  %650 = vperm.xlu1 %1153, %v564_v36  }
  0x4a   :  { %431 = vperm.xlu0 %1152, %v341_v37   ;;  %446 = vperm.xlu1 %1153, %v344_v38  }
  0x4e   :  { %645 = vperm.xlu0 %1152, %v563_v39   ;;  %660 = vperm.xlu1 %1153, %v566_v40   ;;  %v577_v40 = vld [vmem:[%s2309_s6 + $0xd0] sm:$0xff] }
  0x52   :  { %441 = vperm.xlu0 %1152, %v343_v41   ;;  %456 = vperm.xlu1 %1153, %v346_v42   ;;  %v580_v41 = vld [vmem:[%s2309_s6 + $0xe8] sm:$0xff] }
  0x56   :  { %655 = vperm.xlu0 %1152, %v565_v43   ;;  %670 = vperm.xlu1 %1153, %v568_v44  }
  0x5a   :  { %451 = vperm.xlu0 %1152, %v345_v45   ;;  %466 = vperm.xlu1 %1153, %v348_v46  }
  0x5e   :  { %665 = vperm.xlu0 %1152, %v567_v47   ;;  %680 = vperm.xlu1 %1153, %v570_v48  }
  0x62   :  { %461 = vperm.xlu0 %1152, %v347_v49   ;;  %476 = vperm.xlu1 %1153, %v350_v50  }
  0x66   :  { %675 = vperm.xlu0 %1152, %v569_v51   ;;  %690 = vperm.xlu1 %1153, %v572_v52  }
  0x6a   :  { %471 = vperm.xlu0 %1152, %v349_v53   ;;  %486 = vperm.xlu1 %1153, %v352_v54  }
  0x6e   :  { %685 = vperm.xlu0 %1152, %v571_v55   ;;  %700 = vperm.xlu1 %1153, %v574_v56  }
  0x72   :  { %481 = vperm.xlu0 %1152, %v351_v57   ;;  %496 = vperm.xlu1 %1153, %v354_v58  }
  0x76   :  { %695 = vperm.xlu0 %1152, %v573_v59   ;;  %710 = vperm.xlu1 %1153, %v576_v60   ;;  %v357_v59 = vld [vmem:[%s2308_s5 + $0xf0] sm:$0xff]  ;;  %v579_v60 = vld [vmem:[%s2309_s6 + $0xe0] sm:$0xff] }
  0x7a   :  { %491 = vperm.xlu0 %1152, %v353_v61   ;;  %506 = vperm.xlu1 %1153, %v356_v62  }
  0x7d   :  { %v1472_v10 = vpop.permute.xlu0 %100  ;;  %v1474_v11 = vpop.permute.xlu1 %95 }
  0x7e   :  { %705 = vperm.xlu0 %1152, %v575_v63   ;;  %720 = vperm.xlu1 %1153, %v578_v0   ;;  %v104_v15 = vmul.f32 %v1472_v10, %v52_v1  ;;  %v106_v16 = vmul.f32 %v1472_v10, %v54_v2  ;;  %v103_v17 = vmul.f32 %v1474_v11, %v51_v5 }
  0x7f   :  { %v105_v23 = vmul.f32 %v1474_v11, %v53_v6  ;;  %v108_v24 = vmul.f32 %v1472_v10, %v56_v3  ;;  %v107_v25 = vmul.f32 %v1474_v11, %v55_v7  ;;  %v110_v26 = vmul.f32 %v1472_v10, %v58_v4 }
  0x80   :  { %v109_v27 = vmul.f32 %v1474_v11, %v57_v8  ;;  %v1519_v28 = vmul.f32 %v1472_v10, %v60_v9  ;;  %v1522_v29 = vmul.f32 %v1474_v11, %v59_v12  ;;  %v1526_v30 = vmul.f32 %v1472_v10, %v1482_v13 }
  0x81   :  { %v1528_v31 = vpop.permute.xlu0 %142  ;;  %v1530_v32 = vpop.permute.xlu1 %137  ;;  %v1534_v33 = vmul.f32 %v1474_v11, %v1487_v14  ;;  %v1538_v34 = vmul.f32 %v1472_v10, %v1495_v18  ;;  %v1542_v35 = vmul.f32 %v1474_v11, %v1500_v19  ;;  %v1546_v36 = vmul.f32 %v1472_v10, %v1505_v20 }
  0x82   :  { %501 = vperm.xlu0 %1152, %v355_v21   ;;  %516 = vperm.xlu1 %1153, %v358_v22   ;;  %v146_v37 = vmul.f32 %v1528_v31, %v54_v2  ;;  %v148_v38 = vmul.f32 %v1528_v31, %v56_v3  ;;  %v145_v39 = vmul.f32 %v1530_v32, %v53_v6  ;;  %v582_v21 = vld [vmem:[%s2309_s6 + $0xf8] sm:$0xff]  ;;  %v581_v22 = vld [vmem:[%s2309_s6 + $0xf0] sm:$0xff] }
  0x83   :  { %v147_v42 = vmul.f32 %v1530_v32, %v55_v7  ;;  %v150_v43 = vmul.f32 %v1528_v31, %v58_v4  ;;  %v149_v44 = vmul.f32 %v1530_v32, %v57_v8  ;;  %v152_v45 = vmul.f32 %v1528_v31, %v60_v9 }
  0x84   :  { %v178_v46 = vadd.f32 %v146_v37, %v104_v15  ;;  %v180_v47 = vadd.f32 %v148_v38, %v106_v16  ;;  %v177_v48 = vadd.f32 %v145_v39, %v103_v17  ;;  %v151_v49 = vmul.f32 %v1530_v32, %v59_v12 }
  0x85   :  { %v1562_v50 = vpop.permute.xlu0 %216  ;;  %v1564_v51 = vpop.permute.xlu1 %211  ;;  %v179_v52 = vadd.f32 %v147_v42, %v105_v23  ;;  %v182_v53 = vadd.f32 %v150_v43, %v108_v24  ;;  %v181_v54 = vadd.f32 %v149_v44, %v107_v25  ;;  %v184_v55 = vadd.f32 %v152_v45, %v110_v26 }
  0x86   :  { %715 = vperm.xlu0 %1152, %v577_v40   ;;  %730 = vperm.xlu1 %1153, %v580_v41   ;;  %v220_v56 = vmul.f32 %v1562_v50, %v56_v3  ;;  %v222_v57 = vmul.f32 %v1562_v50, %v58_v4  ;;  %v219_v58 = vmul.f32 %v1564_v51, %v55_v7 }
  0x87   :  { %v221_v61 = vmul.f32 %v1564_v51, %v57_v8  ;;  %v224_v62 = vmul.f32 %v1562_v50, %v60_v9  ;;  %v223_v63 = vmul.f32 %v1564_v51, %v59_v12  ;;  %v226_v0 = vmul.f32 %v1562_v50, %v1482_v13 }
  0x88   :  { %v252_v1 = vadd.f32 %v220_v56, %v178_v46  ;;  %v254_v2 = vadd.f32 %v222_v57, %v180_v47  ;;  %v251_v3 = vadd.f32 %v219_v58, %v177_v48  ;;  %v183_v4 = vadd.f32 %v151_v49, %v109_v27  ;;  %v1622_v47 = vld [vmem:[%s2310_s0 + $0x70] sm:$0xff]  ;;  %v811_v48 = vld [vmem:[%s2311_s7 + $0x18] sm:$0xff] }
  0x89   :  { %v1580_v5 = vpop.permute.xlu0 %292  ;;  %v1582_v6 = vpop.permute.xlu1 %287  ;;  %v253_v7 = vadd.f32 %v221_v61, %v179_v52  ;;  %v256_v15 = vadd.f32 %v224_v62, %v182_v53  ;;  %v255_v16 = vadd.f32 %v223_v63, %v181_v54  ;;  %v258_v17 = vadd.f32 %v226_v0, %v184_v55  ;;  %2343 = vst [vmem:[#allocation4_spill] sm:$0xff] %v1622_v47  ;;  %v1637_v54 = vld [vmem:[%s2310_s0 + $0x88] sm:$0xff]  ;;  %v808_v0 = vld [vmem:[%s2311_s7] sm:$0xff] }
  0x8a   :  { %511 = vperm.xlu0 %1152, %v357_v59   ;;  %725 = vperm.xlu1 %1153, %v579_v60   ;;  %v296_v8 = vadd.f32 %v1580_v5, %v252_v1  ;;  %v298_v9 = vadd.f32 %v1580_v5, %v254_v2  ;;  %v295_v12 = vadd.f32 %v1582_v6, %v251_v3  ;;  %v810_v1 = vld [vmem:[%s2311_s7 + $0x10] sm:$0xff] }
  0x8b   :  { %v297_v23 = vadd.f32 %v1582_v6, %v253_v7  ;;  %v300_v24 = vadd.f32 %v1580_v5, %v256_v15  ;;  %v1596_v25 = vadd.f32 %v1582_v6, %v255_v16  ;;  %v1599_v26 = vadd.f32 %v1580_v5, %v258_v17  ;;  %2344 = vst [vmem:[#allocation5_spill] sm:$0xff] %v1637_v54 }
  0x8c   :  { %v225_v27 = vmul.f32 %v1564_v51, %v1487_v14  ;;  %v154_v37 = vmul.f32 %v1528_v31, %v1482_v13  ;;  %v228_v38 = vmul.f32 %v1562_v50, %v1495_v18  ;;  %v153_v39 = vmul.f32 %v1530_v32, %v1487_v14 }
  0x8d   :  { %v367_v40 = vpop.permute.xlu0 %366  ;;  %v377_v41 = vpop.permute.xlu1 %376  ;;  %v227_v42 = vmul.f32 %v1564_v51, %v1500_v19  ;;  %v156_v43 = vmul.f32 %v1528_v31, %v1495_v18  ;;  %v230_v44 = vmul.f32 %v1562_v50, %v1505_v20  ;;  %v155_v13 = vmul.f32 %v1530_v32, %v1500_v19  ;;  %v809_v18 = vld [vmem:[%s2311_s7 + $0x8] sm:$0xff] }
  0x8e   :  { %v520_v45 = vmul.f32 %v367_v40, %v296_v8  ;;  %v1617_v46 = vmul.f32 %v377_v41, %v298_v9  ;;  %740 = vperm.xlu0 %1152, %v582_v21   ;;  %735 = vperm.xlu1 %1153, %v581_v22   ;;  %v257_v14 = vadd.f32 %v225_v27, %v183_v4  ;;  %v1684_v8 = vld [vmem:[%s2310_s0 + $0x98] sm:$0xff]  ;;  %v813_v40 = vld [vmem:[%s2311_s7 + $0x28] sm:$0xff] }
  0x8f   :  { %v186_v19 = vadd.f32 %v154_v37, %v1519_v28  ;;  %v185_v49 = vadd.f32 %v153_v39, %v1522_v29  ;;  %v188_v52 = vadd.f32 %v156_v43, %v1526_v30  ;;  %v187_v53 = vadd.f32 %v155_v13, %v1534_v33  ;;  %2346 = vst [vmem:[#allocation7_spill] sm:$0xff] %v1684_v8  ;;  %v1701_v39 = vld [vmem:[%s2310_s0 + $0x90] sm:$0xff]  ;;  %v881_v41 = vld [vmem:[%s2312_s8 + $0x8] sm:$0xff] }
  0x90   :  { %v1640_v55 = vadd.f32 %v1582_v6, %v257_v14  ;;  %v229_v56 = vmul.f32 %v1564_v51, %v1622_v47  ;;  %v158_v28 = vmul.f32 %v1528_v31, %v1505_v20  ;;  %v232_v29 = vmul.f32 %v1562_v50, %v1637_v54  ;;  %v1657_v20 = vld [vmem:[%s2310_s0 + $0x80] sm:$0xff]  ;;  %2347 = vst [vmem:[#allocation8_spill] sm:$0xff] %v1701_v39  ;;  %v1718_v13 = vld [vmem:[%s2310_s0 + $0xa8] sm:$0xff] }
  0x91   :  { %v362_v30 = vpop.permute.xlu0 %361  ;;  %v372_v57 = vpop.permute.xlu1 %371  ;;  %v260_v33 = vadd.f32 %v228_v38, %v186_v19  ;;  %v259_v58 = vadd.f32 %v227_v42, %v185_v49  ;;  %v262_v59 = vadd.f32 %v230_v44, %v188_v52  ;;  %v157_v60 = vmul.f32 %v1530_v32, %v1622_v47  ;;  %2345 = vst [vmem:[#allocation6_spill] sm:$0xff] %v1657_v20 }
  0x92   :  { %v1650_v61 = vmul.f32 %v362_v30, %v295_v12  ;;  %v1652_v62 = vmul.f32 %v372_v57, %v297_v23  ;;  %835 = vperm.xlu0 %1152, %v809_v18   ;;  %847 = vperm.xlu1 %1153, %v811_v48   ;;  %v261_v63 = vadd.f32 %v229_v56, %v187_v53  ;;  %v1742_v57 = vld [vmem:[%s2310_s0 + $0xa0] sm:$0xff] }
  0x93   :  { %v1666_v2 = vadd.f32 %v1580_v5, %v260_v33  ;;  %v1669_v3 = vadd.f32 %v1582_v6, %v259_v58  ;;  %v1672_v4 = vadd.f32 %v1580_v5, %v262_v59  ;;  %v190_v7 = vadd.f32 %v158_v28, %v1538_v34  ;;  %2348 = vst [vmem:[#allocation9_spill] sm:$0xff] %v1718_v13  ;;  %v812_v33 = vld [vmem:[%s2311_s7 + $0x20] sm:$0xff] }
  0x94   :  { %v1676_v15 = vadd.f32 %v1582_v6, %v261_v63  ;;  %v189_v16 = vadd.f32 %v157_v60, %v1542_v35  ;;  %v231_v17 = vmul.f32 %v1564_v51, %v1657_v20  ;;  %v160_v9 = vmul.f32 %v1528_v31, %v1637_v54  ;;  %2350 = vst [vmem:[#allocation11_spill] sm:$0xff] %v1742_v57 }
  0x95   :  { %v387_v12 = vpop.permute.xlu0 %386  ;;  %v591_v21 = vpop.permute.xlu1 %590  ;;  %v264_v22 = vadd.f32 %v232_v29, %v190_v7  ;;  %v234_v34 = vmul.f32 %v1562_v50, %v1684_v8  ;;  %v117_v35 = vmul.f32 %v1474_v11, %v1622_v47  ;;  %v159_v23 = vmul.f32 %v1530_v32, %v1657_v20 }
  0x96   :  { %v1694_v27 = vmul.f32 %v387_v12, %v300_v24  ;;  %v1696_v37 = vadd.f32 %v591_v21, %v520_v45  ;;  %830 = vperm.xlu0 %1152, %v808_v0   ;;  %842 = vperm.xlu1 %1153, %v810_v1   ;;  %v263_v38 = vadd.f32 %v231_v17, %v189_v16  ;;  %v1761_v0 = vld [vmem:[%s2310_s0 + $0xb8] sm:$0xff] }
  0x97   :  { %v1710_v24 = vadd.f32 %v1580_v5, %v264_v22  ;;  %v192_v42 = vadd.f32 %v160_v9, %v1546_v36  ;;  %v191_v43 = vadd.f32 %v159_v23, %v117_v35  ;;  %v233_v44 = vmul.f32 %v1564_v51, %v1701_v39  ;;  %2351 = vst [vmem:[#allocation12_spill] sm:$0xff] %v1761_v0 }
  0x98   :  { %v1721_v45 = vadd.f32 %v1582_v6, %v263_v38  ;;  %v120_v14 = vmul.f32 %v1472_v10, %v1637_v54  ;;  %v162_v18 = vmul.f32 %v1528_v31, %v1684_v8  ;;  %v236_v36 = vmul.f32 %v1562_v50, %v1718_v13  ;;  %v1785_v38 = vld [vmem:[%s2310_s0 + $0xb0] sm:$0xff] }
  0x99   :  { %v601_v48 = vpop.permute.xlu0 %600  ;;  %v382_v19 = vpop.permute.xlu1 %381  ;;  %v266_v49 = vadd.f32 %v234_v34, %v192_v42  ;;  %v265_v52 = vadd.f32 %v233_v44, %v191_v43  ;;  %v119_v53 = vmul.f32 %v1474_v11, %v1657_v20  ;;  %v161_v56 = vmul.f32 %v1530_v32, %v1701_v39  ;;  %2353 = vst [vmem:[#allocation14_spill] sm:$0xff] %v1785_v38  ;;  %v1798_v43 = vld [vmem:[%s2310_s0 + $0xc8] sm:$0xff] }
  0x9a   :  { %v1734_v28 = vadd.f32 %v601_v48, %v1617_v46  ;;  %v1737_v29 = vmul.f32 %v382_v19, %v1596_v25  ;;  %873 = vperm.xlu0 %1152, %v813_v40   ;;  %889 = vperm.xlu1 %1153, %v881_v41   ;;  %v194_v30 = vadd.f32 %v162_v18, %v120_v14  ;;  %v880_v46 = vld [vmem:[%s2312_s8] sm:$0xff]  ;;  %v895_v40 = vld [vmem:[%s2313_s9 + $0x8] sm:$0xff] }
  0x9b   :  { %v1751_v58 = vadd.f32 %v1580_v5, %v266_v49  ;;  %v1754_v25 = vadd.f32 %v1582_v6, %v265_v52  ;;  %v193_v59 = vadd.f32 %v161_v56, %v119_v53  ;;  %v235_v60 = vmul.f32 %v1564_v51, %v1742_v57  ;;  %2354 = vst [vmem:[#allocation15_spill] sm:$0xff] %v1798_v43 }
  0x9c   :  { %2349 = vst [vmem:[#allocation10_spill] sm:$0xff] %v1734_v28  ;;  %v268_v63 = vadd.f32 %v236_v36, %v194_v30  ;;  %v122_v1 = vmul.f32 %v1472_v10, %v1684_v8  ;;  %v164_v7 = vmul.f32 %v1528_v31, %v1718_v13  ;;  %v238_v12 = vmul.f32 %v1562_v50, %v1761_v0  ;;  %v1809_v36 = vld [vmem:[%s2310_s0 + $0xc0] sm:$0xff] }
  0x9d   :  { %v397_v16 = vpop.permute.xlu0 %396  ;;  %v586_v17 = vpop.permute.xlu1 %585  ;;  %v267_v9 = vadd.f32 %v235_v60, %v193_v59  ;;  %v121_v21 = vmul.f32 %v1474_v11, %v1701_v39  ;;  %v163_v22 = vmul.f32 %v1530_v32, %v1742_v57  ;;  %v237_v42 = vmul.f32 %v1564_v51, %v1785_v38  ;;  %2355 = vst [vmem:[#allocation16_spill] sm:$0xff] %v1809_v36 }
  0x9e   :  { %v1774_v34 = vmul.f32 %v397_v16, %v1599_v26  ;;  %v1777_v35 = vadd.f32 %v586_v17, %v1650_v61  ;;  %868 = vperm.xlu0 %1152, %v812_v33   ;;  %884 = vperm.xlu1 %1153, %v880_v46   ;;  %v1780_v23 = vadd.f32 %v1580_v5, %v268_v63 }
  0x9f   :  { %v1791_v26 = vadd.f32 %v1582_v6, %v267_v9  ;;  %v196_v41 = vadd.f32 %v164_v7, %v122_v1  ;;  %v195_v61 = vadd.f32 %v163_v22, %v121_v21  ;;  %v124_v44 = vmul.f32 %v1472_v10, %v1718_v13 }
  0xa0   :  { %2352 = vst [vmem:[#allocation13_spill] sm:$0xff] %v1777_v35  ;;  %v166_v14 = vmul.f32 %v1528_v31, %v1761_v0  ;;  %v240_v18 = vmul.f32 %v1562_v50, %v1798_v43  ;;  %v123_v48 = vmul.f32 %v1474_v11, %v1742_v57  ;;  %v165_v56 = vmul.f32 %v1530_v32, %v1785_v38 }
  0xa1   :  { %v596_v19 = vpop.permute.xlu0 %595  ;;  %v611_v49 = vpop.permute.xlu1 %610  ;;  %v270_v52 = vadd.f32 %v238_v12, %v196_v41  ;;  %v269_v53 = vadd.f32 %v237_v42, %v195_v61  ;;  %v239_v30 = vmul.f32 %v1564_v51, %v1809_v36  ;;  %v126_v60 = vmul.f32 %v1472_v10, %v1761_v0 }
  0xa2   :  { %v1818_v33 = vadd.f32 %v596_v19, %v1652_v62  ;;  %v1821_v46 = vadd.f32 %v611_v49, %v1694_v27  ;;  %903 = vperm.xlu0 %1152, %v895_v40   ;;  %v198_v59 = vadd.f32 %v166_v14, %v124_v44  ;;  %v197_v7 = vadd.f32 %v165_v56, %v123_v48  ;;  %v1834_v62 = vld [vmem:[%s2310_s0 + $0xd8] sm:$0xff]  ;;  %v1843_v40 = vld [vmem:[%s2310_s0 + $0xd0] sm:$0xff]  ;;  %v1875_v56 = vld [vmem:[%s2310_s0 + $0xe0] sm:$0xff] }
  0xa3   :  { %v1826_v63 = vadd.f32 %v1580_v5, %v270_v52  ;;  %v1829_v1 = vadd.f32 %v1582_v6, %v269_v53  ;;  %2357 = vst [vmem:[#allocation18_spill] sm:$0xff] %v1834_v62  ;;  %v168_v27 = vmul.f32 %v1528_v31, %v1798_v43  ;;  %v242_v17 = vmul.f32 %v1562_v50, %v1834_v62  ;;  %v1864_v52 = vld [vmem:[%s2310_s0 + $0xe8] sm:$0xff] }
  0xa4   :  { %2356 = vst [vmem:[#allocation17_spill] sm:$0xff] %v1818_v33  ;;  %v272_v16 = vadd.f32 %v240_v18, %v198_v59  ;;  %v271_v21 = vadd.f32 %v239_v30, %v197_v7  ;;  %2358 = vst [vmem:[#allocation19_spill] sm:$0xff] %v1843_v40  ;;  %v125_v41 = vmul.f32 %v1474_v11, %v1785_v38 }
  0xa5   :  { %v392_v9 = vpop.permute.xlu0 %391  ;;  %v407_v12 = vpop.permute.xlu1 %406  ;;  %v200_v22 = vadd.f32 %v168_v27, %v126_v60  ;;  %v167_v61 = vmul.f32 %v1530_v32, %v1809_v36  ;;  %v241_v18 = vmul.f32 %v1564_v51, %v1843_v40  ;;  %2359 = vst [vmem:[#allocation20_spill] sm:$0xff] %v1864_v52  ;;  %v244_v53 = vmul.f32 %v1562_v50, %v1864_v52 }
  0xa6   :  { %v525_v42 = vmul.f32 %v392_v9, %v1640_v55  ;;  %v1851_v44 = vmul.f32 %v407_v12, %v1666_v2  ;;  %v1854_v14 = vadd.f32 %v1580_v5, %v272_v16  ;;  %v1859_v48 = vadd.f32 %v1582_v6, %v271_v21  ;;  %2360 = vst [vmem:[#allocation21_spill] sm:$0xff] %v1875_v56 }
  0xa7   :  { %v274_v19 = vadd.f32 %v242_v17, %v200_v22  ;;  %v199_v49 = vadd.f32 %v167_v61, %v125_v41  ;;  %v128_v55 = vmul.f32 %v1472_v10, %v1798_v43  ;;  %v170_v2 = vmul.f32 %v1528_v31, %v1834_v62  ;;  %v1897_v61 = vld [vmem:[%s2310_s0 + $0xf8] sm:$0xff] }
  0xa8   :  { %v127_v30 = vmul.f32 %v1474_v11, %v1809_v36  ;;  %v169_v59 = vmul.f32 %v1530_v32, %v1843_v40  ;;  %v243_v17 = vmul.f32 %v1564_v51, %v1875_v56  ;;  %v130_v9 = vmul.f32 %v1472_v10, %v1834_v62  ;;  %2361 = vst [vmem:[#allocation22_spill] sm:$0xff] %v1897_v61  ;;  %v85_v62 = vld [vmem:[%s2310_s0 + $0x110] sm:$0xff] }
  0xa9   :  { %v606_v60 = vpop.permute.xlu0 %605  ;;  %v621_v7 = vpop.permute.xlu1 %620  ;;  %v1882_v27 = vadd.f32 %v1580_v5, %v274_v19  ;;  %v273_v16 = vadd.f32 %v241_v18, %v199_v49  ;;  %v202_v22 = vadd.f32 %v170_v2, %v128_v55  ;;  %v172_v19 = vmul.f32 %v1528_v31, %v1864_v52  ;;  %v1911_v2 = vld [vmem:[%s2310_s0 + $0xf0] sm:$0xff] }
  0xaa   :  { %v1889_v12 = vadd.f32 %v606_v60, %v1737_v29  ;;  %v1892_v21 = vadd.f32 %v621_v7, %v1774_v34  ;;  %v201_v41 = vadd.f32 %v169_v59, %v127_v30  ;;  %v246_v29 = vmul.f32 %v1562_v50, %v1897_v61  ;;  %2362 = vst [vmem:[#allocation23_spill] sm:$0xff] %v1911_v2 }
  0xab   :  { %v1900_v18 = vadd.f32 %v1582_v6, %v273_v16  ;;  %v129_v34 = vmul.f32 %v1474_v11, %v1843_v40  ;;  %v276_v49 = vadd.f32 %v244_v53, %v202_v22  ;;  %v204_v60 = vadd.f32 %v172_v19, %v130_v9 }
  0xac   :  { %v275_v55 = vadd.f32 %v243_v17, %v201_v41  ;;  %v171_v7 = vmul.f32 %v1530_v32, %v1875_v56  ;;  %v245_v16 = vmul.f32 %v1564_v51, %v1911_v2  ;;  %v132_v36 = vmul.f32 %v1472_v10, %v1864_v52  ;;  %v1934_v41 = vld [vmem:[%s2310_s0 + $0x108] sm:$0xff] }
  0xad   :  { %v402_v30 = vpop.permute.xlu0 %401  ;;  %v417_v59 = vpop.permute.xlu1 %416  ;;  %v1926_v22 = vadd.f32 %v1580_v5, %v276_v49  ;;  %2365 = vst [vmem:[#allocation26_spill] sm:$0xff] %v1934_v41  ;;  %v278_v19 = vadd.f32 %v246_v29, %v204_v60  ;;  %v1943_v49 = vld [vmem:[%s2310_s0 + $0x100] sm:$0xff]  ;;  %v173_v29 = vmul.f32 %v1530_v32, %v1911_v2  ;;  %v176_v20 = vmul.f32 %v1528_v31, %v1934_v41 }
  0xae   :  { %v1920_v53 = vmul.f32 %v402_v30, %v1669_v3  ;;  %v1923_v17 = vmul.f32 %v417_v59, %v1672_v4  ;;  %v1929_v9 = vadd.f32 %v1582_v6, %v275_v55  ;;  %v203_v40 = vadd.f32 %v171_v7, %v129_v34  ;;  %2366 = vst [vmem:[#allocation27_spill] sm:$0xff] %v1943_v49  ;;  %v86_v55 = vld [vmem:[%s2310_s0 + $0x118] sm:$0xff] }
  0xaf   :  { %2363 = vst [vmem:[#allocation24_spill] sm:$0xff] %v1926_v22  ;;  %v174_v3 = vmul.f32 %v1528_v31, %v1897_v61  ;;  %v248_v4 = vmul.f32 %v1562_v50, %v1934_v41  ;;  %v131_v30 = vmul.f32 %v1474_v11, %v1875_v56  ;;  %v247_v34 = vmul.f32 %v1564_v51, %v1943_v49 }
  0xb0   :  { %2364 = vst [vmem:[#allocation25_spill] sm:$0xff] %v1929_v9  ;;  %v134_v59 = vmul.f32 %v1472_v10, %v1897_v61  ;;  %v1957_v38 = vadd.f32 %v1580_v5, %v278_v19  ;;  %v277_v57 = vadd.f32 %v245_v16, %v203_v40  ;;  %v250_v52 = vmul.f32 %v1562_v50, %v86_v55 }
  0xb1   :  { %v616_v60 = vpop.permute.xlu0 %615  ;;  %v631_v7 = vpop.permute.xlu1 %630  ;;  %v206_v39 = vadd.f32 %v174_v3, %v132_v36  ;;  %v205_v47 = vadd.f32 %v173_v29, %v131_v30  ;;  %v133_v36 = vmul.f32 %v1474_v11, %v1911_v2  ;;  %v175_v31 = vmul.f32 %v1530_v32, %v1943_v49 }
  0xb2   :  { %2367 = vst [vmem:[#allocation28_spill] sm:$0xff] %v1957_v38  ;;  %v1961_v56 = vadd.f32 %v616_v60, %v525_v42  ;;  %v1968_v10 = vadd.f32 %v1582_v6, %v277_v57  ;;  %v208_v19 = vadd.f32 %v176_v20, %v134_v59  ;;  %v249_v55 = vmul.f32 %v1564_v51, %v85_v62 }
  0xb3   :  { %v280_v61 = vadd.f32 %v248_v4, %v206_v39  ;;  %v279_v40 = vadd.f32 %v247_v34, %v205_v47  ;;  %v207_v20 = vadd.f32 %v175_v31, %v133_v36  ;;  %v790_v8 = vadd.f32 %v1734_v28, %v1696_v37 }
  0xb4   :  { %2368 = vst [vmem:[#allocation29_spill] sm:$0xff] %v1968_v10  ;;  %v282_v3 = vadd.f32 %v250_v52, %v208_v19  ;;  %v775_v54 = vadd.f32 %v1818_v33, %v1777_v35 }
  0xb5   :  { %v412_v42 = vpop.permute.xlu0 %411  ;;  %v427_v16 = vpop.permute.xlu1 %426  ;;  %v1975_v50 = vadd.f32 %v1580_v5, %v280_v61  ;;  %v1980_v39 = vadd.f32 %v1582_v6, %v279_v40  ;;  %v281_v47 = vadd.f32 %v249_v55, %v207_v20 }
  0xb6   :  { %v529_v57 = vmul.f32 %v412_v42, %v1676_v15  ;;  %v1983_v11 = vadd.f32 %v1580_v5, %v282_v3  ;;  %v776_v10 = vadd.f32 %v775_v54, %v1889_v12  ;;  %v532_v22 = vmul.f32 %v427_v16, %v1710_v24 }
  0xb7   :  { %2369 = vst [vmem:[#allocation30_spill] sm:$0xff] %v1975_v50  ;;  %2370 = vst [vmem:[#allocation31_spill] sm:$0xff] %v1980_v39  ;;  %v1986_v30 = vadd.f32 %v1582_v6, %v281_v47  ;;  %v791_v39 = vadd.f32 %v790_v8, %v1821_v46  ;;  %v1994_v50 = vadd.f32 %v631_v7, %v1851_v44 }
  0xb8   :  { %2371 = vst [vmem:[#allocation32_spill] sm:$0xff] %v1983_v11  ;;  %v777_v33 = vadd.f32 %v776_v10, %v1961_v56 }
  0xb9   :  { %v626_v4 = vpop.permute.xlu0 %625  ;;  %v641_v32 = vpop.permute.xlu1 %640  ;;  %2372 = vst [vmem:[#allocation33_spill] sm:$0xff] %v1986_v30  ;;  %v792_v9 = vadd.f32 %v791_v39, %v1892_v21 }
  0xba   :  { %v1998_v38 = vadd.f32 %v626_v4, %v1920_v53  ;;  %v2003_v28 = vadd.f32 %v641_v32, %v1923_v17 }
  0xbb   :  { %v793_v54 = vadd.f32 %v792_v9, %v1994_v50 }
  0xbc   :  { %v778_v39 = vadd.f32 %v777_v33, %v1998_v38 }
  0xbd   :  { %v422_v61 = vpop.permute.xlu0 %421  ;;  %v437_v29 = vpop.permute.xlu1 %436  ;;  %v794_v10 = vadd.f32 %v793_v54, %v2003_v28 }
  0xbe   :  { %v531_v35 = vmul.f32 %v422_v61, %v1721_v45  ;;  %v534_v53 = vmul.f32 %v437_v29, %v1751_v58 }
  0xc1   :  { %v636_v52 = vpop.permute.xlu0 %635  ;;  %v651_v34 = vpop.permute.xlu1 %650 }
  0xc2   :  { %v2007_v8 = vadd.f32 %v636_v52, %v529_v57  ;;  %v2011_v4 = vadd.f32 %v651_v34, %v532_v22 }
  0xc4   :  { %v779_v57 = vadd.f32 %v778_v39, %v2007_v8  ;;  %v795_v33 = vadd.f32 %v794_v10, %v2011_v4  ;;  %v2377_v10 = vld [vmem:[#allocation30_spill] sm:$0xff] }
  0xc5   :  { %v432_v51 = vpop.permute.xlu0 %431  ;;  %v447_v62 = vpop.permute.xlu1 %446 }
  0xc6   :  { %v533_v24 = vmul.f32 %v432_v51, %v1754_v25  ;;  %v536_v45 = vmul.f32 %v447_v62, %v1780_v23 }
  0xc9   :  { %v646_v15 = vpop.permute.xlu0 %645  ;;  %v661_v59 = vpop.permute.xlu1 %660 }
  0xca   :  { %v2015_v17 = vadd.f32 %v646_v15, %v531_v35  ;;  %v2019_v16 = vadd.f32 %v661_v59, %v534_v53  ;;  %v2375_v53 = vld [vmem:[#allocation28_spill] sm:$0xff] }
  0xcc   :  { %v780_v61 = vadd.f32 %v779_v57, %v2015_v17  ;;  %v796_v52 = vadd.f32 %v795_v33, %v2019_v16 }
  0xcd   :  { %v442_v60 = vpop.permute.xlu0 %441  ;;  %v457_v19 = vpop.permute.xlu1 %456 }
  0xce   :  { %v535_v9 = vmul.f32 %v442_v60, %v1791_v26  ;;  %v538_v25 = vmul.f32 %v457_v19, %v1826_v63 }
  0xd1   :  { %v656_v36 = vpop.permute.xlu0 %655  ;;  %v671_v40 = vpop.permute.xlu1 %670 }
  0xd2   :  { %v2023_v32 = vadd.f32 %v656_v36, %v533_v24  ;;  %v2027_v35 = vadd.f32 %v671_v40, %v536_v45 }
  0xd4   :  { %v781_v51 = vadd.f32 %v780_v61, %v2023_v32  ;;  %v797_v60 = vadd.f32 %v796_v52, %v2027_v35 }
  0xd5   :  { %v452_v5 = vpop.permute.xlu0 %451  ;;  %v467_v31 = vpop.permute.xlu1 %466 }
  0xd6   :  { %v537_v23 = vmul.f32 %v452_v5, %v1829_v1  ;;  %v540_v26 = vmul.f32 %v467_v31, %v1854_v14  ;;  %v2373_v31 = vld [vmem:[#allocation24_spill] sm:$0xff] }
  0xd9   :  { %v666_v42 = vpop.permute.xlu0 %665  ;;  %v681_v3 = vpop.permute.xlu1 %680 }
  0xda   :  { %v2031_v29 = vadd.f32 %v666_v42, %v535_v9  ;;  %v2035_v34 = vadd.f32 %v681_v3, %v538_v25 }
  0xdc   :  { %v782_v36 = vadd.f32 %v781_v51, %v2031_v29  ;;  %v798_v5 = vadd.f32 %v797_v60, %v2035_v34 }
  0xdd   :  { %v462_v55 = vpop.permute.xlu0 %461  ;;  %v477_v20 = vpop.permute.xlu1 %476 }
  0xde   :  { %v539_v62 = vmul.f32 %v462_v55, %v1859_v48  ;;  %v542_v1 = vmul.f32 %v477_v20, %v1882_v27  ;;  %v2374_v55 = vld [vmem:[#allocation25_spill] sm:$0xff] }
  0xe1   :  { %v676_v6 = vpop.permute.xlu0 %675  ;;  %v691_v47 = vpop.permute.xlu1 %690 }
  0xe2   :  { %v2039_v15 = vadd.f32 %v676_v6, %v537_v23  ;;  %v2043_v19 = vadd.f32 %v691_v47, %v540_v26  ;;  %v2379_v23 = vld [vmem:[#allocation32_spill] sm:$0xff] }
  0xe4   :  { %v783_v3 = vadd.f32 %v782_v36, %v2039_v15  ;;  %v799_v47 = vadd.f32 %v798_v5, %v2043_v19 }
  0xe5   :  { %v472_v49 = vpop.permute.xlu0 %471  ;;  %v487_v2 = vpop.permute.xlu1 %486 }
  0xe6   :  { %v541_v14 = vmul.f32 %v472_v49, %v1900_v18  ;;  %v544_v48 = vmul.f32 %v487_v2, %v2373_v31  ;;  %v2376_v2 = vld [vmem:[#allocation29_spill] sm:$0xff] }
  0xe9   :  { %v686_v41 = vpop.permute.xlu0 %685  ;;  %v701_v43 = vpop.permute.xlu1 %700 }
  0xea   :  { %v2047_v40 = vadd.f32 %v686_v41, %v539_v62  ;;  %v2051_v42 = vadd.f32 %v701_v43, %v542_v1 }
  0xec   :  { %v784_v49 = vadd.f32 %v783_v3, %v2047_v40  ;;  %v800_v43 = vadd.f32 %v799_v47, %v2051_v42  ;;  %v909_v3 = vld [vmem:[%s2314_s10 + $0x8] sm:$0xff]  ;;  %v936_v47 = vld [vmem:[%s2318_s11] sm:$0xff] }
  0xed   :  { %v482_v0 = vpop.permute.xlu0 %481  ;;  %v497_v13 = vpop.permute.xlu1 %496  ;;  %1146 = vmatprep.mubr.msk.f32.mxu0 %vm950_vm0, %v936_v47 }
  0xee   :  { %v543_v6 = vmul.f32 %v482_v0, %v2374_v55  ;;  %v546_v18 = vmul.f32 %v497_v13, %v2375_v53  ;;  %v894_v55 = vld [vmem:[%s2313_s9] sm:$0xff] }
  0xf1   :  { %v696_v30 = vpop.permute.xlu0 %695  ;;  %v711_v11 = vpop.permute.xlu1 %710 }
  0xf2   :  { %v2055_v54 = vadd.f32 %v696_v30, %v541_v14  ;;  %v2059_v41 = vadd.f32 %v711_v11, %v544_v48  ;;  %v2378_v11 = vld [vmem:[#allocation31_spill] sm:$0xff] }
  0xf4   :  { %v785_v45 = vadd.f32 %v784_v49, %v2055_v54  ;;  %v801_v13 = vadd.f32 %v800_v43, %v2059_v41 }
  0xf5   :  { %v492_v44 = vpop.permute.xlu0 %491  ;;  %v507_v7 = vpop.permute.xlu1 %506 }
  0xf6   :  { %v545_v24 = vmul.f32 %v492_v44, %v2376_v2  ;;  %v548_v0 = vmul.f32 %v507_v7, %v2377_v10 }
  0xf9   :  { %v706_v58 = vpop.permute.xlu0 %705  ;;  %v721_v22 = vpop.permute.xlu1 %720 }
  0xfa   :  { %v2062_v39 = vadd.f32 %v706_v58, %v543_v6  ;;  %v2067_v30 = vadd.f32 %v721_v22, %v546_v18  ;;  %v2380_v22 = vld [vmem:[#allocation33_spill] sm:$0xff]  ;;  %v938_v6 = vld [vmem:[%s2315_s12] sm:$0xff] }
  0xfc   :  { %v786_v61 = vadd.f32 %v785_v45, %v2062_v39  ;;  %v802_v44 = vadd.f32 %v801_v13, %v2067_v30 }
  0xfd   :  { %v502_v63 = vpop.permute.xlu0 %501  ;;  %v517_v59 = vpop.permute.xlu1 %516 }
  0xfe   :  { %v547_v33 = vmul.f32 %v502_v63, %v2378_v11  ;;  %v550_v7 = vmul.f32 %v517_v59, %v2379_v23 }
 0x101   :  { %v716_v27 = vpop.permute.xlu0 %715  ;;  %v731_v20 = vpop.permute.xlu1 %730 }
 0x102   :  { %v2072_v25 = vadd.f32 %v716_v27, %v545_v24  ;;  %v2074_v58 = vadd.f32 %v731_v20, %v548_v0  ;;  %v908_v27 = vld [vmem:[%s2314_s10] sm:$0xff]  ;;  %v939_v20 = vld [vmem:[%s2315_s12 + $0x8] sm:$0xff] }
 0x104   :  { %v787_v60 = vadd.f32 %v786_v61, %v2072_v25  ;;  %v803_v63 = vadd.f32 %v802_v44, %v2074_v58 }
 0x105   :  { %v512_v57 = vpop.permute.xlu0 %511  ;;  %v726_v9 = vpop.permute.xlu1 %725 }
 0x106   :  { %v549_v52 = vmul.f32 %v512_v57, %v2380_v22  ;;  %v2080_v26 = vadd.f32 %v726_v9, %v547_v33  ;;  %v1132_v57 = vld [vmem:[%s2319_s13] ss:$0 sm:$0xff]  ;;  %v1133_v9 = vld [vmem:[%s2319_s13 + $0x2] ss:$0 sm:$0xff] }
 0x108   :  { %v788_v14 = vadd.f32 %v787_v60, %v2080_v26 }
 0x109   :  { %v741_v51 = vpop.permute.xlu0 %740  ;;  %v736_v62 = vpop.permute.xlu1 %735 }
 0x10a   :  { %v2084_v1 = vadd.f32 %v741_v51, %v550_v7  ;;  %v2086_v36 = vadd.f32 %v736_v62, %v549_v52 }
 0x10c   :  { %v804_v5 = vadd.f32 %v803_v63, %v2084_v1  ;;  %v789_v59 = vadd.f32 %v788_v14, %v2086_v36 }
 0x10d   :  { %v836_v53 = vpop.permute.xlu0 %835  ;;  %v848_v18 = vpop.permute.xlu1 %847 }
 0x10e   :  { %v807_v31 = vmul.f32 0.0625, %v804_v5  ;;  %v806_v48 = vmul.f32 0.0625, %v789_v59 }
 0x110   :  { %856 = vrot.lane.b32.xlu0 %v807_v31, %s1176_s4  ;;  %818 = vrot.lane.b32.xlu1 %v807_v31, %s1177_s16  ;;  %v851_v44 = vmul.f32 %v848_v18, %v807_v31 }
 0x111   :  { %v831_v49 = vpop.permute.xlu0 %830  ;;  %v843_v43 = vpop.permute.xlu1 %842 }
 0x112   :  { %v850_v63 = vmul.f32 %v843_v43, %v806_v48 }
 0x114   :  { %854 = vrot.lane.b32.xlu0 %v806_v48, %s1176_s4  ;;  %816 = vrot.lane.b32.xlu1 %v806_v48, %s1177_s16 }
 0x115   :  { %v874_v2 = vpop.permute.xlu0 %873  ;;  %v890_v24 = vpop.permute.xlu1 %889 }
 0x118   :  { %917 = vperm.xlu0 %1152, %v909_v3   ;;  %898 = vperm.xlu1 %1153, %v894_v55  }
 0x119   :  { %v869_v10 = vpop.permute.xlu0 %868  ;;  %v885_v0 = vpop.permute.xlu1 %884 }
 0x11c   :  { %942 = vperm.xlu0 %1152, %v938_v6   ;;  %912 = vperm.xlu1 %1153, %v908_v27  }
 0x11d   :  { %v904_v45 = vpop.permute.xlu0 %903 }
 0x120   :  { %947 = vperm.xlu1 %1153, %v939_v20  }
 0x182   :  { %v857_v13 = vpop.permute.xlu0 %856  ;;  %v819_v11 = vpop.permute.xlu1 %818 }
 0x183   :  { %v827_v33 = vmul.f32 %v1132_v57, %v819_v11  ;;  %v865_v61 = vmul.f32 %v1133_v9, %v857_v13 }
 0x185   :  { %v839_v23 = vmul.f32 %v836_v53, %v827_v33  ;;  %v877_v62 = vmul.f32 %v874_v2, %v865_v61 }
 0x186   :  { %v817_v7 = vpop.permute.xlu1 %816  ;;  %v855_v52 = vpop.permute.xlu0 %854 }
 0x187   :  { %v853_v22 = vadd.f32 %v851_v44, %v839_v23  ;;  %v826_v51 = vmul.f32 %v1132_v57, %v817_v7  ;;  %v864_v14 = vmul.f32 %v1133_v9, %v855_v52 }
 0x189   :  { %v838_v60 = vmul.f32 %v831_v49, %v826_v51  ;;  %v879_v5 = vadd.f32 %v877_v62, %v853_v22  ;;  %v876_v3 = vmul.f32 %v869_v10, %v864_v14  ;;  %v2381_v22 = vld [vmem:[#allocation10_spill] sm:$0xff] }
 0x18b   :  { %v852_v59 = vadd.f32 %v850_v63, %v838_v60  ;;  %v893_v55 = vadd.f32 %v890_v24, %v879_v5 }
 0x18d   :  { %v878_v6 = vadd.f32 %v876_v3, %v852_v59  ;;  %v907_v27 = vmul.f32 %v904_v45, %v893_v55 }
 0x18f   :  { %v892_v13 = vadd.f32 %v885_v0, %v878_v6  ;;  %v937_v0 = vld [vmem:[%s2318_s11 + $0x8] sm:$0xff] }
 0x190   :  { %v1167_v6 = vld [vmem:[%s2310_s0 + $0x68] sm:$0xff] }
 0x193   :  { %v918_v20 = vpop.permute.xlu0 %917  ;;  %v899_v47 = vpop.permute.xlu1 %898 }
 0x194   :  { %v921_v11 = vadd.f32 %v918_v20, %v907_v27  ;;  %v906_v53 = vmul.f32 %v899_v47, %v892_v13  ;;  %v1168_v20 = vld [vmem:[%s2310_s0 + $0x78] sm:$0xff] }
 0x196   :  { %v1135_v31 = vmul.f32 -1.442695, %v921_v11 }
 0x197   :  { %v913_v18 = vpop.permute.xlu1 %912 }
 0x198   :  { %1154 = vpow2.f32 %v1135_v31  ;;  %v920_v33 = vadd.f32 %v913_v18, %v906_v53  ;;  %v2383_v53 = vld [vmem:[#allocation7_spill] sm:$0xff] }
 0x19a   :  { %v1134_v57 = vmul.f32 -1.442695, %v920_v33 }
 0x19b   :  { %v948_v61 = vpop.permute.xlu1 %947 }
 0x19c   :  { %1156 = vpow2.f32 %v1134_v57 }
 0x1a5   :  { %v1155_v49 = vpop.eup %1154 }
 0x1a6   :  { %v929_v48 = vadd.f32 1.0, %v1155_v49  ;;  %v2385_v49 = vld [vmem:[#allocation12_spill] sm:$0xff] }
 0x1a8   :  { %1158 = vrcp.f32 %v929_v48 }
 0x1a9   :  { %v1157_v43 = vpop.eup %1156 }
 0x1aa   :  { %v928_v2 = vadd.f32 1.0, %v1157_v43  ;;  %v2386_v43 = vld [vmem:[#allocation15_spill] sm:$0xff] }
 0x1ac   :  { %1160 = vrcp.f32 %v928_v2 }
 0x1b5   :  { %v1159_v24 = vpop.eup %1158 }
 0x1b6   :  { %v935_v10 = vmul.f32 %v1159_v24, %v921_v11  ;;  %v2382_v11 = vld [vmem:[#allocation5_spill] sm:$0xff]  ;;  %v943_v24 = vpop.permute.xlu0 %942 }
 0x1b8   :  { %1142 = vmatprep.subr.mxu0 %v935_v10 }
 0x1b9   :  { %v1161_v45 = vpop.eup %1160  ;;  %1143 = vmatpush3.msra.mxu0 %v935_v10  ;;  %v2387_v10 = vld [vmem:[#allocation18_spill] sm:$0xff] }
 0x1ba   :  { %v934_v9 = vmul.f32 %v1161_v45, %v920_v33  ;;  %v2384_v33 = vld [vmem:[#allocation9_spill] sm:$0xff] }
 0x1bc   :  { %1144 = vmatprep.subr.mxu0 %v934_v9 }
 0x1bd   :  { %1145 = vmatpush3.msra.mxu0 %v934_v9  ;;  %v2388_v9 = vld [vmem:[#allocation20_spill] sm:$0xff] }
 0x1be   :  { %1147 = vmatmul.mubr.msk.f32.vlgmr.msra.gmra.mxu0 %vm950_vm0, %v937_v0 }
 0x27e   :  { %v1148_v44 = vpop.f32.mrf.mxu0 }
 0x27f   :  { %v1029_v23 = vadd.f32 %v1148_v44, %v948_v61  ;;  %v2389_v61 = vld [vmem:[#allocation22_spill] sm:$0xff] }
 0x280   :  { %v1023_v31 = vpop.f32.mrf.mxu0 }
 0x281   :  { %v1033_v7 = vadd.f32 %v1029_v23, %v1696_v37  ;;  %v1035_v52 = vadd.f32 %v1029_v23, %v2381_v22  ;;  %v1037_v51 = vadd.f32 %v1029_v23, %v1821_v46  ;;  %v1039_v62 = vadd.f32 %v1029_v23, %v1892_v21 }
 0x282   :  { %v1041_v60 = vadd.f32 %v1029_v23, %v1994_v50  ;;  %v1043_v63 = vadd.f32 %v1029_v23, %v2003_v28  ;;  %v1045_v14 = vadd.f32 %v1029_v23, %v2011_v4  ;;  %v1047_v5 = vadd.f32 %v1029_v23, %v2019_v16  ;;  %v1162_v4 = vld [vmem:[%s2310_s0 + $0x18] sm:$0xff] }
 0x283   :  { %v1049_v59 = vadd.f32 %v1029_v23, %v2027_v35  ;;  %v1051_v3 = vadd.f32 %v1029_v23, %v2035_v34  ;;  %v1053_v37 = vadd.f32 %v1029_v23, %v2043_v19  ;;  %v1055_v55 = vadd.f32 %v1029_v23, %v2051_v42  ;;  %v1163_v35 = vld [vmem:[%s2310_s0 + $0x28] sm:$0xff]  ;;  %v1164_v19 = vld [vmem:[%s2310_s0 + $0x38] sm:$0xff] }
 0x284   :  { %v1057_v46 = vadd.f32 %v1029_v23, %v2059_v41  ;;  %v1059_v21 = vadd.f32 %v1029_v23, %v2067_v30  ;;  %v1061_v50 = vadd.f32 %v1029_v23, %v2074_v58  ;;  %v1063_v28 = vadd.f32 %v1029_v23, %v2084_v1  ;;  %v1165_v41 = vld [vmem:[%s2310_s0 + $0x48] sm:$0xff]  ;;  %v1166_v58 = vld [vmem:[%s2310_s0 + $0x58] sm:$0xff]  ;;  %v2390_v23 = vld [vmem:[#allocation26_spill] sm:$0xff] }
 0x285   :  { %v1065_v16 = vadd.f32 %v1162_v4, %v1033_v7  ;;  %v1067_v34 = vadd.f32 %v1163_v35, %v1035_v52  ;;  %v1069_v42 = vadd.f32 %v1164_v19, %v1037_v51  ;;  %v1071_v30 = vadd.f32 %v1165_v41, %v1039_v62  ;;  %v2391_v52 = vld [vmem:[#allocation13_spill] sm:$0xff] }
 0x286   :  { %v1073_v1 = vadd.f32 %v1166_v58, %v1041_v60  ;;  %v1075_v27 = vadd.f32 %v1167_v6, %v1043_v63  ;;  %v1077_v47 = vadd.f32 %v1168_v20, %v1045_v14  ;;  %v1079_v13 = vadd.f32 %v1047_v5, %v2382_v11  ;;  %v2392_v62 = vld [vmem:[#allocation17_spill] sm:$0xff] }
 0x287   :  { %v1081_v18 = vadd.f32 %v1049_v59, %v2383_v53  ;;  %v1083_v57 = vadd.f32 %v1051_v3, %v2384_v33  ;;  %v1085_v48 = vadd.f32 %v1053_v37, %v2385_v49  ;;  %v1087_v2 = vadd.f32 %v1055_v55, %v2386_v43  ;;  %1097 = vst [vmem:[%s2320_s14 + $0x8] sm:$0xff] %v1065_v16  ;;  %v2393_v16 = vld [vmem:[#allocation4_spill] sm:$0xff]  ;;  %v2401_v53 = vld [vmem:[#allocation23_spill] sm:$0xff] }
 0x288   :  { %1099 = vst [vmem:[%s2320_s14 + $0x18] sm:$0xff] %v1067_v34  ;;  %1101 = vst [vmem:[%s2320_s14 + $0x28] sm:$0xff] %v1069_v42  ;;  %v1089_v45 = vadd.f32 %v1057_v46, %v2387_v10  ;;  %v1091_v0 = vadd.f32 %v1059_v21, %v2388_v9  ;;  %v1093_v44 = vadd.f32 %v1061_v50, %v2389_v61  ;;  %v2394_v34 = vld [vmem:[#allocation6_spill] sm:$0xff]  ;;  %v2395_v42 = vld [vmem:[#allocation8_spill] sm:$0xff] }
 0x289   :  { %1103 = vst [vmem:[%s2320_s14 + $0x38] sm:$0xff] %v1071_v30  ;;  %v1095_v7 = vadd.f32 %v1063_v28, %v2390_v23  ;;  %1105 = vst [vmem:[%s2320_s14 + $0x48] sm:$0xff] %v1073_v1  ;;  %v1024_v22 = vadd.f32 %v1023_v31, %v943_v24  ;;  %v1174_v28 = vld [vmem:[%s2310_s0 + $0x60] sm:$0xff]  ;;  %v2396_v30 = vld [vmem:[#allocation11_spill] sm:$0xff] }
 0x28a   :  { %1107 = vst [vmem:[%s2320_s14 + $0x58] sm:$0xff] %v1075_v27  ;;  %1109 = vst [vmem:[%s2320_s14 + $0x68] sm:$0xff] %v1077_v47  ;;  %v2397_v1 = vld [vmem:[#allocation14_spill] sm:$0xff]  ;;  %v2398_v27 = vld [vmem:[#allocation16_spill] sm:$0xff] }
 0x28b   :  { %1111 = vst [vmem:[%s2320_s14 + $0x78] sm:$0xff] %v1079_v13  ;;  %1113 = vst [vmem:[%s2320_s14 + $0x88] sm:$0xff] %v1081_v18  ;;  %v1032_v51 = vadd.f32 %v1024_v22, %v2391_v52  ;;  %v1034_v60 = vadd.f32 %v1024_v22, %v2392_v62  ;;  %v1036_v63 = vadd.f32 %v1024_v22, %v1889_v12  ;;  %v2399_v47 = vld [vmem:[#allocation19_spill] sm:$0xff]  ;;  %v2400_v13 = vld [vmem:[#allocation21_spill] sm:$0xff] }
 0x28c   :  { %1115 = vst [vmem:[%s2320_s14 + $0x98] sm:$0xff] %v1083_v57  ;;  %1117 = vst [vmem:[%s2320_s14 + $0xa8] sm:$0xff] %v1085_v48  ;;  %v1038_v14 = vadd.f32 %v1024_v22, %v1961_v56  ;;  %v1040_v5 = vadd.f32 %v1024_v22, %v1998_v38  ;;  %v1042_v59 = vadd.f32 %v1024_v22, %v2007_v8  ;;  %v2402_v33 = vld [vmem:[#allocation27_spill] sm:$0xff] }
 0x28d   :  { %1119 = vst [vmem:[%s2320_s14 + $0xb8] sm:$0xff] %v1087_v2  ;;  %1121 = vst [vmem:[%s2320_s14 + $0xc8] sm:$0xff] %v1089_v45  ;;  %v1044_v3 = vadd.f32 %v1024_v22, %v2015_v17  ;;  %v1046_v37 = vadd.f32 %v1024_v22, %v2023_v32  ;;  %v1048_v55 = vadd.f32 %v1024_v22, %v2031_v29  ;;  %v1169_v17 = vld [vmem:[%s2310_s0 + $0x10] sm:$0xff]  ;;  %v1170_v29 = vld [vmem:[%s2310_s0 + $0x20] sm:$0xff] }
 0x28e   :  { %1123 = vst [vmem:[%s2320_s14 + $0xd8] sm:$0xff] %v1091_v0  ;;  %1125 = vst [vmem:[%s2320_s14 + $0xe8] sm:$0xff] %v1093_v44  ;;  %v1050_v46 = vadd.f32 %v1024_v22, %v2039_v15  ;;  %v1052_v21 = vadd.f32 %v1024_v22, %v2047_v40  ;;  %v1054_v50 = vadd.f32 %v1024_v22, %v2055_v54  ;;  %v1171_v40 = vld [vmem:[%s2310_s0 + $0x30] sm:$0xff] }
 0x28f   :  { %1127 = vst [vmem:[%s2320_s14 + $0xf8] sm:$0xff] %v1095_v7  ;;  %v1056_v12 = vadd.f32 %v1024_v22, %v2062_v39  ;;  %v1058_v56 = vadd.f32 %v1024_v22, %v2072_v25  ;;  %v1060_v38 = vadd.f32 %v1024_v22, %v2080_v26  ;;  %v1062_v8 = vadd.f32 %v1024_v22, %v2086_v36  ;;  %v1172_v39 = vld [vmem:[%s2310_s0 + $0x40] sm:$0xff]  ;;  %v1173_v26 = vld [vmem:[%s2310_s0 + $0x50] sm:$0xff] }
 0x290   :  { %v1064_v32 = vadd.f32 %v1169_v17, %v1032_v51  ;;  %v1066_v15 = vadd.f32 %v1170_v29, %v1034_v60  ;;  %v1068_v54 = vadd.f32 %v1171_v40, %v1036_v63  ;;  %v1070_v25 = vadd.f32 %v1172_v39, %v1038_v14 }
 0x291   :  { %v1072_v36 = vadd.f32 %v1173_v26, %v1040_v5  ;;  %v1074_v4 = vadd.f32 %v1174_v28, %v1042_v59  ;;  %v1076_v35 = vadd.f32 %v1044_v3, %v2393_v16  ;;  %v1078_v19 = vadd.f32 %v1046_v37, %v2394_v34 }
 0x292   :  { %v1080_v41 = vadd.f32 %v1048_v55, %v2395_v42  ;;  %v1082_v58 = vadd.f32 %v1050_v46, %v2396_v30  ;;  %v1084_v6 = vadd.f32 %v1052_v21, %v2397_v1  ;;  %v1086_v20 = vadd.f32 %v1054_v50, %v2398_v27  ;;  %1096 = vst [vmem:[%s2320_s14] sm:$0xff] %v1064_v32 }
 0x293   :  { %1098 = vst [vmem:[%s2320_s14 + $0x10] sm:$0xff] %v1066_v15  ;;  %1100 = vst [vmem:[%s2320_s14 + $0x20] sm:$0xff] %v1068_v54  ;;  %v1088_v11 = vadd.f32 %v1056_v12, %v2399_v47  ;;  %v1090_v31 = vadd.f32 %v1058_v56, %v2400_v13  ;;  %v1092_v18 = vadd.f32 %v1060_v38, %v2401_v53 }
 0x294   :  { %1102 = vst [vmem:[%s2320_s14 + $0x30] sm:$0xff] %v1070_v25  ;;  %v1094_v57 = vadd.f32 %v1062_v8, %v2402_v33  ;;  %1104 = vst [vmem:[%s2320_s14 + $0x40] sm:$0xff] %v1072_v36 }
 0x295   :  { %1106 = vst [vmem:[%s2320_s14 + $0x50] sm:$0xff] %v1074_v4  ;;  %1108 = vst [vmem:[%s2320_s14 + $0x60] sm:$0xff] %v1076_v35 }
 0x296   :  { %1110 = vst [vmem:[%s2320_s14 + $0x70] sm:$0xff] %v1078_v19  ;;  %1112 = vst [vmem:[%s2320_s14 + $0x80] sm:$0xff] %v1080_v41 }
 0x297   :  { %1114 = vst [vmem:[%s2320_s14 + $0x90] sm:$0xff] %v1082_v58  ;;  %1116 = vst [vmem:[%s2320_s14 + $0xa0] sm:$0xff] %v1084_v6 }
 0x298   :  { %1118 = vst [vmem:[%s2320_s14 + $0xb0] sm:$0xff] %v1086_v20  ;;  %1120 = vst [vmem:[%s2320_s14 + $0xc0] sm:$0xff] %v1088_v11 }
 0x299   :  { %1122 = vst [vmem:[%s2320_s14 + $0xd0] sm:$0xff] %v1090_v31  ;;  %1124 = vst [vmem:[%s2320_s14 + $0xe0] sm:$0xff] %v1092_v18 }
 0x29a   :  { %1126 = vst [vmem:[%s2320_s14 + $0xf0] sm:$0xff] %v1094_v57 }

// kernel: _lambda_.2
= control target key start
LH: loop header
LB: loop body
LE: loop exit
PB: predicated region body
PF: predicated region fallthrough
CT: control target
= control target key end

     0   :  { %vm324_vm0 = vcmask 1043456   ;;  %v3072_v0 = vmov 0   ;;  %vm317_vm1 = vcmask 31744   ;;  %s3073_s23 = smov 127   ;;  %vm2694_vm2 = vcmask 130048   ;;  %s4455_s2 = inlined_call_operand.vmem [shape: f32[18,16,1], index: 2, kind: input, shape index: {}]   ;;  %s4456_s0 = inlined_call_operand.vmem [shape: f32[18,4,128], index: 0, kind: input, shape index: {}]   ;;  %s4457_s1 = inlined_call_operand.vmem [shape: f32[18,16,4], index: 1, kind: input, shape index: {}]   ;;  %s4458_s3 = inlined_call_operand.vmem [shape: f32[3,1,16,1], index: 3, kind: input, shape index: {}]   ;;  %s4459_s4 = inlined_call_operand.vmem [shape: f32[1,16,1], index: 4, kind: input, shape index: {}]   ;;  %s4460_s5 = inlined_call_operand.vmem [shape: f32[16,16,1], index: 5, kind: input, shape index: {}]   ;;  %s4461_s6 = inlined_call_operand.vmem [shape: f32[16,16,1], index: 6, kind: input, shape index: {}]   ;;  %s4462_s7 = inlined_call_operand.vmem [shape: f32[3,16,1], index: 7, kind: input, shape index: {}]   ;;  %s4463_s8 = inlined_call_operand.vmem [shape: f32[16,1], index: 8, kind: input, shape index: {}]   ;;  %s4464_s9 = inlined_call_operand.vmem [shape: f32[16,1], index: 9, kind: input, shape index: {}]   ;;  %s4465_s10 = inlined_call_operand.vmem [shape: f32[16,1], index: 10, kind: input, shape index: {}]   ;;  %s4466_s12 = inlined_call_operand.vmem [shape: f32[16,1], index: 12, kind: input, shape index: {}]   ;;  %s4467_s11 = inlined_call_operand.vmem [shape: f32[16,16], index: 11, kind: input, shape index: {}]   ;;  %s4468_s13 = inlined_call_operand.vmem [shape: f32[3,1,128], index: 13, kind: input, shape index: {}]   ;;  %s4469_s14 = inlined_call_operand.vmem [shape: f32[16,16,128], index: 14, kind: output, shape index: {}]  }
   0x1   :  { %3063 = vset.pattern.permute.xlu1 %v3072_v0  ;;  %3062 = vset.pattern.permute.xlu0 %v3072_v0  ;;  %v103_v1 = vld [vmem:[%s4455_s2 + $0x10] sm:$0xff]  ;;  %v101_v2 = vld [vmem:[%s4455_s2] sm:$0xff]  ;;  %v66_v7 = vld [vmem:[%s4457_s1 + $0x8] sm:$0xff] }
   0x2   :  { %v47_v3 = vld [vmem:[%s4456_s0] sm:$0xf]  ;;  %149 = vperm.xlu1 %3063, %v103_v1   ;;  %139 = vperm.xlu0 %3062, %v101_v2   ;;  %v48_v4 = vld [vmem:[%s4456_s0 + $0x4] sm:$0xf]  ;;  %v67_v6 = vld [vmem:[%s4457_s1 + $0x10] sm:$0xff] }
   0x3   :  { %v65_v5 = vld [vmem:[%s4457_s1] sm:$0xff]  ;;  %2962 = vmatprep.subr.msk.mxu0 %vm324_vm0, %v47_v3  ;;  %2967 = vmatprep.subr.msk.mxu1 %vm324_vm0, %v48_v4  ;;  %v68_v8 = vld [vmem:[%s4457_s1 + $0x18] sm:$0xff]  ;;  %v102_v10 = vld [vmem:[%s4455_s2 + $0x8] sm:$0xff] }
   0x4   :  { %2963 = vmatpush3.msk.msra.mxu0 %vm324_vm0, %v47_v3  ;;  %2964 = vmatprep.mubr.msk.f32.mxu0 %vm317_vm1, %v65_v5  ;;  %v104_v9 = vld [vmem:[%s4455_s2 + $0x18] sm:$0xff]  ;;  %v49_v11 = vld [vmem:[%s4456_s0 + $0x8] sm:$0xf]  ;;  %v50_v12 = vld [vmem:[%s4456_s0 + $0xc] sm:$0xf] }
   0x5   :  { %2968 = vmatpush3.msk.msra.mxu1 %vm324_vm0, %v48_v4  ;;  %2969 = vmatprep.mubr.msk.f32.mxu1 %vm317_vm1, %v67_v6  ;;  %v69_v13 = vld [vmem:[%s4457_s1 + $0x20] sm:$0xff]  ;;  %v71_v14 = vld [vmem:[%s4457_s1 + $0x30] sm:$0xff]  ;;  %v70_v15 = vld [vmem:[%s4457_s1 + $0x28] sm:$0xff] }
   0x6   :  { %2965 = vmatmul.mubr.msk.f32.vlgmr.msra.gmra.mxu0 %vm317_vm1, %v66_v7  ;;  %2970 = vmatmul.mubr.msk.f32.vlgmr.msra.gmra.mxu1 %vm317_vm1, %v68_v8  ;;  %v72_v16 = vld [vmem:[%s4457_s1 + $0x38] sm:$0xff]  ;;  %v106_v17 = vld [vmem:[%s4455_s2 + $0x28] sm:$0xff]  ;;  %v105_v18 = vld [vmem:[%s4455_s2 + $0x20] sm:$0xff] }
   0x7   :  { %154 = vperm.xlu1 %3063, %v104_v9   ;;  %144 = vperm.xlu0 %3062, %v102_v10   ;;  %v51_v19 = vld [vmem:[%s4456_s0 + $0x10] sm:$0xf]  ;;  %v52_v20 = vld [vmem:[%s4456_s0 + $0x14] sm:$0xf]  ;;  %v73_v21 = vld [vmem:[%s4457_s1 + $0x40] sm:$0xff] }
   0x8   :  { %2972 = vmatprep.subr.msk.mxu0 %vm324_vm0, %v49_v11  ;;  %2977 = vmatprep.subr.msk.mxu1 %vm324_vm0, %v50_v12  ;;  %v75_v22 = vld [vmem:[%s4457_s1 + $0x50] sm:$0xff]  ;;  %v74_v23 = vld [vmem:[%s4457_s1 + $0x48] sm:$0xff]  ;;  %v76_v24 = vld [vmem:[%s4457_s1 + $0x58] sm:$0xff] }
   0x9   :  { %2973 = vmatpush3.msk.msra.mxu0 %vm324_vm0, %v49_v11  ;;  %2974 = vmatprep.mubr.msk.f32.mxu0 %vm317_vm1, %v69_v13  ;;  %v108_v25 = vld [vmem:[%s4455_s2 + $0x38] sm:$0xff]  ;;  %v107_v26 = vld [vmem:[%s4455_s2 + $0x30] sm:$0xff]  ;;  %v77_v29 = vld [vmem:[%s4457_s1 + $0x60] sm:$0xff] }
   0xa   :  { %2978 = vmatpush3.msk.msra.mxu1 %vm324_vm0, %v50_v12  ;;  %2979 = vmatprep.mubr.msk.f32.mxu1 %vm317_vm1, %v71_v14  ;;  %v53_v27 = vld [vmem:[%s4456_s0 + $0x18] sm:$0xf]  ;;  %v54_v28 = vld [vmem:[%s4456_s0 + $0x1c] sm:$0xf]  ;;  %v79_v30 = vld [vmem:[%s4457_s1 + $0x70] sm:$0xff] }
   0xb   :  { %2975 = vmatmul.mubr.msk.f32.vlgmr.msra.gmra.mxu0 %vm317_vm1, %v70_v15  ;;  %2980 = vmatmul.mubr.msk.f32.vlgmr.msra.gmra.mxu1 %vm317_vm1, %v72_v16  ;;  %v78_v31 = vld [vmem:[%s4457_s1 + $0x68] sm:$0xff]  ;;  %v80_v32 = vld [vmem:[%s4457_s1 + $0x78] sm:$0xff]  ;;  %v109_v34 = vld [vmem:[%s4455_s2 + $0x40] sm:$0xff] }
   0xc   :  { %164 = vperm.xlu1 %3063, %v106_v17   ;;  %159 = vperm.xlu0 %3062, %v105_v18   ;;  %v110_v33 = vld [vmem:[%s4455_s2 + $0x48] sm:$0xff]  ;;  %v55_v35 = vld [vmem:[%s4456_s0 + $0x20] sm:$0xf]  ;;  %v56_v36 = vld [vmem:[%s4456_s0 + $0x24] sm:$0xf] }
   0xd   :  { %2982 = vmatprep.subr.msk.mxu0 %vm324_vm0, %v51_v19  ;;  %2987 = vmatprep.subr.msk.mxu1 %vm324_vm0, %v52_v20  ;;  %v81_v37 = vld [vmem:[%s4457_s1 + $0x80] sm:$0xff]  ;;  %v83_v38 = vld [vmem:[%s4457_s1 + $0x90] sm:$0xff]  ;;  %v82_v39 = vld [vmem:[%s4457_s1 + $0x88] sm:$0xff] }
   0xe   :  { %2983 = vmatpush3.msk.msra.mxu0 %vm324_vm0, %v51_v19  ;;  %2984 = vmatprep.mubr.msk.f32.mxu0 %vm317_vm1, %v73_v21  ;;  %v84_v40 = vld [vmem:[%s4457_s1 + $0x98] sm:$0xff]  ;;  %v111_v42 = vld [vmem:[%s4455_s2 + $0x50] sm:$0xff]  ;;  %v57_v43 = vld [vmem:[%s4456_s0 + $0x28] sm:$0xf] }
   0xf   :  { %2988 = vmatpush3.msk.msra.mxu1 %vm324_vm0, %v52_v20  ;;  %2989 = vmatprep.mubr.msk.f32.mxu1 %vm317_vm1, %v75_v22  ;;  %v112_v41 = vld [vmem:[%s4455_s2 + $0x58] sm:$0xff]  ;;  %v85_v44 = vld [vmem:[%s4457_s1 + $0xa0] sm:$0xff]  ;;  %v58_v45 = vld [vmem:[%s4456_s0 + $0x2c] sm:$0xf] }
  0x10   :  { %2985 = vmatmul.mubr.msk.f32.vlgmr.msra.gmra.mxu0 %vm317_vm1, %v74_v23  ;;  %2990 = vmatmul.mubr.msk.f32.vlgmr.msra.gmra.mxu1 %vm317_vm1, %v76_v24  ;;  %v86_v46 = vld [vmem:[%s4457_s1 + $0xa8] sm:$0xff]  ;;  %v87_v47 = vld [vmem:[%s4457_s1 + $0xb0] sm:$0xff]  ;;  %v88_v49 = vld [vmem:[%s4457_s1 + $0xb8] sm:$0xff] }
  0x11   :  { %174 = vperm.xlu1 %3063, %v108_v25   ;;  %169 = vperm.xlu0 %3062, %v107_v26   ;;  %v114_v48 = vld [vmem:[%s4455_s2 + $0x68] sm:$0xff]  ;;  %v113_v50 = vld [vmem:[%s4455_s2 + $0x60] sm:$0xff]  ;;  %v59_v51 = vld [vmem:[%s4456_s0 + $0x30] sm:$0xf] }
  0x12   :  { %2992 = vmatprep.subr.msk.mxu0 %vm324_vm0, %v53_v27  ;;  %2997 = vmatprep.subr.msk.mxu1 %vm324_vm0, %v54_v28  ;;  %v89_v52 = vld [vmem:[%s4457_s1 + $0xc0] sm:$0xff]  ;;  %v60_v53 = vld [vmem:[%s4456_s0 + $0x34] sm:$0xf]  ;;  %v116_v54 = vld [vmem:[%s4455_s2 + $0x78] sm:$0xff] }
  0x13   :  { %2993 = vmatpush3.msk.msra.mxu0 %vm324_vm0, %v53_v27  ;;  %2994 = vmatprep.mubr.msk.f32.mxu0 %vm317_vm1, %v77_v29  ;;  %v90_v55 = vld [vmem:[%s4457_s1 + $0xc8] sm:$0xff]  ;;  %v115_v56 = vld [vmem:[%s4455_s2 + $0x70] sm:$0xff]  ;;  %v61_v58 = vld [vmem:[%s4456_s0 + $0x38] sm:$0xf] }
  0x14   :  { %2998 = vmatpush3.msk.msra.mxu1 %vm324_vm0, %v54_v28  ;;  %2999 = vmatprep.mubr.msk.f32.mxu1 %vm317_vm1, %v79_v30  ;;  %v91_v57 = vld [vmem:[%s4457_s1 + $0xd0] sm:$0xff]  ;;  %v92_v59 = vld [vmem:[%s4457_s1 + $0xd8] sm:$0xff]  ;;  %v118_v60 = vld [vmem:[%s4455_s2 + $0x88] sm:$0xff] }
  0x15   :  { %2995 = vmatmul.mubr.msk.f32.vlgmr.msra.gmra.mxu0 %vm317_vm1, %v78_v31  ;;  %3000 = vmatmul.mubr.msk.f32.vlgmr.msra.gmra.mxu1 %vm317_vm1, %v80_v32  ;;  %v93_v61 = vld [vmem:[%s4457_s1 + $0xe0] sm:$0xff]  ;;  %v94_v63 = vld [vmem:[%s4457_s1 + $0xe8] sm:$0xff]  ;;  %v62_v0 = vld [vmem:[%s4456_s0 + $0x3c] sm:$0xf] }
  0x16   :  { %184 = vperm.xlu1 %3063, %v110_v33   ;;  %179 = vperm.xlu0 %3062, %v109_v34   ;;  %v117_v62 = vld [vmem:[%s4455_s2 + $0x80] sm:$0xff]  ;;  %v95_v1 = vld [vmem:[%s4457_s1 + $0xf0] sm:$0xff]  ;;  %v120_v3 = vld [vmem:[%s4455_s2 + $0x98] sm:$0xff] }
  0x17   :  { %3002 = vmatprep.subr.msk.mxu0 %vm324_vm0, %v55_v35  ;;  %3007 = vmatprep.subr.msk.mxu1 %vm324_vm0, %v56_v36  ;;  %v63_v2 = vld [vmem:[%s4456_s0 + $0x40] sm:$0xf]  ;;  %v96_v4 = vld [vmem:[%s4457_s1 + $0xf8] sm:$0xff]  ;;  %v119_v5 = vld [vmem:[%s4455_s2 + $0x90] sm:$0xff] }
  0x18   :  { %3003 = vmatpush3.msk.msra.mxu0 %vm324_vm0, %v55_v35  ;;  %3004 = vmatprep.mubr.msk.f32.mxu0 %vm317_vm1, %v81_v37  ;;  %v97_v6 = vld [vmem:[%s4457_s1 + $0x100] sm:$0xff]  ;;  %v98_v8 = vld [vmem:[%s4457_s1 + $0x108] sm:$0xff]  ;;  %v1834_v9 = vld [vmem:[%s4458_s3 + $0x18] sm:$0xff] }
  0x19   :  { %3008 = vmatpush3.msk.msra.mxu1 %vm324_vm0, %v56_v36  ;;  %3009 = vmatprep.mubr.msk.f32.mxu1 %vm317_vm1, %v83_v38  ;;  %v64_v7 = vld [vmem:[%s4456_s0 + $0x44] sm:$0xf]  ;;  %v99_v10 = vld [vmem:[%s4457_s1 + $0x110] sm:$0xff]  ;;  %v1832_v11 = vld [vmem:[%s4458_s3 + $0x8] sm:$0xff] }
  0x1a   :  { %3005 = vmatmul.mubr.msk.f32.vlgmr.msra.gmra.mxu0 %vm317_vm1, %v82_v39  ;;  %3010 = vmatmul.mubr.msk.f32.vlgmr.msra.gmra.mxu1 %vm317_vm1, %v84_v40  ;;  %v100_v12 = vld [vmem:[%s4457_s1 + $0x118] sm:$0xff]  ;;  %v1833_v13 = vld [vmem:[%s4458_s3 + $0x10] sm:$0xff]  ;;  %v1831_v14 = vld [vmem:[%s4458_s3] sm:$0xff]  ;;  %s3074_s1 = smov 1  }
  0x1b   :  { %194 = vperm.xlu1 %3063, %v112_v41   ;;  %189 = vperm.xlu0 %3062, %v111_v42   ;;  %v1835_v15 = vld [vmem:[%s4458_s3 + $0x20] sm:$0xff]  ;;  %v1836_v16 = vld [vmem:[%s4458_s3 + $0x28] sm:$0xff]  ;;  %v2074_v19 = vld [vmem:[%s4460_s5 + $0x18] sm:$0xff] }
  0x1c   :  { %3012 = vmatprep.subr.msk.mxu0 %vm324_vm0, %v57_v43  ;;  %3014 = vmatprep.mubr.msk.f32.mxu0 %vm317_vm1, %v85_v44  ;;  %v2027_v17 = vld [vmem:[%s4459_s4] sm:$0xff]  ;;  %v2028_v18 = vld [vmem:[%s4459_s4 + $0x8] sm:$0xff]  ;;  %v2073_v21 = vld [vmem:[%s4460_s5 + $0x10] sm:$0xff] }
  0x1d   :  { %3013 = vmatpush3.msk.msra.mxu0 %vm324_vm0, %v57_v43  ;;  %3017 = vmatprep.subr.msk.mxu1 %vm324_vm0, %v58_v45  ;;  %v2072_v20 = vld [vmem:[%s4460_s5 + $0x8] sm:$0xff]  ;;  %v2071_v22 = vld [vmem:[%s4460_s5] sm:$0xff]  ;;  %v2298_v26 = vld [vmem:[%s4461_s6 + $0x18] sm:$0xff] }
  0x1e   :  { %3015 = vmatmul.mubr.msk.f32.vlgmr.msra.gmra.mxu0 %vm317_vm1, %v86_v46  ;;  %3018 = vmatpush3.msk.msra.mxu1 %vm324_vm0, %v58_v45  ;;  %v2296_v23 = vld [vmem:[%s4461_s6 + $0x8] sm:$0xff]  ;;  %v2075_v25 = vld [vmem:[%s4460_s5 + $0x20] sm:$0xff]  ;;  %v2078_v28 = vld [vmem:[%s4460_s5 + $0x38] sm:$0xff] }
  0x1f   :  { %3019 = vmatprep.mubr.msk.f32.mxu1 %vm317_vm1, %v87_v47  ;;  %204 = vperm.xlu1 %3063, %v114_v48   ;;  %v2076_v24 = vld [vmem:[%s4460_s5 + $0x28] sm:$0xff]  ;;  %v2295_v27 = vld [vmem:[%s4461_s6] sm:$0xff]  ;;  %v2297_v30 = vld [vmem:[%s4461_s6 + $0x10] sm:$0xff] }
  0x20   :  { %3020 = vmatmul.mubr.msk.f32.vlgmr.msra.gmra.mxu1 %vm317_vm1, %v88_v49  ;;  %199 = vperm.xlu0 %3062, %v113_v50   ;;  %v2300_v29 = vld [vmem:[%s4461_s6 + $0x28] sm:$0xff]  ;;  %v2077_v31 = vld [vmem:[%s4460_s5 + $0x30] sm:$0xff]  ;;  %v2299_v33 = vld [vmem:[%s4461_s6 + $0x20] sm:$0xff] }
  0x21   :  { %3022 = vmatprep.subr.msk.mxu0 %vm324_vm0, %v59_v51  ;;  %3024 = vmatprep.mubr.msk.f32.mxu0 %vm317_vm1, %v89_v52  ;;  %v122_v32 = vld [vmem:[%s4455_s2 + $0xa8] sm:$0xff]  ;;  %v121_v35 = vld [vmem:[%s4455_s2 + $0xa0] sm:$0xff]  ;;  %v2302_v36 = vld [vmem:[%s4461_s6 + $0x38] sm:$0xff] }
  0x22   :  { %3023 = vmatpush3.msk.msra.mxu0 %vm324_vm0, %v59_v51  ;;  %3027 = vmatprep.subr.msk.mxu1 %vm324_vm0, %v60_v53  ;;  %v2080_v34 = vld [vmem:[%s4460_s5 + $0x48] sm:$0xff]  ;;  %v2079_v37 = vld [vmem:[%s4460_s5 + $0x40] sm:$0xff]  ;;  %v124_v38 = vld [vmem:[%s4455_s2 + $0xb8] sm:$0xff] }
  0x23   :  { %214 = vperm.xlu1 %3063, %v116_v54   ;;  %3025 = vmatmul.mubr.msk.f32.vlgmr.msra.gmra.mxu0 %vm317_vm1, %v90_v55  ;;  %v2301_v39 = vld [vmem:[%s4461_s6 + $0x30] sm:$0xff]  ;;  %v2082_v40 = vld [vmem:[%s4460_s5 + $0x58] sm:$0xff]  ;;  %v2304_v42 = vld [vmem:[%s4461_s6 + $0x48] sm:$0xff] }
  0x24   :  { %209 = vperm.xlu0 %3062, %v115_v56   ;;  %3028 = vmatpush3.msk.msra.mxu1 %vm324_vm0, %v60_v53  ;;  %v123_v41 = vld [vmem:[%s4455_s2 + $0xb0] sm:$0xff]  ;;  %v126_v44 = vld [vmem:[%s4455_s2 + $0xc8] sm:$0xff]  ;;  %v2303_v45 = vld [vmem:[%s4461_s6 + $0x40] sm:$0xff] }
  0x25   :  { %3029 = vmatprep.mubr.msk.f32.mxu1 %vm317_vm1, %v91_v57  ;;  %3032 = vmatprep.subr.msk.mxu0 %vm324_vm0, %v61_v58  ;;  %v2081_v43 = vld [vmem:[%s4460_s5 + $0x50] sm:$0xff]  ;;  %v2084_v46 = vld [vmem:[%s4460_s5 + $0x68] sm:$0xff]  ;;  %v125_v47 = vld [vmem:[%s4455_s2 + $0xc0] sm:$0xff] }
  0x26   :  { %3030 = vmatmul.mubr.msk.f32.vlgmr.msra.gmra.mxu1 %vm317_vm1, %v92_v59  ;;  %3033 = vmatpush3.msk.msra.mxu0 %vm324_vm0, %v61_v58  ;;  %v2306_v48 = vld [vmem:[%s4461_s6 + $0x58] sm:$0xff]  ;;  %v2083_v49 = vld [vmem:[%s4460_s5 + $0x60] sm:$0xff]  ;;  %v2305_v51 = vld [vmem:[%s4461_s6 + $0x50] sm:$0xff] }
  0x27   :  { %224 = vperm.xlu1 %3063, %v118_v60   ;;  %3034 = vmatprep.mubr.msk.f32.mxu0 %vm317_vm1, %v93_v61  ;;  %v128_v50 = vld [vmem:[%s4455_s2 + $0xd8] sm:$0xff]  ;;  %v127_v55 = vld [vmem:[%s4455_s2 + $0xd0] sm:$0xff]  ;;  %v2308_v56 = vld [vmem:[%s4461_s6 + $0x68] sm:$0xff] }
  0x28   :  { %219 = vperm.xlu0 %3062, %v117_v62   ;;  %3035 = vmatmul.mubr.msk.f32.vlgmr.msra.gmra.mxu0 %vm317_vm1, %v94_v63  ;;  %v2086_v52 = vld [vmem:[%s4460_s5 + $0x78] sm:$0xff]  ;;  %v2085_v59 = vld [vmem:[%s4460_s5 + $0x70] sm:$0xff]  ;;  %v130_v60 = vld [vmem:[%s4455_s2 + $0xe8] sm:$0xff] }
  0x29   :  { %3037 = vmatprep.subr.msk.mxu1 %vm324_vm0, %v62_v0  ;;  %3039 = vmatprep.mubr.msk.f32.mxu1 %vm317_vm1, %v95_v1  ;;  %v2307_v63 = vld [vmem:[%s4461_s6 + $0x60] sm:$0xff] }
  0x2a   :  { %3038 = vmatpush3.msk.msra.mxu1 %vm324_vm0, %v62_v0  ;;  %3042 = vmatprep.subr.msk.mxu0 %vm324_vm0, %v63_v2  ;;  %v2088_v0 = vld [vmem:[%s4460_s5 + $0x88] sm:$0xff] }
  0x2b   :  { %234 = vperm.xlu1 %3063, %v120_v3   ;;  %3040 = vmatmul.mubr.msk.f32.vlgmr.msra.gmra.mxu1 %vm317_vm1, %v96_v4  ;;  %v129_v3 = vld [vmem:[%s4455_s2 + $0xe0] sm:$0xff]  ;;  %v2310_v4 = vld [vmem:[%s4461_s6 + $0x78] sm:$0xff] }
  0x2c   :  { %229 = vperm.xlu0 %3062, %v119_v5   ;;  %3043 = vmatpush3.msk.msra.mxu0 %vm324_vm0, %v63_v2  ;;  %v2087_v5 = vld [vmem:[%s4460_s5 + $0x80] sm:$0xff] }
  0x2d   :  { %3044 = vmatprep.mubr.msk.f32.mxu0 %vm317_vm1, %v97_v6  ;;  %3047 = vmatprep.subr.msk.mxu1 %vm324_vm0, %v64_v7 }
  0x2e   :  { %3045 = vmatmul.mubr.msk.f32.vlgmr.msra.gmra.mxu0 %vm317_vm1, %v98_v8  ;;  %3048 = vmatpush3.msk.msra.mxu1 %vm324_vm0, %v64_v7  ;;  %v132_v8 = vld [vmem:[%s4455_s2 + $0xf8] sm:$0xff] }
  0x2f   :  { %1886 = vperm.xlu1 %3063, %v1834_v9   ;;  %3049 = vmatprep.mubr.msk.f32.mxu1 %vm317_vm1, %v99_v10  ;;  %v2309_v9 = vld [vmem:[%s4461_s6 + $0x70] sm:$0xff]  ;;  %v2090_v10 = vld [vmem:[%s4460_s5 + $0x98] sm:$0xff] }
  0x30   :  { %1844 = vperm.xlu0 %3062, %v1832_v11   ;;  %3050 = vmatmul.mubr.msk.f32.vlgmr.msra.gmra.mxu1 %vm317_vm1, %v100_v12 }
  0x33   :  { %1881 = vperm.xlu1 %3063, %v1833_v13   ;;  %v131_v13 = vld [vmem:[%s4455_s2 + $0xf0] sm:$0xff] }
  0x34   :  { %1839 = vperm.xlu0 %3062, %v1831_v14   ;;  %v2312_v14 = vld [vmem:[%s4461_s6 + $0x88] sm:$0xff] }
  0x37   :  { %1955 = vperm.xlu1 %3063, %v1835_v15  }
  0x38   :  { %1960 = vperm.xlu0 %3062, %v1836_v16  }
  0x3b   :  { %2031 = vperm.xlu1 %3063, %v2027_v17   ;;  %v2089_v17 = vld [vmem:[%s4460_s5 + $0x90] sm:$0xff] }
  0x3c   :  { %2036 = vperm.xlu0 %3062, %v2028_v18   ;;  %v134_v18 = vld [vmem:[%s4455_s2 + $0x108] sm:$0xff] }
  0x3f   :  { %2120 = vperm.xlu1 %3063, %v2074_v19  }
  0x40   :  { %2110 = vperm.xlu0 %3062, %v2072_v20  }
  0x43   :  { %2115 = vperm.xlu1 %3063, %v2073_v21   ;;  %v2311_v21 = vld [vmem:[%s4461_s6 + $0x80] sm:$0xff] }
  0x44   :  { %2105 = vperm.xlu0 %3062, %v2071_v22   ;;  %v2092_v22 = vld [vmem:[%s4460_s5 + $0xa8] sm:$0xff] }
  0x47   :  { %2334 = vperm.xlu1 %3063, %v2296_v23  }
  0x48   :  { %2130 = vperm.xlu0 %3062, %v2076_v24  }
  0x4b   :  { %2125 = vperm.xlu1 %3063, %v2075_v25   ;;  %v133_v25 = vld [vmem:[%s4455_s2 + $0x100] sm:$0xff] }
  0x4c   :  { %2344 = vperm.xlu0 %3062, %v2298_v26   ;;  %v2314_v26 = vld [vmem:[%s4461_s6 + $0x98] sm:$0xff] }
  0x4f   :  { %2329 = vperm.xlu1 %3063, %v2295_v27  }
  0x50   :  { %2140 = vperm.xlu0 %3062, %v2078_v28  }
  0x53   :  { %2354 = vperm.xlu1 %3063, %v2300_v29   ;;  %v2091_v29 = vld [vmem:[%s4460_s5 + $0xa0] sm:$0xff] }
  0x54   :  { %2339 = vperm.xlu0 %3062, %v2297_v30   ;;  %v136_v30 = vld [vmem:[%s4455_s2 + $0x118] sm:$0xff] }
  0x57   :  { %2135 = vperm.xlu1 %3063, %v2077_v31  }
  0x58   :  { %244 = vperm.xlu0 %3062, %v122_v32  }
  0x5b   :  { %2349 = vperm.xlu1 %3063, %v2299_v33   ;;  %v2313_v33 = vld [vmem:[%s4461_s6 + $0x90] sm:$0xff] }
  0x5c   :  { %2150 = vperm.xlu0 %3062, %v2080_v34   ;;  %v2094_v34 = vld [vmem:[%s4460_s5 + $0xb8] sm:$0xff] }
  0x5f   :  { %239 = vperm.xlu1 %3063, %v121_v35  }
  0x60   :  { %2364 = vperm.xlu0 %3062, %v2302_v36  }
  0x63   :  { %2145 = vperm.xlu1 %3063, %v2079_v37   ;;  %v135_v37 = vld [vmem:[%s4455_s2 + $0x110] sm:$0xff] }
  0x64   :  { %254 = vperm.xlu0 %3062, %v124_v38   ;;  %v2316_v38 = vld [vmem:[%s4461_s6 + $0xa8] sm:$0xff] }
  0x67   :  { %2359 = vperm.xlu1 %3063, %v2301_v39  }
  0x68   :  { %2160 = vperm.xlu0 %3062, %v2082_v40  }
  0x6b   :  { %249 = vperm.xlu1 %3063, %v123_v41   ;;  %v2096_v41 = vld [vmem:[%s4460_s5 + $0xc8] sm:$0xff] }
  0x6c   :  { %2374 = vperm.xlu0 %3062, %v2304_v42   ;;  %v2093_v42 = vld [vmem:[%s4460_s5 + $0xb0] sm:$0xff] }
  0x6f   :  { %2155 = vperm.xlu1 %3063, %v2081_v43  }
  0x70   :  { %264 = vperm.xlu0 %3062, %v126_v44  }
  0x73   :  { %2369 = vperm.xlu1 %3063, %v2303_v45   ;;  %v2318_v45 = vld [vmem:[%s4461_s6 + $0xb8] sm:$0xff] }
  0x74   :  { %2170 = vperm.xlu0 %3062, %v2084_v46   ;;  %v2315_v46 = vld [vmem:[%s4461_s6 + $0xa0] sm:$0xff] }
  0x77   :  { %259 = vperm.xlu1 %3063, %v125_v47  }
  0x78   :  { %2384 = vperm.xlu0 %3062, %v2306_v48  }
  0x7b   :  { %2165 = vperm.xlu1 %3063, %v2083_v49   ;;  %v2098_v49 = vld [vmem:[%s4460_s5 + $0xd8] sm:$0xff] }
  0x7c   :  { %274 = vperm.xlu0 %3062, %v128_v50   ;;  %v2095_v50 = vld [vmem:[%s4460_s5 + $0xc0] sm:$0xff] }
  0x7d   :  { %v3570_v53 = vpop.permute.xlu1 %149  ;;  %v3572_v54 = vpop.permute.xlu0 %139 }
  0x7f   :  { %2379 = vperm.xlu1 %3063, %v2305_v51  }
  0x80   :  { %2180 = vperm.xlu0 %3062, %v2086_v52  }
  0x82   :  { %v3580_v57 = vpop.permute.xlu1 %154  ;;  %v3582_v58 = vpop.permute.xlu0 %144 }
  0x83   :  { %269 = vperm.xlu1 %3063, %v127_v55   ;;  %v2320_v55 = vld [vmem:[%s4461_s6 + $0xc8] sm:$0xff] }
  0x84   :  { %2394 = vperm.xlu0 %3062, %v2308_v56   ;;  %v2317_v56 = vld [vmem:[%s4461_s6 + $0xb0] sm:$0xff] }
  0x87   :  { %2175 = vperm.xlu1 %3063, %v2085_v59   ;;  %v3590_v61 = vpop.permute.xlu1 %164  ;;  %v3592_v62 = vpop.permute.xlu0 %159 }
  0x88   :  { %284 = vperm.xlu0 %3062, %v130_v60  }
  0x8b   :  { %2389 = vperm.xlu1 %3063, %v2307_v63   ;;  %v2100_v63 = vld [vmem:[%s4460_s5 + $0xe8] sm:$0xff] }
  0x8c   :  { %2190 = vperm.xlu0 %3062, %v2088_v0   ;;  %v3600_v1 = vpop.permute.xlu1 %174  ;;  %v3602_v2 = vpop.permute.xlu0 %169  ;;  %v2097_v0 = vld [vmem:[%s4460_s5 + $0xd0] sm:$0xff] }
  0x8f   :  { %279 = vperm.xlu1 %3063, %v129_v3  }
  0x90   :  { %2404 = vperm.xlu0 %3062, %v2310_v4  }
  0x91   :  { %v3613_v6 = vpop.permute.xlu1 %184  ;;  %v3615_v7 = vpop.permute.xlu0 %179 }
  0x93   :  { %2185 = vperm.xlu1 %3063, %v2087_v5  }
  0x94   :  { %294 = vperm.xlu0 %3062, %v132_v8  }
  0x96   :  { %v3626_v11 = vpop.permute.xlu1 %194  ;;  %v3628_v12 = vpop.permute.xlu0 %189 }
  0x97   :  { %2399 = vperm.xlu1 %3063, %v2309_v9   ;;  %v2322_v9 = vld [vmem:[%s4461_s6 + $0xd8] sm:$0xff] }
  0x98   :  { %2200 = vperm.xlu0 %3062, %v2090_v10  }
  0x9a   :  { %v3636_v15 = vpop.permute.xlu1 %204 }
  0x9b   :  { %v3638_v16 = vpop.permute.xlu0 %199  ;;  %289 = vperm.xlu1 %3063, %v131_v13   ;;  %v2319_v13 = vld [vmem:[%s4461_s6 + $0xc0] sm:$0xff] }
  0x9c   :  { %2414 = vperm.xlu0 %3062, %v2312_v14  }
  0x9e   :  { %v3646_v19 = vpop.permute.xlu1 %214 }
  0x9f   :  { %v3648_v20 = vpop.permute.xlu0 %209  ;;  %2195 = vperm.xlu1 %3063, %v2089_v17  }
  0xa0   :  { %304 = vperm.xlu0 %3062, %v134_v18  }
  0xa2   :  { %v3656_v23 = vpop.permute.xlu1 %224 }
  0xa3   :  { %v3658_v24 = vpop.permute.xlu0 %219  ;;  %2409 = vperm.xlu1 %3063, %v2311_v21  }
  0xa4   :  { %4479 = vst [vmem:[#allocation2_spill] sm:$0xff] %v3658_v24  ;;  %2210 = vperm.xlu0 %3062, %v2092_v22  }
  0xa6   :  { %v3666_v27 = vpop.permute.xlu1 %234 }
  0xa7   :  { %v3668_v28 = vpop.permute.xlu0 %229  ;;  %299 = vperm.xlu1 %3063, %v133_v25  }
  0xa8   :  { %2424 = vperm.xlu0 %3062, %v2314_v26  }
  0xaa   :  { %v3676_v31 = vpop.permute.xlu1 %1886 }
  0xab   :  { %v3678_v32 = vpop.permute.xlu0 %1844  ;;  %2205 = vperm.xlu1 %3063, %v2091_v29   ;;  %v2102_v29 = vld [vmem:[%s4460_s5 + $0xf8] sm:$0xff] }
  0xac   :  { %314 = vperm.xlu0 %3062, %v136_v30  }
  0xae   :  { %v3686_v35 = vpop.permute.xlu1 %1881 }
  0xaf   :  { %v3688_v36 = vpop.permute.xlu0 %1839  ;;  %2419 = vperm.xlu1 %3063, %v2313_v33  }
  0xb0   :  { %2220 = vperm.xlu0 %3062, %v2094_v34  }
  0xb2   :  { %v3696_v39 = vpop.permute.xlu1 %1955 }
  0xb3   :  { %v3698_v40 = vpop.permute.xlu0 %1960  ;;  %309 = vperm.xlu1 %3063, %v135_v37  }
  0xb4   :  { %2434 = vperm.xlu0 %3062, %v2316_v38  }
  0xb6   :  { %v3706_v43 = vpop.permute.xlu1 %2031 }
  0xb7   :  { %v3708_v44 = vpop.permute.xlu0 %2036  ;;  %2230 = vperm.xlu1 %3063, %v2096_v41  }
  0xb8   :  { %2215 = vperm.xlu0 %3062, %v2093_v42  }
  0xba   :  { %v3716_v47 = vpop.permute.xlu1 %2120 }
  0xbb   :  { %v3718_v48 = vpop.permute.xlu0 %2110  ;;  %2444 = vperm.xlu1 %3063, %v2318_v45  }
  0xbc   :  { %2429 = vperm.xlu0 %3062, %v2315_v46  }
  0xbe   :  { %v3726_v51 = vpop.permute.xlu1 %2115 }
  0xbf   :  { %v3728_v52 = vpop.permute.xlu0 %2105  ;;  %2240 = vperm.xlu1 %3063, %v2098_v49  }
  0xc0   :  { %2225 = vperm.xlu0 %3062, %v2095_v50  }
  0xc2   :  { %v3736_v59 = vpop.permute.xlu1 %2334 }
  0xc3   :  { %v3738_v60 = vpop.permute.xlu0 %2130  ;;  %2454 = vperm.xlu1 %3063, %v2320_v55  }
  0xc4   :  { %2439 = vperm.xlu0 %3062, %v2317_v56  }
  0xc6   :  { %v3746_v3 = vpop.permute.xlu1 %2125  ;;  %v2966_v4 = vpop.f32.mrf.mxu0 }
  0xc7   :  { %v3748_v5 = vpop.permute.xlu0 %2344  ;;  %2250 = vperm.xlu1 %3063, %v2100_v63   ;;  %v2971_v8 = vpop.f32.mrf.mxu1  ;;  %v400_v45 = vadd.f32 %v2966_v4, %v3582_v58 }
  0xc8   :  { %2235 = vperm.xlu0 %3062, %v2097_v0   ;;  %v394_v10 = vpop.f32.mrf.mxu0  ;;  %v484_v46 = vadd.f32 %v2971_v8, %v3580_v57  ;;  %v2321_v57 = vld [vmem:[%s4461_s6 + $0xd0] sm:$0xff] }
  0xc9   :  { %v395_v14 = vadd.f32 %v394_v10, %v3572_v54  ;;  %v478_v17 = vpop.f32.mrf.mxu1  ;;  %v2099_v54 = vld [vmem:[%s4460_s5 + $0xe0] sm:$0xff] }
  0xca   :  { %v3757_v18 = vpop.permute.xlu1 %2329  ;;  %v479_v21 = vadd.f32 %v478_v17, %v3570_v53 }
  0xcb   :  { %v3760_v22 = vpop.permute.xlu0 %2140  ;;  %2464 = vperm.xlu1 %3063, %v2322_v9   ;;  %v2976_v25 = vpop.f32.mrf.mxu0  ;;  %v1847_v30 = vmul.f32 %v3688_v36, %v395_v14 }
  0xcc   :  { %2449 = vperm.xlu0 %3062, %v2319_v13   ;;  %v2981_v26 = vpop.f32.mrf.mxu1  ;;  %v1889_v33 = vmul.f32 %v3686_v35, %v479_v21  ;;  %v568_v53 = vadd.f32 %v2976_v25, %v3590_v61  ;;  %v2324_v61 = vld [vmem:[%s4461_s6 + $0xe8] sm:$0xff]  ;;  %v1849_v55 = vmul.f32 %v3688_v36, %v479_v21  ;;  %v1848_v21 = vmul.f32 %v3678_v32, %v400_v45 }
  0xcd   :  { %v562_v34 = vpop.f32.mrf.mxu0  ;;  %v1890_v25 = vmul.f32 %v3676_v31, %v484_v46 }
  0xce   :  { %v3771_v37 = vpop.permute.xlu1 %2354  ;;  %v646_v38 = vpop.f32.mrf.mxu1  ;;  %v563_v42 = vadd.f32 %v562_v34, %v3592_v62  ;;  %v1921_v56 = vadd.f32 %v1889_v33, %v1847_v30  ;;  %v1892_v58 = vmul.f32 %v3676_v31, %v568_v53  ;;  %v2101_v34 = vld [vmem:[%s4460_s5 + $0xf0] sm:$0xff] }
  0xcf   :  { %v3773_v41 = vpop.permute.xlu0 %2339  ;;  %2260 = vperm.xlu1 %3063, %v2102_v29   ;;  %v3779_v49 = vadd.f32 %v646_v38, %v3602_v2  ;;  %v652_v2 = vadd.f32 %v2981_v26, %v3600_v1  ;;  %v2323_v26 = vld [vmem:[%s4461_s6 + $0xe0] sm:$0xff]  ;;  %v1850_v29 = vmul.f32 %v3678_v32, %v484_v46 }
  0xd0   :  { %2245 = vperm.xlu0 %3062, %v2099_v54   ;;  %v2986_v50 = vpop.f32.mrf.mxu0  ;;  %v1891_v63 = vmul.f32 %v3686_v35, %v563_v42  ;;  %v1963_v62 = vmul.f32 %v3696_v39, %v563_v42  ;;  %v2991_v14 = vpop.f32.mrf.mxu1 }
  0xd1   :  { %v1965_v10 = vmul.f32 %v3696_v39, %v3779_v49  ;;  %v736_v13 = vadd.f32 %v2986_v50, %v3613_v6  ;;  %v1852_v6 = vmul.f32 %v3678_v32, %v568_v53  ;;  %v1894_v38 = vmul.f32 %v3676_v31, %v652_v2 }
  0xd2   :  { %v3792_v0 = vpop.permute.xlu1 %2135  ;;  %v730_v4 = vpop.f32.mrf.mxu0  ;;  %v1923_v8 = vadd.f32 %v1891_v63, %v1849_v55  ;;  %v1995_v9 = vadd.f32 %v1963_v62, %v1921_v56  ;;  %v1893_v45 = vmul.f32 %v3686_v35, %v3779_v49  ;;  %v3818_v50 = vadd.f32 %v2991_v14, %v3626_v11 }
  0xd3   :  { %v3797_v17 = vpop.permute.xlu0 %244  ;;  %2474 = vperm.xlu1 %3063, %v2324_v61   ;;  %v3802_v1 = vadd.f32 %v730_v4, %v3615_v7  ;;  %v1851_v7 = vmul.f32 %v3688_v36, %v563_v42  ;;  %v1924_v61 = vadd.f32 %v1892_v58, %v1850_v29  ;;  %v1964_v55 = vmul.f32 %v3698_v40, %v568_v53  ;;  %v2325_v53 = vld [vmem:[%s4461_s6 + $0xf0] sm:$0xff] }
  0xd4   :  { %2459 = vperm.xlu0 %3062, %v2321_v57   ;;  %v2039_v30 = vadd.f32 %v3706_v43, %v1995_v9  ;;  %v1997_v33 = vadd.f32 %v1965_v10, %v1923_v8  ;;  %v1896_v63 = vmul.f32 %v3676_v31, %v736_v13  ;;  %v1922_v57 = vadd.f32 %v1890_v25, %v1848_v21  ;;  %v814_v8 = vpop.f32.mrf.mxu1  ;;  %v2326_v21 = vld [vmem:[%s4461_s6 + $0xf8] sm:$0xff] }
  0xd5   :  { %v2996_v54 = vpop.f32.mrf.mxu0  ;;  %v1968_v42 = vmul.f32 %v3698_v40, %v736_v13  ;;  %v1967_v4 = vmul.f32 %v3696_v39, %v3802_v1  ;;  %v1854_v58 = vmul.f32 %v3678_v32, %v652_v2  ;;  %v1966_v9 = vmul.f32 %v3698_v40, %v652_v2 }
  0xd6   :  { %v2350_v46 = vpop.permute.xlu1 %2349  ;;  %v2041_v56 = vadd.f32 %v3706_v43, %v1997_v33  ;;  %v3829_v11 = vadd.f32 %v2996_v54, %v3636_v15  ;;  %v2263_v10 = vmul.f32 %v3728_v52, %v2039_v30  ;;  %v1926_v25 = vadd.f32 %v1894_v38, %v1852_v6  ;;  %v3001_v30 = vpop.f32.mrf.mxu1  ;;  %v2555_v38 = vld [vmem:[%s4462_s7 + $0x18] sm:$0xff] }
  0xd7   :  { %v3823_v62 = vpop.permute.xlu0 %2150  ;;  %2469 = vperm.xlu1 %3063, %v2323_v26   ;;  %v1925_v15 = vadd.f32 %v1893_v45, %v1851_v7  ;;  %v1856_v26 = vmul.f32 %v3678_v32, %v736_v13  ;;  %v1898_v29 = vmul.f32 %v3676_v31, %v3818_v50  ;;  %v1996_v33 = vadd.f32 %v1964_v55, %v1922_v57  ;;  %v898_v13 = vpop.f32.mrf.mxu0 }
  0xd8   :  { %2255 = vperm.xlu0 %3062, %v2101_v34   ;;  %v2265_v14 = vmul.f32 %v3726_v51, %v2041_v56  ;;  %v1998_v54 = vadd.f32 %v1966_v9, %v1924_v61  ;;  %v1928_v34 = vadd.f32 %v1896_v63, %v1854_v58  ;;  %v2000_v52 = vadd.f32 %v1968_v42, %v1926_v25  ;;  %v2553_v61 = vld [vmem:[%s4462_s7 + $0x8] sm:$0xff] }
  0xd9   :  { %v1972_v51 = vmul.f32 %v3698_v40, %v3829_v11  ;;  %v1999_v56 = vadd.f32 %v1967_v4, %v1925_v15  ;;  %v3849_v6 = vadd.f32 %v3757_v18, %v2263_v10  ;;  %v1970_v7 = vmul.f32 %v3698_v40, %v3818_v50  ;;  %v982_v10 = vpop.f32.mrf.mxu1  ;;  %v2552_v15 = vld [vmem:[%s4462_s7] sm:$0xff] }
  0xda   :  { %v3844_v24 = vpop.permute.xlu1 %239  ;;  %v3857_v45 = vadd.f32 %v3773_v41, %v2265_v14  ;;  %v1930_v18 = vadd.f32 %v1898_v29, %v1856_v26  ;;  %v2040_v63 = vadd.f32 %v3708_v44, %v1996_v33  ;;  %v2044_v41 = vadd.f32 %v3708_v44, %v2000_v52  ;;  %v3871_v14 = vpop.f32.mrf.mxu0 }
  0xdb   :  { %v2365_v2 = vpop.permute.xlu0 %2364  ;;  %2479 = vperm.xlu1 %3063, %v2325_v53   ;;  %v2043_v55 = vadd.f32 %v3706_v43, %v1999_v56  ;;  %v2002_v57 = vadd.f32 %v1970_v7, %v1928_v34  ;;  %v2042_v53 = vadd.f32 %v3708_v44, %v1998_v54  ;;  %v815_v25 = vadd.f32 %v814_v8, %v3628_v12 }
  0xdc   :  { %2484 = vperm.xlu0 %3062, %v2326_v21   ;;  %4480 = vst [vmem:[#allocation3_spill] sm:$0xff] %v3857_v45  ;;  %v2004_v9 = vadd.f32 %v1972_v51, %v1930_v18  ;;  %v2554_v21 = vld [vmem:[%s4462_s7 + $0x10] sm:$0xff]  ;;  %v1895_v26 = vmul.f32 %v3686_v35, %v3802_v1  ;;  %v2264_v54 = vmul.f32 %v3718_v48, %v2040_v63  ;;  %v3011_v51 = vpop.f32.mrf.mxu1  ;;  %v3898_v56 = vpop.f32.mrf.mxu0  ;;  %v2625_v48 = vld [vmem:[%s4463_s8 + $0x8] sm:$0xff] }
  0xdd   :  { %v2267_v58 = vmul.f32 %v3746_v3, %v2043_v55  ;;  %v3885_v3 = vadd.f32 %v898_v13, %v3638_v16  ;;  %v2046_v33 = vadd.f32 %v3708_v44, %v2002_v57  ;;  %v1853_v12 = vmul.f32 %v3688_v36, %v3779_v49 }
  0xde   :  { %v3864_v42 = vpop.permute.xlu1 %2145  ;;  %v2048_v8 = vadd.f32 %v3708_v44, %v2004_v9  ;;  %v2268_v16 = vmul.f32 %v3738_v60, %v2044_v41  ;;  %v1855_v13 = vmul.f32 %v3688_v36, %v3802_v1  ;;  %v3908_v7 = vadd.f32 %v3736_v59, %v2264_v54 }
  0xdf   :  { %v3866_v4 = vpop.permute.xlu0 %254  ;;  %2591 = vperm.xlu1 %3063, %v2555_v38   ;;  %v3882_v29 = vadd.f32 %v2350_v46, %v2267_v58  ;;  %v2266_v46 = vmul.f32 %v3716_v47, %v2042_v53  ;;  %v1897_v38 = vmul.f32 %v3686_v35, %v815_v25  ;;  %v2270_v49 = vmul.f32 %v3760_v22, %v2046_v33  ;;  %v2557_v47 = vld [vmem:[%s4462_s7 + $0x28] sm:$0xff]  ;;  %v3016_v58 = vpop.f32.mrf.mxu0 }
  0xe0   :  { %2579 = vperm.xlu0 %3062, %v2553_v61   ;;  %4482 = vst [vmem:[#allocation5_spill] sm:$0xff] %v3908_v7  ;;  %v1927_v60 = vadd.f32 %v1895_v26, %v1853_v12  ;;  %v1900_v61 = vmul.f32 %v3676_v31, %v3829_v11  ;;  %v3919_v1 = vadd.f32 %v3771_v37, %v2268_v16  ;;  %v1150_v37 = vpop.f32.mrf.mxu1 }
  0xe1   :  { %4481 = vst [vmem:[#allocation4_spill] sm:$0xff] %v3882_v29  ;;  %v3916_v55 = vadd.f32 %v3748_v5, %v2266_v46  ;;  %v3922_v18 = vadd.f32 %v3001_v30, %v3646_v19  ;;  %v1971_v59 = vmul.f32 %v3696_v39, %v3885_v3  ;;  %v3926_v22 = vadd.f32 %v2365_v2, %v2270_v49  ;;  %v2624_v19 = vld [vmem:[%s4463_s8] sm:$0xff]  ;;  %v1234_v46 = vpop.f32.mrf.mxu0  ;;  %v2639_v49 = vld [vmem:[%s4464_s9 + $0x8] sm:$0xff] }
  0xe2   :  { %v3889_v34 = vpop.permute.xlu1 %2359  ;;  %v1858_v53 = vmul.f32 %v3678_v32, %v3818_v50  ;;  %v1969_v5 = vmul.f32 %v3696_v39, %v815_v25  ;;  %v2272_v41 = vmul.f32 %v3823_v62, %v2048_v8  ;;  %v1929_v30 = vadd.f32 %v1897_v38, %v1855_v13  ;;  %v2556_v2 = vld [vmem:[%s4462_s7 + $0x20] sm:$0xff]  ;;  %v3021_v8 = vpop.f32.mrf.mxu1 }
  0xe3   :  { %v3891_v52 = vpop.permute.xlu0 %2160  ;;  %2586 = vperm.xlu1 %3063, %v2554_v21   ;;  %4483 = vst [vmem:[#allocation6_spill] sm:$0xff] %v3916_v55  ;;  %v1974_v50 = vmul.f32 %v3698_v40, %v3922_v18  ;;  %v1899_v62 = vmul.f32 %v3686_v35, %v3885_v3  ;;  %v3947_v12 = vadd.f32 %v982_v10, %v3648_v20 }
  0xe4   :  { %2574 = vperm.xlu0 %3062, %v2552_v15   ;;  %v2001_v9 = vadd.f32 %v1969_v5, %v1927_v60  ;;  %v1932_v21 = vadd.f32 %v1900_v61, %v1858_v53  ;;  %v2003_v26 = vadd.f32 %v1971_v59, %v1929_v30  ;;  %v1857_v16 = vmul.f32 %v3688_v36, %v815_v25  ;;  %v1318_v10 = vpop.f32.mrf.mxu1  ;;  %v3026_v60 = vpop.f32.mrf.mxu0 }
  0xe5   :  { %v3959_v20 = vadd.f32 %v3871_v14, %v3656_v23  ;;  %v1902_v25 = vmul.f32 %v3676_v31, %v3922_v18  ;;  %v3964_v61 = vadd.f32 %v3011_v51, %v3666_v27  ;;  %v1240_v23 = vadd.f32 %v3016_v58, %v3797_v17 }
  0xe6   :  { %v250_v63 = vpop.permute.xlu1 %249  ;;  %v2045_v13 = vadd.f32 %v3706_v43, %v2001_v9  ;;  %v2006_v38 = vadd.f32 %v1974_v50, %v1932_v21  ;;  %v3976_v27 = vadd.f32 %v1234_v46, %v3844_v24  ;;  %v1402_v30 = vpop.f32.mrf.mxu0  ;;  %v3984_v17 = vadd.f32 %v1150_v37, %v3668_v28 }
  0xe7   :  { %v2375_v57 = vpop.permute.xlu0 %2374  ;;  %2633 = vperm.xlu1 %3063, %v2625_v48   ;;  %v2047_v48 = vadd.f32 %v3706_v43, %v2003_v26  ;;  %v1319_v51 = vadd.f32 %v1318_v10, %v250_v63  ;;  %v1866_v24 = vmul.f32 %v3678_v32, %v3964_v61  ;;  %v1906_v50 = vmul.f32 %v3676_v31, %v3964_v61 }
  0xe8   :  { %2617 = vperm.xlu0 %3062, %v2557_v47   ;;  %v3938_v15 = vadd.f32 %v2375_v57, %v2272_v41  ;;  %v1860_v47 = vmul.f32 %v3678_v32, %v3829_v11  ;;  %v2269_v59 = vmul.f32 %v3792_v0, %v2045_v13  ;;  %v1931_v57 = vadd.f32 %v1899_v62, %v1857_v16 }
  0xe9   :  { %v1973_v11 = vmul.f32 %v3696_v39, %v3947_v12  ;;  %v2271_v14 = vmul.f32 %v3864_v42, %v2047_v48  ;;  %v2050_v41 = vadd.f32 %v3708_v44, %v2006_v38  ;;  %v1908_v28 = vmul.f32 %v3676_v31, %v1240_v23 }
  0xea   :  { %v3944_v33 = vpop.permute.xlu1 %2155  ;;  %v3979_v0 = vadd.f32 %v3889_v34, %v2269_v59  ;;  %v1868_v62 = vmul.f32 %v3678_v32, %v1240_v23  ;;  %v1909_v46 = vmul.f32 %v3686_v35, %v1319_v51  ;;  %v1865_v16 = vmul.f32 %v3688_v36, %v3984_v17 }
  0xeb   :  { %v265_v54 = vpop.permute.xlu0 %264  ;;  %2628 = vperm.xlu1 %3063, %v2624_v19   ;;  %v1324_v19 = vadd.f32 %v3021_v8, %v3866_v4  ;;  %v2274_v42 = vmul.f32 %v3891_v52, %v2050_v41  ;;  %v1976_v4 = vmul.f32 %v3698_v40, %v3959_v20  ;;  %v2005_v34 = vadd.f32 %v1973_v11, %v1931_v57 }
  0xec   :  { %2612 = vperm.xlu0 %3062, %v2556_v2   ;;  %4484 = vst [vmem:[#allocation7_spill] sm:$0xff] %v3979_v0  ;;  %v1864_v2 = vmul.f32 %v3678_v32, %v3959_v20  ;;  %v1408_v9 = vadd.f32 %v3026_v60, %v265_v54  ;;  %v1907_v8 = vmul.f32 %v3686_v35, %v3976_v27  ;;  %v3031_v54 = vpop.f32.mrf.mxu1 }
  0xed   :  { %v1910_v26 = vmul.f32 %v3676_v31, %v1324_v19  ;;  %v1982_v48 = vmul.f32 %v3698_v40, %v1324_v19  ;;  %v1867_v13 = vmul.f32 %v3688_v36, %v3976_v27  ;;  %v1934_v38 = vadd.f32 %v1902_v25, %v1860_v47 }
  0xee   :  { %v2370_v53 = vpop.permute.xlu1 %2369  ;;  %v2049_v10 = vadd.f32 %v3706_v43, %v2005_v34  ;;  %v1912_v60 = vmul.f32 %v3676_v31, %v1408_v9  ;;  %v1984_v59 = vmul.f32 %v3698_v40, %v1408_v9  ;;  %v1872_v34 = vmul.f32 %v3678_v32, %v1408_v9 }
  0xef   :  { %v3967_v5 = vpop.permute.xlu0 %2170  ;;  %v3987_v58 = vadd.f32 %v2370_v53, %v2271_v14  ;;  %v2008_v11 = vadd.f32 %v1976_v4, %v1934_v38  ;;  %v1942_v47 = vadd.f32 %v1910_v26, %v1868_v62  ;;  %v1941_v25 = vadd.f32 %v1909_v46, %v1867_v13 }
  0xf0   :  { %2647 = vperm.xlu0 %3062, %v2639_v49   ;;  %v1981_v49 = vmul.f32 %v3696_v39, %v1319_v51  ;;  %v1869_v26 = vmul.f32 %v3688_v36, %v1319_v51  ;;  %v1980_v46 = vmul.f32 %v3698_v40, %v1240_v23 }
  0xf1   :  { %4485 = vst [vmem:[#allocation8_spill] sm:$0xff] %v3987_v58 }
  0xf2   :  { %v260_v63 = vpop.permute.xlu1 %259 }
  0xf3   :  { %v2385_v21 = vpop.permute.xlu0 %2384  ;;  %v1403_v52 = vadd.f32 %v1402_v30, %v260_v63  ;;  %v1940_v30 = vadd.f32 %v1908_v28, %v1866_v24  ;;  %v1939_v63 = vadd.f32 %v1907_v8, %v1865_v16  ;;  %v2052_v28 = vadd.f32 %v3708_v44, %v2008_v11  ;;  %v1486_v8 = vpop.f32.mrf.mxu1 }
  0xf4   :  { %v3996_v37 = vadd.f32 %v2385_v21, %v2274_v42  ;;  %v1870_v42 = vmul.f32 %v3678_v32, %v1324_v19  ;;  %v2273_v21 = vmul.f32 %v3944_v33, %v2049_v10  ;;  %v4027_v19 = vadd.f32 %v1984_v59, %v1942_v47 }
  0xf5   :  { %v1983_v14 = vmul.f32 %v3696_v39, %v1403_v52  ;;  %v4025_v24 = vadd.f32 %v1981_v49, %v1939_v63  ;;  %v2276_v16 = vmul.f32 %v3967_v5, %v2052_v28 }
  0xf6   :  { %4486 = vst [vmem:[#allocation9_spill] sm:$0xff] %v3996_v37  ;;  %v4012_v57 = vpop.permute.xlu1 %2165  ;;  %v1944_v62 = vadd.f32 %v1912_v60, %v1870_v42  ;;  %v1871_v60 = vmul.f32 %v3688_v36, %v1403_v52 }
  0xf7   :  { %4487 = vst [vmem:[#allocation10_spill] sm:$0xff] %v4012_v57  ;;  %v275_v53 = vpop.permute.xlu0 %274  ;;  %v1911_v57 = vmul.f32 %v3686_v35, %v1403_v52  ;;  %v4032_v9 = vadd.f32 %v1983_v14, %v1941_v25  ;;  %v1938_v14 = vadd.f32 %v1906_v50, %v1864_v2 }
  0xf8   :  { %v1492_v41 = vadd.f32 %v3031_v54, %v275_v53  ;;  %v4023_v54 = vadd.f32 %v1982_v48, %v1940_v30  ;;  %v3036_v30 = vpop.f32.mrf.mxu0 }
  0xf9   :  { %v1943_v59 = vadd.f32 %v1911_v57, %v1869_v26  ;;  %v2012_v23 = vadd.f32 %v1980_v46, %v1938_v14 }
  0xfa   :  { %v1914_v37 = vmul.f32 %v3676_v31, %v1492_v41  ;;  %v1986_v58 = vmul.f32 %v3698_v40, %v1492_v41  ;;  %v2380_v4 = vpop.permute.xlu1 %2379  ;;  %v1874_v2 = vmul.f32 %v3678_v32, %v1492_v41 }
  0xfb   :  { %v4021_v38 = vpop.permute.xlu0 %2180  ;;  %v4030_v33 = vadd.f32 %v2380_v4, %v2273_v21  ;;  %v2056_v47 = vadd.f32 %v3708_v44, %v2012_v23 }
  0xfc   :  { %v4037_v48 = vadd.f32 %v1986_v58, %v1944_v62  ;;  %v1946_v13 = vadd.f32 %v1914_v37, %v1872_v34 }
  0xfd   :  { %4488 = vst [vmem:[#allocation11_spill] sm:$0xff] %v4030_v33 }
  0xfe   :  { %v270_v49 = vpop.permute.xlu1 %269 }
  0xff   :  { %v2395_v10 = vpop.permute.xlu0 %2394  ;;  %v4041_v11 = vadd.f32 %v1486_v8, %v270_v49 }
 0x100   :  { %v4039_v53 = vadd.f32 %v2395_v10, %v2276_v16 }
 0x101   :  { %v1913_v51 = vmul.f32 %v3686_v35, %v4041_v11  ;;  %v1985_v5 = vmul.f32 %v3696_v39, %v4041_v11 }
 0x102   :  { %v4048_v58 = vpop.permute.xlu1 %2175 }
 0x103   :  { %v285_v37 = vpop.permute.xlu0 %284  ;;  %v4052_v57 = vadd.f32 %v1985_v5, %v1943_v59  ;;  %v4054_v63 = vadd.f32 %v1913_v51, %v1871_v60 }
 0x104   :  { %v4050_v42 = vadd.f32 %v3036_v30, %v285_v37 }
 0x106   :  { %v1916_v50 = vmul.f32 %v3676_v31, %v4050_v42  ;;  %v1988_v52 = vmul.f32 %v3698_v40, %v4050_v42  ;;  %v4062_v25 = vpop.permute.xlu1 %2389 }
 0x107   :  { %v2191_v21 = vpop.permute.xlu0 %2190 }
 0x108   :  { %v4064_v34 = vmul.f32 %v2191_v21, %v2056_v47  ;;  %v4066_v4 = vadd.f32 %v1988_v52, %v1946_v13  ;;  %v4068_v28 = vadd.f32 %v1916_v50, %v1874_v2  ;;  %v4499_v50 = vld [vmem:[#allocation2_spill] sm:$0xff]  ;;  %v1904_v47 = vmul.f32 %v3676_v31, %v3959_v20 }
 0x109   :  { %v1067_v52 = vadd.f32 %v3898_v56, %v4499_v50  ;;  %v1862_v56 = vmul.f32 %v3678_v32, %v3922_v18  ;;  %v1861_v20 = vmul.f32 %v3688_v36, %v3947_v12 }
 0x10a   :  { %v280_v62 = vpop.permute.xlu1 %279 }
 0x10b   :  { %v4070_v26 = vpop.permute.xlu0 %2404  ;;  %v1975_v50 = vmul.f32 %v3696_v39, %v1067_v52 }
 0x10e   :  { %v4072_v41 = vpop.permute.xlu1 %2185 }
 0x10f   :  { %v295_v8 = vpop.permute.xlu0 %294 }
 0x112   :  { %v4074_v46 = vpop.permute.xlu1 %2399 }
 0x113   :  { %v4076_v16 = vpop.permute.xlu0 %2200 }
 0x114   :  { %4489 = vst [vmem:[#allocation12_spill] sm:$0xff] %v4076_v16 }
 0x116   :  { %v4078_v49 = vpop.permute.xlu1 %289 }
 0x117   :  { %v4080_v10 = vpop.permute.xlu0 %2414 }
 0x11a   :  { %v4082_v59 = vpop.permute.xlu1 %2195 }
 0x11b   :  { %4490 = vst [vmem:[#allocation13_spill] sm:$0xff] %v4082_v59  ;;  %v4084_v13 = vpop.permute.xlu0 %304  ;;  %v1936_v59 = vadd.f32 %v1904_v47, %v1862_v56  ;;  %v1977_v47 = vmul.f32 %v3696_v39, %v3984_v17 }
 0x11e   :  { %v4086_v14 = vpop.permute.xlu1 %2409 }
 0x11f   :  { %4491 = vst [vmem:[#allocation14_spill] sm:$0xff] %v4086_v14  ;;  %v4088_v30 = vpop.permute.xlu0 %2210 }
 0x120   :  { %4492 = vst [vmem:[#allocation15_spill] sm:$0xff] %v4088_v30  ;;  %v1859_v30 = vmul.f32 %v3688_v36, %v3885_v3  ;;  %v1905_v3 = vmul.f32 %v3686_v35, %v3984_v17 }
 0x122   :  { %v4090_v60 = vpop.permute.xlu1 %299 }
 0x123   :  { %4493 = vst [vmem:[#allocation16_spill] sm:$0xff] %v4090_v60  ;;  %v4092_v51 = vpop.permute.xlu0 %2424 }
 0x124   :  { %4494 = vst [vmem:[#allocation17_spill] sm:$0xff] %v4092_v51 }
 0x126   :  { %v4094_v5 = vpop.permute.xlu1 %2205 }
 0x127   :  { %4495 = vst [vmem:[#allocation18_spill] sm:$0xff] %v4094_v5  ;;  %v4096_v23 = vpop.permute.xlu0 %314  ;;  %v1901_v5 = vmul.f32 %v3686_v35, %v3947_v12  ;;  %v1978_v12 = vmul.f32 %v3698_v40, %v3964_v61  ;;  %v3041_v61 = vpop.f32.mrf.mxu1 }
 0x128   :  { %4496 = vst [vmem:[#allocation19_spill] sm:$0xff] %v4096_v23 }
 0x129   :  { %v2010_v60 = vadd.f32 %v1978_v12, %v1936_v59  ;;  %v1654_v59 = vpop.f32.mrf.mxu1 }
 0x12a   :  { %v4098_v37 = vpop.permute.xlu1 %2419 }
 0x12b   :  { %4497 = vst [vmem:[#allocation20_spill] sm:$0xff] %v4098_v37  ;;  %v4100_v2 = vpop.permute.xlu0 %2220  ;;  %v2534_v37 = vadd.f32 %v3916_v55, %v3908_v7  ;;  %v2519_v55 = vadd.f32 %v3857_v45, %v3849_v6  ;;  %v1933_v7 = vadd.f32 %v1901_v5, %v1859_v30 }
 0x12c   :  { %4498 = vst [vmem:[#allocation21_spill] sm:$0xff] %v4100_v2  ;;  %v1903_v2 = vmul.f32 %v3686_v35, %v1067_v52 }
 0x12d   :  { %v2535_v18 = vadd.f32 %v2534_v37, %v3919_v1  ;;  %v2007_v56 = vadd.f32 %v1975_v50, %v1933_v7  ;;  %v2520_v30 = vadd.f32 %v2519_v55, %v3882_v29  ;;  %v1660_v50 = vadd.f32 %v3041_v61, %v295_v8  ;;  %v4504_v55 = vld [vmem:[#allocation8_spill] sm:$0xff] }
 0x12e   :  { %v4106_v21 = vpop.permute.xlu1 %309  ;;  %v1935_v23 = vadd.f32 %v1903_v2, %v1861_v20  ;;  %v2058_v8 = vadd.f32 %v3708_v44, %v4023_v54  ;;  %v2057_v61 = vadd.f32 %v3706_v43, %v4025_v24  ;;  %v2059_v54 = vadd.f32 %v3706_v43, %v4032_v9 }
 0x12f   :  { %4500 = vst [vmem:[#allocation2_spill] sm:$0xff] %v4106_v21  ;;  %v4108_v14 = vpop.permute.xlu0 %2434  ;;  %v2536_v5 = vadd.f32 %v2535_v18, %v3926_v22  ;;  %v2051_v7 = vadd.f32 %v3706_v43, %v2007_v56  ;;  %v1873_v24 = vmul.f32 %v3688_v36, %v4041_v11  ;;  %v1876_v9 = vmul.f32 %v3678_v32, %v4050_v42 }
 0x130   :  { %4501 = vst [vmem:[#allocation22_spill] sm:$0xff] %v4108_v14  ;;  %v1863_v14 = vmul.f32 %v3688_v36, %v1067_v52  ;;  %v1979_v52 = vmul.f32 %v3696_v39, %v3976_v27  ;;  %v2009_v37 = vadd.f32 %v1977_v47, %v1935_v23  ;;  %v2521_v27 = vadd.f32 %v2520_v30, %v3979_v0  ;;  %v4505_v23 = vld [vmem:[#allocation9_spill] sm:$0xff]  ;;  %v4510_v0 = vld [vmem:[#allocation19_spill] sm:$0xff] }
 0x131   :  { %v2537_v17 = vadd.f32 %v2536_v5, %v3938_v15  ;;  %v1655_v5 = vadd.f32 %v1654_v59, %v4078_v49  ;;  %v1918_v11 = vmul.f32 %v3676_v31, %v1660_v50 }
 0x132   :  { %v4125_v51 = vpop.permute.xlu1 %2230  ;;  %v2522_v18 = vadd.f32 %v2521_v27, %v4504_v55 }
 0x133   :  { %4502 = vst [vmem:[#allocation23_spill] sm:$0xff] %v4125_v51  ;;  %v4127_v21 = vpop.permute.xlu0 %2215  ;;  %v1570_v51 = vpop.f32.mrf.mxu0  ;;  %v2538_v47 = vadd.f32 %v2537_v17, %v4505_v23  ;;  %v1917_v55 = vmul.f32 %v3686_v35, %v1655_v5  ;;  %v1950_v29 = vadd.f32 %v1918_v11, %v1876_v9 }
 0x134   :  { %4503 = vst [vmem:[#allocation24_spill] sm:$0xff] %v4127_v21  ;;  %v1937_v21 = vadd.f32 %v1905_v3, %v1863_v14  ;;  %v1571_v2 = vadd.f32 %v1570_v51, %v280_v62  ;;  %v2054_v14 = vadd.f32 %v3708_v44, %v2010_v60  ;;  %v4506_v62 = vld [vmem:[#allocation10_spill] sm:$0xff] }
 0x135   :  { %v2275_v51 = vmul.f32 %v4506_v62, %v2051_v7  ;;  %v2539_v49 = vadd.f32 %v2538_v47, %v4039_v53  ;;  %v3046_v7 = vpop.f32.mrf.mxu0  ;;  %v1989_v62 = vmul.f32 %v3696_v39, %v1655_v5 }
 0x136   :  { %v4138_v16 = vpop.permute.xlu1 %2444  ;;  %v2011_v20 = vadd.f32 %v1979_v52, %v1937_v21  ;;  %v2053_v21 = vadd.f32 %v3706_v43, %v2009_v37  ;;  %v2278_v52 = vmul.f32 %v4021_v38, %v2054_v14  ;;  %v1987_v56 = vmul.f32 %v3696_v39, %v1571_v2 }
 0x137   :  { %v4140_v45 = vpop.permute.xlu0 %2429  ;;  %v4162_v60 = vadd.f32 %v4062_v25, %v2275_v51  ;;  %v2060_v37 = vadd.f32 %v3708_v44, %v4027_v19  ;;  %v2523_v38 = vadd.f32 %v2522_v18, %v4030_v33  ;;  %v1915_v19 = vmul.f32 %v3686_v35, %v1571_v2  ;;  %v1738_v51 = vpop.f32.mrf.mxu0 }
 0x138   :  { %v2055_v30 = vadd.f32 %v3706_v43, %v2011_v20  ;;  %v4171_v27 = vadd.f32 %v4070_v26, %v2278_v52  ;;  %v1990_v20 = vmul.f32 %v3698_v40, %v1660_v50  ;;  %v2062_v26 = vadd.f32 %v3708_v44, %v4037_v48  ;;  %v3051_v52 = vpop.f32.mrf.mxu1 }
 0x139   :  { %4507 = vst [vmem:[#allocation9_spill] sm:$0xff] %v4162_v60  ;;  %v2277_v59 = vmul.f32 %v4048_v58, %v2053_v21  ;;  %v2061_v14 = vadd.f32 %v3706_v43, %v4052_v57  ;;  %v2019_v18 = vadd.f32 %v1987_v56, %v4054_v63  ;;  %v2524_v47 = vadd.f32 %v2523_v38, %v4162_v60 }
 0x13a   :  { %v4148_v3 = vpop.permute.xlu1 %2240  ;;  %v2064_v48 = vadd.f32 %v3708_v44, %v4066_v4  ;;  %v2540_v58 = vadd.f32 %v2539_v49, %v4171_v27  ;;  %v1744_v57 = vadd.f32 %v3046_v7, %v4084_v13  ;;  %v2022_v63 = vadd.f32 %v1990_v20, %v4068_v28  ;;  %v1822_v49 = vpop.f32.mrf.mxu1  ;;  %v4509_v7 = vld [vmem:[#allocation16_spill] sm:$0xff] }
 0x13b   :  { %v4150_v12 = vpop.permute.xlu0 %2225  ;;  %v4199_v42 = vadd.f32 %v4074_v46, %v2277_v59  ;;  %v1875_v38 = vmul.f32 %v3688_v36, %v1571_v2  ;;  %v2279_v60 = vmul.f32 %v4072_v41, %v2055_v30  ;;  %v4211_v4 = vadd.f32 %v4080_v10, %v4064_v34  ;;  %v4508_v59 = vld [vmem:[#allocation12_spill] sm:$0xff]  ;;  %v4511_v10 = vld [vmem:[#allocation2_spill] sm:$0xff] }
 0x13c   :  { %v1947_v33 = vadd.f32 %v1915_v19, %v1873_v24  ;;  %v1878_v46 = vmul.f32 %v3678_v32, %v1660_v50  ;;  %v2282_v13 = vmul.f32 %v4508_v59, %v2058_v8  ;;  %v1739_v28 = vadd.f32 %v1738_v51, %v4509_v7  ;;  %v4512_v59 = vld [vmem:[#allocation17_spill] sm:$0xff]  ;;  %v4517_v7 = vld [vmem:[#allocation22_spill] sm:$0xff] }
 0x13d   :  { %v2063_v20 = vadd.f32 %v3706_v43, %v2019_v18  ;;  %v1828_v2 = vadd.f32 %v3051_v52, %v4510_v0  ;;  %v2525_v30 = vadd.f32 %v2524_v47, %v4199_v42  ;;  %v1920_v34 = vmul.f32 %v3676_v31, %v1744_v57  ;;  %v4514_v47 = vld [vmem:[#allocation15_spill] sm:$0xff]  ;;  %v4515_v52 = vld [vmem:[#allocation14_spill] sm:$0xff] }
 0x13e   :  { %v4176_v25 = vpop.permute.xlu1 %2454  ;;  %v2021_v41 = vadd.f32 %v1989_v62, %v1947_v33  ;;  %v1823_v24 = vadd.f32 %v1822_v49, %v4511_v10  ;;  %v2066_v32 = vadd.f32 %v3708_v44, %v2022_v63  ;;  %v2541_v19 = vadd.f32 %v2540_v58, %v4211_v4  ;;  %v4513_v33 = vld [vmem:[#allocation13_spill] sm:$0xff] }
 0x13f   :  { %v4178_v17 = vpop.permute.xlu0 %2439  ;;  %v1877_v18 = vmul.f32 %v3688_v36, %v1655_v5  ;;  %v1992_v51 = vmul.f32 %v3698_v40, %v1744_v57  ;;  %v4227_v0 = vadd.f32 %v4512_v59, %v2282_v13  ;;  %v2281_v9 = vmul.f32 %v4513_v33, %v2057_v61  ;;  %v4516_v49 = vld [vmem:[#allocation21_spill] sm:$0xff]  ;;  %v4518_v59 = vld [vmem:[#allocation18_spill] sm:$0xff]  ;;  %v4519_v33 = vld [vmem:[#allocation20_spill] sm:$0xff] }
 0x140   :  { %v2284_v11 = vmul.f32 %v4514_v47, %v2060_v37  ;;  %v1919_v31 = vmul.f32 %v3686_v35, %v1739_v28  ;;  %v1991_v62 = vmul.f32 %v3696_v39, %v1739_v28  ;;  %v4234_v63 = vadd.f32 %v4515_v52, %v2279_v60 }
 0x141   :  { %v1994_v58 = vmul.f32 %v3698_v40, %v1828_v2  ;;  %v2065_v36 = vadd.f32 %v3706_v43, %v2021_v41  ;;  %v1949_v5 = vadd.f32 %v1917_v55, %v1875_v38  ;;  %v1952_v57 = vadd.f32 %v1920_v34, %v1878_v46  ;;  %v4520_v55 = vld [vmem:[#allocation23_spill] sm:$0xff] }
 0x142   :  { %v4203_v21 = vpop.permute.xlu1 %2250  ;;  %v2286_v13 = vmul.f32 %v4516_v49, %v2062_v26  ;;  %v4240_v10 = vadd.f32 %v4517_v7, %v2284_v11  ;;  %v1993_v61 = vmul.f32 %v3696_v39, %v1823_v24  ;;  %v2542_v28 = vadd.f32 %v2541_v19, %v4227_v0  ;;  %v4521_v39 = vld [vmem:[#allocation24_spill] sm:$0xff] }
 0x143   :  { %v4205_v56 = vpop.permute.xlu0 %2235  ;;  %v2283_v60 = vmul.f32 %v4518_v59, %v2059_v54  ;;  %v4246_v47 = vadd.f32 %v4519_v33, %v2281_v9  ;;  %v2024_v40 = vadd.f32 %v1992_v51, %v1950_v29  ;;  %v1951_v2 = vadd.f32 %v1919_v31, %v1877_v18 }
 0x144   :  { %v2288_v38 = vmul.f32 %v4520_v55, %v2064_v48  ;;  %v4250_v26 = vadd.f32 %v4138_v16, %v2286_v13  ;;  %v2023_v46 = vadd.f32 %v1991_v62, %v1949_v5  ;;  %v2526_v41 = vadd.f32 %v2525_v30, %v4234_v63  ;;  %v2653_v55 = vld [vmem:[%s4465_s10 + $0x8] sm:$0xff] }
 0x145   :  { %v2285_v34 = vmul.f32 %v4521_v39, %v2061_v14  ;;  %v4255_v24 = vadd.f32 %v4140_v45, %v2283_v60  ;;  %v2026_v19 = vadd.f32 %v1994_v58, %v1952_v57  ;;  %v2543_v54 = vadd.f32 %v2542_v28, %v4240_v10  ;;  %v2683_v39 = vld [vmem:[%s4466_s12 + $0x8] sm:$0xff] }
 0x146   :  { %v2465_v50 = vpop.permute.xlu1 %2464  ;;  %v2290_v9 = vmul.f32 %v4148_v3, %v2066_v32  ;;  %v4260_v29 = vadd.f32 %v4176_v25, %v2288_v38  ;;  %v2025_v16 = vadd.f32 %v1993_v61, %v1951_v2  ;;  %v2527_v51 = vadd.f32 %v2526_v41, %v4246_v47  ;;  %v2638_v38 = vld [vmem:[%s4464_s9] sm:$0xff] }
 0x147   :  { %v2450_v8 = vpop.permute.xlu0 %2449  ;;  %v2287_v30 = vmul.f32 %v4150_v12, %v2063_v20  ;;  %v4265_v14 = vadd.f32 %v4178_v17, %v2285_v34  ;;  %v2068_v45 = vadd.f32 %v3708_v44, %v2024_v40  ;;  %v2544_v11 = vadd.f32 %v2543_v54, %v4250_v26  ;;  %v2652_v41 = vld [vmem:[%s4465_s10] sm:$0xff] }
 0x148   :  { %v4269_v31 = vadd.f32 %v2465_v50, %v2290_v9  ;;  %v2067_v3 = vadd.f32 %v3706_v43, %v2023_v46  ;;  %v2528_v25 = vadd.f32 %v2527_v51, %v4255_v24  ;;  %v2289_v62 = vmul.f32 %v4205_v56, %v2065_v36  ;;  %v2682_v46 = vld [vmem:[%s4466_s12] sm:$0xff] }
 0x149   :  { %v2292_v32 = vmul.f32 %v4203_v21, %v2068_v45  ;;  %v4275_v52 = vadd.f32 %v2450_v8, %v2287_v30  ;;  %v2545_v12 = vadd.f32 %v2544_v11, %v4260_v29  ;;  %v2070_v17 = vadd.f32 %v3708_v44, %v2026_v19  ;;  %v2680_v34 = vld [vmem:[%s4467_s11] sm:$0xff] }
 0x14a   :  { %v2261_v37 = vpop.permute.xlu1 %2260  ;;  %v2069_v5 = vadd.f32 %v3706_v43, %v2025_v16  ;;  %v2529_v50 = vadd.f32 %v2528_v25, %v4265_v14  ;;  %3056 = vmatprep.mubr.msk.f32.mxu0 %vm2694_vm2, %v2680_v34  ;;  %v2898_v11 = vld [vmem:[%s4468_s13] ss:$0 sm:$0xff] }
 0x14b   :  { %v2246_v35 = vpop.permute.xlu0 %2245  ;;  %v2546_v21 = vadd.f32 %v2545_v12, %v4269_v31  ;;  %v2294_v8 = vmul.f32 %v2261_v37, %v2070_v17 }
 0x14c   :  { %v2291_v57 = vmul.f32 %v2246_v35, %v2067_v3  ;;  %v2530_v56 = vadd.f32 %v2529_v50, %v4275_v52  ;;  %v2899_v3 = vld [vmem:[%s4468_s13 + $0x2] ss:$0 sm:$0xff] }
 0x14e   :  { %v2475_v48 = vpop.permute.xlu1 %2474 }
 0x14f   :  { %v2460_v18 = vpop.permute.xlu0 %2459  ;;  %v4281_v49 = vadd.f32 %v2475_v48, %v2292_v32 }
 0x150   :  { %v4283_v13 = vadd.f32 %v2460_v18, %v2289_v62 }
 0x151   :  { %v2547_v28 = vadd.f32 %v2546_v21, %v4281_v49 }
 0x152   :  { %v2470_v20 = vpop.permute.xlu1 %2469  ;;  %v2531_v43 = vadd.f32 %v2530_v56, %v4283_v13 }
 0x153   :  { %v2256_v58 = vpop.permute.xlu0 %2255  ;;  %v4287_v36 = vadd.f32 %v2470_v20, %v2291_v57 }
 0x154   :  { %v2293_v7 = vmul.f32 %v2256_v58, %v2069_v5 }
 0x155   :  { %v2532_v60 = vadd.f32 %v2531_v43, %v4287_v36 }
 0x156   :  { %v2480_v44 = vpop.permute.xlu1 %2479 }
 0x157   :  { %v2485_v61 = vpop.permute.xlu0 %2484  ;;  %v4291_v59 = vadd.f32 %v2480_v44, %v2293_v7 }
 0x158   :  { %v4293_v35 = vadd.f32 %v2485_v61, %v2294_v8 }
 0x159   :  { %v2533_v40 = vadd.f32 %v2532_v60, %v4291_v59 }
 0x15a   :  { %v2548_v33 = vadd.f32 %v2547_v28, %v4293_v35  ;;  %v2592_v54 = vpop.permute.xlu1 %2591 }
 0x15b   :  { %v2550_v2 = vmul.f32 0.0625, %v2533_v40  ;;  %v2580_v19 = vpop.permute.xlu0 %2579 }
 0x15c   :  { %v2551_v37 = vmul.f32 0.0625, %v2548_v33 }
 0x15e   :  { %2600 = vrot.lane.b32.xlu0 %v2551_v37, %s3073_s23  ;;  %2562 = vrot.lane.b32.xlu1 %v2551_v37, %s3074_s1  ;;  %v2587_v48 = vpop.permute.xlu1 %2586  ;;  %v2595_v17 = vmul.f32 %v2592_v54, %v2551_v37 }
 0x15f   :  { %v2575_v9 = vpop.permute.xlu0 %2574  ;;  %v2594_v8 = vmul.f32 %v2587_v48, %v2550_v2 }
 0x162   :  { %2598 = vrot.lane.b32.xlu0 %v2550_v2, %s3073_s23  ;;  %2560 = vrot.lane.b32.xlu1 %v2550_v2, %s3074_s1  ;;  %v2634_v16 = vpop.permute.xlu1 %2633 }
 0x163   :  { %v2618_v18 = vpop.permute.xlu0 %2617 }
 0x166   :  { %2661 = vperm.xlu0 %3062, %v2653_v55   ;;  %2642 = vperm.xlu1 %3063, %v2638_v38   ;;  %v2629_v30 = vpop.permute.xlu1 %2628 }
 0x167   :  { %v2613_v51 = vpop.permute.xlu0 %2612 }
 0x16a   :  { %2686 = vperm.xlu0 %3062, %v2682_v46   ;;  %2656 = vperm.xlu1 %3063, %v2652_v41  }
 0x16b   :  { %v2648_v45 = vpop.permute.xlu0 %2647 }
 0x16e   :  { %2691 = vperm.xlu1 %3063, %v2683_v39  }
 0x1d0   :  { %v2601_v25 = vpop.permute.xlu0 %2600  ;;  %v2563_v32 = vpop.permute.xlu1 %2562 }
 0x1d1   :  { %v2571_v62 = vmul.f32 %v2898_v11, %v2563_v32  ;;  %v2609_v12 = vmul.f32 %v2899_v3, %v2601_v25  ;;  %v4522_v32 = vld [vmem:[#allocation5_spill] sm:$0xff] }
 0x1d3   :  { %v2583_v20 = vmul.f32 %v2580_v19, %v2571_v62  ;;  %v2621_v21 = vmul.f32 %v2618_v18, %v2609_v12  ;;  %v4523_v12 = vld [vmem:[#allocation6_spill] sm:$0xff] }
 0x1d4   :  { %v2561_v58 = vpop.permute.xlu1 %2560  ;;  %v2599_v50 = vpop.permute.xlu0 %2598 }
 0x1d5   :  { %v2597_v5 = vadd.f32 %v2595_v17, %v2583_v20  ;;  %v2570_v57 = vmul.f32 %v2898_v11, %v2561_v58  ;;  %v2608_v7 = vmul.f32 %v2899_v3, %v2599_v50 }
 0x1d7   :  { %v2582_v56 = vmul.f32 %v2575_v9, %v2570_v57  ;;  %v2623_v44 = vadd.f32 %v2621_v21, %v2597_v5  ;;  %v2620_v28 = vmul.f32 %v2613_v51, %v2608_v7 }
 0x1d9   :  { %v2596_v61 = vadd.f32 %v2594_v8, %v2582_v56  ;;  %v2637_v43 = vadd.f32 %v2634_v16, %v2623_v44 }
 0x1db   :  { %v2622_v60 = vadd.f32 %v2620_v28, %v2596_v61  ;;  %v2651_v33 = vmul.f32 %v2648_v45, %v2637_v43  ;;  %v4528_v43 = vld [vmem:[#allocation11_spill] sm:$0xff] }
 0x1dd   :  { %v2636_v46 = vadd.f32 %v2629_v30, %v2622_v60  ;;  %v2681_v30 = vld [vmem:[%s4467_s11 + $0x8] sm:$0xff] }
 0x1e1   :  { %v2662_v40 = vpop.permute.xlu0 %2661  ;;  %v2643_v55 = vpop.permute.xlu1 %2642 }
 0x1e2   :  { %v2665_v38 = vadd.f32 %v2662_v40, %v2651_v33  ;;  %v2650_v41 = vmul.f32 %v2643_v55, %v2636_v46  ;;  %v4529_v33 = vld [vmem:[#allocation9_spill] sm:$0xff] }
 0x1e4   :  { %v2901_v37 = vmul.f32 -1.442695, %v2665_v38 }
 0x1e5   :  { %v2657_v39 = vpop.permute.xlu1 %2656 }
 0x1e6   :  { %3064 = vpow2.f32 %v2901_v37  ;;  %v2664_v34 = vadd.f32 %v2657_v39, %v2650_v41 }
 0x1e8   :  { %v2900_v19 = vmul.f32 -1.442695, %v2664_v34 }
 0x1e9   :  { %v2692_v11 = vpop.permute.xlu1 %2691 }
 0x1ea   :  { %3066 = vpow2.f32 %v2900_v19 }
 0x1f3   :  { %v3065_v54 = vpop.eup %3064 }
 0x1f4   :  { %v2673_v2 = vadd.f32 1.0, %v3065_v54 }
 0x1f6   :  { %3068 = vrcp.f32 %v2673_v2 }
 0x1f7   :  { %v3067_v9 = vpop.eup %3066 }
 0x1f8   :  { %v2672_v48 = vadd.f32 1.0, %v3067_v9 }
 0x1fa   :  { %3070 = vrcp.f32 %v2672_v48 }
 0x203   :  { %v3069_v18 = vpop.eup %3068 }
 0x204   :  { %v2679_v16 = vmul.f32 %v3069_v18, %v2665_v38 }
 0x206   :  { %3052 = vmatprep.subr.mxu0 %v2679_v16 }
 0x207   :  { %v3071_v51 = vpop.eup %3070  ;;  %3053 = vmatpush3.msra.mxu0 %v2679_v16 }
 0x208   :  { %v2678_v45 = vmul.f32 %v3071_v51, %v2664_v34 }
 0x20a   :  { %3054 = vmatprep.subr.mxu0 %v2678_v45 }
 0x20b   :  { %3055 = vmatpush3.msra.mxu0 %v2678_v45 }
 0x20c   :  { %3057 = vmatmul.mubr.msk.f32.vlgmr.msra.gmra.mxu0 %vm2694_vm2, %v2681_v30 }
 0x2cc   :  { %v3058_v3 = vpop.f32.mrf.mxu0 }
 0x2cd   :  { %v2773_v25 = vadd.f32 %v3058_v3, %v2692_v11 }
 0x2ce   :  { %v2767_v56 = vpop.f32.mrf.mxu0 }
 0x2cf   :  { %v2777_v62 = vadd.f32 %v2773_v25, %v4522_v32  ;;  %v2779_v17 = vadd.f32 %v2773_v25, %v4523_v12  ;;  %v2781_v20 = vadd.f32 %v2773_v25, %v3919_v1  ;;  %v2783_v58 = vadd.f32 %v2773_v25, %v3926_v22  ;;  %v2687_v1 = vpop.permute.xlu0 %2686 }
 0x2d0   :  { %v2785_v5 = vadd.f32 %v2773_v25, %v3938_v15  ;;  %v2787_v50 = vadd.f32 %v2773_v25, %v4505_v23  ;;  %v2789_v57 = vadd.f32 %v2773_v25, %v4039_v53  ;;  %v2791_v21 = vadd.f32 %v2773_v25, %v4171_v27 }
 0x2d1   :  { %v2793_v8 = vadd.f32 %v2773_v25, %v4211_v4  ;;  %v2795_v7 = vadd.f32 %v2773_v25, %v4227_v0  ;;  %v2797_v44 = vadd.f32 %v2773_v25, %v4240_v10  ;;  %v2799_v61 = vadd.f32 %v2773_v25, %v4250_v26  ;;  %2809 = vst [vmem:[%s4469_s14 + $0x8] sm:$0xff] %v2777_v62  ;;  %v4524_v0 = vld [vmem:[#allocation3_spill] sm:$0xff]  ;;  %v4525_v26 = vld [vmem:[#allocation4_spill] sm:$0xff] }
 0x2d2   :  { %2811 = vst [vmem:[%s4469_s14 + $0x18] sm:$0xff] %v2779_v17  ;;  %2813 = vst [vmem:[%s4469_s14 + $0x28] sm:$0xff] %v2781_v20  ;;  %v2801_v22 = vadd.f32 %v2773_v25, %v4260_v29  ;;  %v2803_v15 = vadd.f32 %v2773_v25, %v4269_v31  ;;  %v2805_v53 = vadd.f32 %v2773_v25, %v4281_v49  ;;  %v4526_v31 = vld [vmem:[#allocation7_spill] sm:$0xff] }
 0x2d3   :  { %2815 = vst [vmem:[%s4469_s14 + $0x38] sm:$0xff] %v2783_v58  ;;  %v2807_v23 = vadd.f32 %v2773_v25, %v4293_v35  ;;  %2817 = vst [vmem:[%s4469_s14 + $0x48] sm:$0xff] %v2785_v5  ;;  %v2768_v27 = vadd.f32 %v2767_v56, %v2687_v1  ;;  %v4527_v35 = vld [vmem:[#allocation8_spill] sm:$0xff] }
 0x2d4   :  { %2819 = vst [vmem:[%s4469_s14 + $0x58] sm:$0xff] %v2787_v50  ;;  %2821 = vst [vmem:[%s4469_s14 + $0x68] sm:$0xff] %v2789_v57 }
 0x2d5   :  { %2823 = vst [vmem:[%s4469_s14 + $0x78] sm:$0xff] %v2791_v21  ;;  %2825 = vst [vmem:[%s4469_s14 + $0x88] sm:$0xff] %v2793_v8  ;;  %v2776_v4 = vadd.f32 %v2768_v27, %v3849_v6  ;;  %v2778_v10 = vadd.f32 %v2768_v27, %v4524_v0  ;;  %v2780_v29 = vadd.f32 %v2768_v27, %v4525_v26 }
 0x2d6   :  { %2827 = vst [vmem:[%s4469_s14 + $0x98] sm:$0xff] %v2795_v7  ;;  %2829 = vst [vmem:[%s4469_s14 + $0xa8] sm:$0xff] %v2797_v44  ;;  %v2782_v49 = vadd.f32 %v2768_v27, %v4526_v31  ;;  %v2784_v28 = vadd.f32 %v2768_v27, %v4527_v35  ;;  %v2786_v60 = vadd.f32 %v2768_v27, %v4528_v43 }
 0x2d7   :  { %2831 = vst [vmem:[%s4469_s14 + $0xb8] sm:$0xff] %v2799_v61  ;;  %2833 = vst [vmem:[%s4469_s14 + $0xc8] sm:$0xff] %v2801_v22  ;;  %v2788_v40 = vadd.f32 %v2768_v27, %v4529_v33  ;;  %v2790_v55 = vadd.f32 %v2768_v27, %v4199_v42  ;;  %v2792_v38 = vadd.f32 %v2768_v27, %v4234_v63 }
 0x2d8   :  { %2835 = vst [vmem:[%s4469_s14 + $0xd8] sm:$0xff] %v2803_v15  ;;  %2837 = vst [vmem:[%s4469_s14 + $0xe8] sm:$0xff] %v2805_v53  ;;  %v2794_v46 = vadd.f32 %v2768_v27, %v4246_v47  ;;  %v2796_v6 = vadd.f32 %v2768_v27, %v4255_v24  ;;  %v2798_v37 = vadd.f32 %v2768_v27, %v4265_v14 }
 0x2d9   :  { %2839 = vst [vmem:[%s4469_s14 + $0xf8] sm:$0xff] %v2807_v23  ;;  %2808 = vst [vmem:[%s4469_s14] sm:$0xff] %v2776_v4  ;;  %v2800_v42 = vadd.f32 %v2768_v27, %v4275_v52  ;;  %v2802_v63 = vadd.f32 %v2768_v27, %v4283_v13  ;;  %v2804_v47 = vadd.f32 %v2768_v27, %v4287_v36 }
 0x2da   :  { %2810 = vst [vmem:[%s4469_s14 + $0x10] sm:$0xff] %v2778_v10  ;;  %2812 = vst [vmem:[%s4469_s14 + $0x20] sm:$0xff] %v2780_v29  ;;  %v2806_v24 = vadd.f32 %v2768_v27, %v4291_v59 }
 0x2db   :  { %2814 = vst [vmem:[%s4469_s14 + $0x30] sm:$0xff] %v2782_v49  ;;  %2816 = vst [vmem:[%s4469_s14 + $0x40] sm:$0xff] %v2784_v28 }
 0x2dc   :  { %2818 = vst [vmem:[%s4469_s14 + $0x50] sm:$0xff] %v2786_v60  ;;  %2820 = vst [vmem:[%s4469_s14 + $0x60] sm:$0xff] %v2788_v40 }
 0x2dd   :  { %2822 = vst [vmem:[%s4469_s14 + $0x70] sm:$0xff] %v2790_v55  ;;  %2824 = vst [vmem:[%s4469_s14 + $0x80] sm:$0xff] %v2792_v38 }
 0x2de   :  { %2826 = vst [vmem:[%s4469_s14 + $0x90] sm:$0xff] %v2794_v46  ;;  %2828 = vst [vmem:[%s4469_s14 + $0xa0] sm:$0xff] %v2796_v6 }
 0x2df   :  { %2830 = vst [vmem:[%s4469_s14 + $0xb0] sm:$0xff] %v2798_v37  ;;  %2832 = vst [vmem:[%s4469_s14 + $0xc0] sm:$0xff] %v2800_v42 }
 0x2e0   :  { %2834 = vst [vmem:[%s4469_s14 + $0xd0] sm:$0xff] %v2802_v63  ;;  %2836 = vst [vmem:[%s4469_s14 + $0xe0] sm:$0xff] %v2804_v47 }
 0x2e1   :  { %2838 = vst [vmem:[%s4469_s14 + $0xf0] sm:$0xff] %v2806_v24 }

</bundles_post_ra>
